<compile_context>
chip_gen: v6e
topology: v6e:2x2x1
jax: 0.10.0
libtpu: 0.0.40
codegen_flags: <defaults>
</compile_context>

<pallas_src>
import jax
import jax.numpy as jnp
from jax.experimental import pallas as pl
from jax.experimental.pallas import tpu as pltpu


def _largest_divisor_leq(n, cap):
    cap = int(max(1, min(n, cap)))
    for d in range(cap, 0, -1):
        if n % d == 0:
            return d
    return 1


def _choose_tiles(B, C, HW, itemsize):
    """Pick (bblk, cblk, sblk) so one input block stays <= ~2 MiB.

    With double buffering plus the small output block this is comfortably
    inside every chip's default scoped VMEM (v5e 16 MiB, v6e 32 MiB,
    v7x 32 MiB default / 64 MiB physical), so no vmem_limit override needed.
    """
    budget = 2 * 1024 * 1024
    # When B == 1, split the flat spatial dim so both v7x TensorCores get work.
    if B == 1 and HW >= 512 and HW % 256 == 0:
        sblk = HW // 2
    else:
        sblk = HW
    row_bytes = max(1, sblk * itemsize)
    max_c = max(1, budget // row_bytes)
    if C <= max_c:
        cblk = C
        bblk = _largest_divisor_leq(B, max(1, budget // (C * row_bytes)))
    else:
        # Tile C; keep the second-minor block dim a multiple of 8 (layout rule).
        if C % 8 == 0 and max_c >= 8:
            cblk = 8 * _largest_divisor_leq(C // 8, max_c // 8)
        else:
            cblk = C
        bblk = 1
    return bblk, cblk, sblk


def _reduce_kernel(x_ref, o_ref):
    """Channel sum + channel max over a lane-dense (bblk, cblk, sblk) block."""
    c = pl.program_id(2)                       # reduction axis (last, "arbitrary")
    xb = x_ref[...].astype(jnp.float32)        # (bblk, cblk, sblk)
    psum = jnp.sum(xb, axis=1)                 # (bblk, sblk) full-lane-width adds
    pmax = jnp.max(xb, axis=1)

    @pl.when(c == 0)
    def _():
        o_ref[:, 0, :] = psum
        o_ref[:, 1, :] = pmax

    @pl.when(c > 0)
    def _():
        o_ref[:, 0, :] = o_ref[:, 0, :] + psum
        o_ref[:, 1, :] = jnp.maximum(o_ref[:, 1, :], pmax)


def spatial_attention_pallas(x, w, kernel_size):
    """x: (B, C, H, W), w: (1, 2, K, K) conv weight (no bias)."""
    assert kernel_size in (7, 3)
    pad = 3 if kernel_size == 7 else 1
    K = kernel_size
    B, C, H, W = x.shape
    HW = H * W
    Hp, Wp = H + 2 * pad, W + 2 * pad

    # ---------------- stage 1: lane-dense channel reduction over unpadded x --
    x_flat = x.reshape(B, C, HW)               # free: contiguous NCHW reshape
    bblk, cblk, sblk = _choose_tiles(B, C, HW, x.dtype.itemsize)
    grid = (B // bblk, HW // sblk, C // cblk)

    red = pl.pallas_call(
        _reduce_kernel,
        out_shape=jax.ShapeDtypeStruct((B, 2, HW), jnp.float32),
        grid=grid,
        in_specs=[pl.BlockSpec((bblk, cblk, sblk), lambda b, s, c: (b, c, s))],
        out_specs=pl.BlockSpec((bblk, 2, sblk), lambda b, s, c: (b, 0, s)),
        compiler_params=pltpu.CompilerParams(
            dimension_semantics=("parallel", "parallel", "arbitrary")),
    )(x_flat)

    # ------------- tiny glue: pad only the reduced maps (2/C of x's bytes) ---
    maps = red.reshape(B, 2, H, W)
    maps_p = jnp.pad(maps, ((0, 0), (0, 0), (pad, pad), (pad, pad)))

    # Fold 1/C into the avg-channel weights: stage 1 stores raw channel sums,
    # and the conv result is unchanged because the weights act linearly.
    w_scaled = w.astype(jnp.float32) * jnp.array(
        [1.0 / C, 1.0], jnp.float32).reshape(1, 2, 1, 1)
    w_flat = w_scaled.reshape(-1)              # index = c*K*K + kh*K + kw

    # ---------------- stage 2: KxK conv (VPU shifted MACs) + sigmoid ---------
    def conv_kernel(w_ref, m_ref, o_ref):
        summ = m_ref[0, 0]                     # (Hp, Wp) channel-sum map
        mx = m_ref[0, 1]                       # (Hp, Wp) channel-max map
        acc = jnp.zeros((H, W), jnp.float32)
        for kw in range(K):                    # hoist lane-direction shift
            s_col = summ[:, kw:kw + W]         # (Hp, W): one lane shift / (ch, kw)
            m_col = mx[:, kw:kw + W]
            for kh in range(K):                # sublane slices are cheap
                wa = w_ref[kh * K + kw]        # scalar from SMEM (avg ch, pre /C)
                wm = w_ref[K * K + kh * K + kw]
                acc = acc + wa * s_col[kh:kh + H, :] + wm * m_col[kh:kh + H, :]
        o_ref[0, 0] = jax.nn.sigmoid(acc).astype(o_ref.dtype)

    out = pl.pallas_call(
        conv_kernel,
        out_shape=jax.ShapeDtypeStruct((B, 1, H, W), x.dtype),
        grid=(B,),
        in_specs=[
            pl.BlockSpec(memory_space=pltpu.SMEM),                    # weights
            pl.BlockSpec((1, 2, Hp, Wp), lambda b: (b, 0, 0, 0)),     # padded maps
        ],
        out_specs=pl.BlockSpec((1, 1, H, W), lambda b: (b, 0, 0, 0)),
        compiler_params=pltpu.CompilerParams(
            dimension_semantics=("parallel",)),
    )(w_flat, maps_p)

    return out


def spatial_attention_ref(x, w, kernel_size):
    """Pure-JAX reference matching the PyTorch forward exactly."""
    pad = 3 if kernel_size == 7 else 1
    avg = jnp.mean(x, axis=1, keepdims=True)
    mx = jnp.max(x, axis=1, keepdims=True)
    cat = jnp.concatenate([avg, mx], axis=1)
    out = jax.lax.conv_general_dilated(
        cat, w, window_strides=(1, 1),
        padding=[(pad, pad), (pad, pad)],
        dimension_numbers=("NCHW", "OIHW", "NCHW"))
    return jax.nn.sigmoid(out)


if __name__ == "__main__":
    kernel_size = 7
    B, C, H, W = 2, 4, 16, 16

    key = jax.random.PRNGKey(0)
    kx, kw = jax.random.split(key)

    x = jax.random.normal(kx, (B, C, H, W), dtype=jnp.float32)

    # Deterministic conv weight init (PyTorch-style uniform, fan_in = 2*K*K).
    fan_in = 2 * kernel_size * kernel_size
    bound = 1.0 / (fan_in ** 0.5)
    w = jax.random.uniform(kw, (1, 2, kernel_size, kernel_size),
                           dtype=jnp.float32, minval=-bound, maxval=bound)

    fn = jax.jit(spatial_attention_pallas, static_argnums=2)
    out = fn(x, w, kernel_size)
    out = jax.block_until_ready(out)

    ref = spatial_attention_ref(x, w, kernel_size)
    assert out.shape == (B, 1, H, W)
    assert jnp.allclose(out, ref, atol=1e-5, rtol=1e-5), "mismatch vs reference"

    print("KERNEL_OK")
</pallas_src>

<mosaic_0001>
module attributes {stable_mosaic.version = 11 : i64} {
  func.func @_reduce_kernel(%arg0: i32, %arg1: i32, %arg2: i32, %arg3: memref<2x4x256xf32, #tpu.memory_space<vmem>>, %arg4: memref<2x2x256xf32, #tpu.memory_space<vmem>>) attributes {dimension_semantics = [#tpu.dimension_semantics<parallel>, #tpu.dimension_semantics<parallel>, #tpu.dimension_semantics<arbitrary>], iteration_bounds = array<i64: 1, 1, 1>, scalar_prefetch = 0 : i64, scratch_operands = 0 : i64, tpu.core_type = #tpu.core_type<tc>, window_params = [{transform_indices = @transform_0, window_bounds = array<i64: 2, 4, 256>}, {transform_indices = @transform_1, window_bounds = array<i64: 2, 2, 256>}]} {
    %c0 = arith.constant 0 : index
    %c0_0 = arith.constant 0 : index
    %c0_1 = arith.constant 0 : index
    %0 = vector.load %arg3[%c0, %c0_0, %c0_1] : memref<2x4x256xf32, #tpu.memory_space<vmem>>, vector<2x4x256xf32>
    %cst = arith.constant dense<0.000000e+00> : vector<2x256xf32>
    %1 = vector.multi_reduction <add>, %0, %cst [1] : vector<2x4x256xf32> to vector<2x256xf32>
    %cst_2 = arith.constant dense<0xFF800000> : vector<2x256xf32>
    %2 = vector.multi_reduction <maximumf>, %0, %cst_2 [1] : vector<2x4x256xf32> to vector<2x256xf32>
    %c0_i32 = arith.constant 0 : i32
    %3 = arith.cmpi eq, %arg2, %c0_i32 : i32
    %4 = arith.extui %3 : i1 to i32
    %c0_i32_3 = arith.constant 0 : i32
    %5 = arith.cmpi ne, %4, %c0_i32_3 : i32
    scf.if %5 {
      %c0_6 = arith.constant 0 : index
      %c0_7 = arith.constant 0 : index
      %c0_8 = arith.constant 0 : index
      %9 = vector.load %arg4[%c0_6, %c0_7, %c0_8] : memref<2x2x256xf32, #tpu.memory_space<vmem>>, vector<2x1x256xf32>
      %10 = vector.shape_cast %9 : vector<2x1x256xf32> to vector<2x256xf32>
      %11 = vector.shape_cast %1 : vector<2x256xf32> to vector<2x1x256xf32>
      tpu.vector_store %arg4[%c0_6, %c0_7, %c0_8], %11 {strides = array<i32>} : memref<2x2x256xf32, #tpu.memory_space<vmem>>, vector<2x1x256xf32>,
      %c0_9 = arith.constant 0 : index
      %c1 = arith.constant 1 : index
      %c0_10 = arith.constant 0 : index
      %12 = vector.load %arg4[%c0_9, %c1, %c0_10] : memref<2x2x256xf32, #tpu.memory_space<vmem>>, vector<2x1x256xf32>
      %13 = vector.shape_cast %12 : vector<2x1x256xf32> to vector<2x256xf32>
      %14 = vector.shape_cast %2 : vector<2x256xf32> to vector<2x1x256xf32>
      tpu.vector_store %arg4[%c0_9, %c1, %c0_10], %14 {strides = array<i32>} : memref<2x2x256xf32, #tpu.memory_space<vmem>>, vector<2x1x256xf32>,
    } else {
    }
    %c0_i32_4 = arith.constant 0 : i32
    %6 = arith.cmpi sgt, %arg2, %c0_i32_4 : i32
    %7 = arith.extui %6 : i1 to i32
    %c0_i32_5 = arith.constant 0 : i32
    %8 = arith.cmpi ne, %7, %c0_i32_5 : i32
    scf.if %8 {
      %c0_6 = arith.constant 0 : index
      %c0_7 = arith.constant 0 : index
      %c0_8 = arith.constant 0 : index
      %9 = vector.load %arg4[%c0_6, %c0_7, %c0_8] : memref<2x2x256xf32, #tpu.memory_space<vmem>>, vector<2x1x256xf32>
      %10 = vector.shape_cast %9 : vector<2x1x256xf32> to vector<2x256xf32>
      %11 = arith.addf %10, %1 : vector<2x256xf32>
      %c0_9 = arith.constant 0 : index
      %c0_10 = arith.constant 0 : index
      %c0_11 = arith.constant 0 : index
      %12 = vector.load %arg4[%c0_9, %c0_10, %c0_11] : memref<2x2x256xf32, #tpu.memory_space<vmem>>, vector<2x1x256xf32>
      %13 = vector.shape_cast %12 : vector<2x1x256xf32> to vector<2x256xf32>
      %14 = vector.shape_cast %11 : vector<2x256xf32> to vector<2x1x256xf32>
      tpu.vector_store %arg4[%c0_9, %c0_10, %c0_11], %14 {strides = array<i32>} : memref<2x2x256xf32, #tpu.memory_space<vmem>>, vector<2x1x256xf32>,
      %c0_12 = arith.constant 0 : index
      %c1 = arith.constant 1 : index
      %c0_13 = arith.constant 0 : index
      %15 = vector.load %arg4[%c0_12, %c1, %c0_13] : memref<2x2x256xf32, #tpu.memory_space<vmem>>, vector<2x1x256xf32>
      %16 = vector.shape_cast %15 : vector<2x1x256xf32> to vector<2x256xf32>
      %17 = arith.maximumf %16, %2 : vector<2x256xf32>
      %c0_14 = arith.constant 0 : index
      %c1_15 = arith.constant 1 : index
      %c0_16 = arith.constant 0 : index
      %18 = vector.load %arg4[%c0_14, %c1_15, %c0_16] : memref<2x2x256xf32, #tpu.memory_space<vmem>>, vector<2x1x256xf32>
      %19 = vector.shape_cast %18 : vector<2x1x256xf32> to vector<2x256xf32>
      %20 = vector.shape_cast %17 : vector<2x256xf32> to vector<2x1x256xf32>
      tpu.vector_store %arg4[%c0_14, %c1_15, %c0_16], %20 {strides = array<i32>} : memref<2x2x256xf32, #tpu.memory_space<vmem>>, vector<2x1x256xf32>,
    } else {
    }
    return
  }
  func.func @transform_0(%arg0: i32, %arg1: i32, %arg2: i32) -> (i32, i32, i32) {
    %c0_i32 = arith.constant 0 : i32
    return %arg0, %arg2, %arg1 : i32, i32, i32
  }
  func.func @transform_1(%arg0: i32, %arg1: i32, %arg2: i32) -> (i32, i32, i32) {
    %c0_i32 = arith.constant 0 : i32
    %c0_i32_0 = arith.constant 0 : i32
    return %arg0, %c0_i32, %arg1 : i32, i32, i32
  }
}

module attributes {stable_mosaic.version = 11 : i64} {
  func.func @conv_kernel(%arg0: i32, %arg1: memref<98xf32, #tpu.memory_space<smem>>, %arg2: memref<1x2x22x22xf32, #tpu.memory_space<vmem>>, %arg3: memref<1x1x16x16xf32, #tpu.memory_space<vmem>>) attributes {dimension_semantics = [#tpu.dimension_semantics<parallel>], iteration_bounds = array<i64: 2>, scalar_prefetch = 0 : i64, scratch_operands = 0 : i64, tpu.core_type = #tpu.core_type<tc>, window_params = [{transform_indices = @transform_0, window_bounds = array<i64: 98>}, {transform_indices = @transform_1, window_bounds = array<i64: 1, 2, 22, 22>}, {transform_indices = @transform_2, window_bounds = array<i64: 1, 1, 16, 16>}]} {
    %c0 = arith.constant 0 : index
    %c0_0 = arith.constant 0 : index
    %c0_1 = arith.constant 0 : index
    %c0_2 = arith.constant 0 : index
    %0 = vector.load %arg2[%c0, %c0_0, %c0_1, %c0_2] : memref<1x2x22x22xf32, #tpu.memory_space<vmem>>, vector<1x1x22x22xf32>
    %1 = vector.shape_cast %0 : vector<1x1x22x22xf32> to vector<22x22xf32>
    %c0_3 = arith.constant 0 : index
    %c1 = arith.constant 1 : index
    %c0_4 = arith.constant 0 : index
    %c0_5 = arith.constant 0 : index
    %2 = vector.load %arg2[%c0_3, %c1, %c0_4, %c0_5] : memref<1x2x22x22xf32, #tpu.memory_space<vmem>>, vector<1x1x22x22xf32>
    %3 = vector.shape_cast %2 : vector<1x1x22x22xf32> to vector<22x22xf32>
    %cst = arith.constant 0.000000e+00 : f32
    %4 = vector.broadcast %cst : f32 to vector<16x16xf32>
    %5 = vector.extract_strided_slice %1 {offsets = [0, 0], sizes = [22, 16], strides = [1, 1]} : vector<22x22xf32> to vector<22x16xf32>
    %6 = vector.extract_strided_slice %3 {offsets = [0, 0], sizes = [22, 16], strides = [1, 1]} : vector<22x22xf32> to vector<22x16xf32>
    %c0_6 = arith.constant 0 : index
    %7 = memref.load %arg1[%c0_6] : memref<98xf32, #tpu.memory_space<smem>>
    %c49 = arith.constant 49 : index
    %8 = memref.load %arg1[%c49] : memref<98xf32, #tpu.memory_space<smem>>
    %9 = vector.extract_strided_slice %5 {offsets = [0, 0], sizes = [16, 16], strides = [1, 1]} : vector<22x16xf32> to vector<16x16xf32>
    %10 = vector.broadcast %7 : f32 to vector<16x16xf32>
    %11 = arith.mulf %10, %9 : vector<16x16xf32>
    %12 = arith.addf %4, %11 : vector<16x16xf32>
    %13 = vector.extract_strided_slice %6 {offsets = [0, 0], sizes = [16, 16], strides = [1, 1]} : vector<22x16xf32> to vector<16x16xf32>
    %14 = vector.broadcast %8 : f32 to vector<16x16xf32>
    %15 = arith.mulf %14, %13 : vector<16x16xf32>
    %16 = arith.addf %12, %15 : vector<16x16xf32>
    %c7 = arith.constant 7 : index
    %17 = memref.load %arg1[%c7] : memref<98xf32, #tpu.memory_space<smem>>
    %c56 = arith.constant 56 : index
    %18 = memref.load %arg1[%c56] : memref<98xf32, #tpu.memory_space<smem>>
    %19 = vector.extract_strided_slice %5 {offsets = [1, 0], sizes = [16, 16], strides = [1, 1]} : vector<22x16xf32> to vector<16x16xf32>
    %20 = vector.broadcast %17 : f32 to vector<16x16xf32>
    %21 = arith.mulf %20, %19 : vector<16x16xf32>
    %22 = arith.addf %16, %21 : vector<16x16xf32>
    %23 = vector.extract_strided_slice %6 {offsets = [1, 0], sizes = [16, 16], strides = [1, 1]} : vector<22x16xf32> to vector<16x16xf32>
    %24 = vector.broadcast %18 : f32 to vector<16x16xf32>
    %25 = arith.mulf %24, %23 : vector<16x16xf32>
    %26 = arith.addf %22, %25 : vector<16x16xf32>
    %c14 = arith.constant 14 : index
    %27 = memref.load %arg1[%c14] : memref<98xf32, #tpu.memory_space<smem>>
    %c63 = arith.constant 63 : index
    %28 = memref.load %arg1[%c63] : memref<98xf32, #tpu.memory_space<smem>>
    %29 = vector.extract_strided_slice %5 {offsets = [2, 0], sizes = [16, 16], strides = [1, 1]} : vector<22x16xf32> to vector<16x16xf32>
    %30 = vector.broadcast %27 : f32 to vector<16x16xf32>
    %31 = arith.mulf %30, %29 : vector<16x16xf32>
    %32 = arith.addf %26, %31 : vector<16x16xf32>
    %33 = vector.extract_strided_slice %6 {offsets = [2, 0], sizes = [16, 16], strides = [1, 1]} : vector<22x16xf32> to vector<16x16xf32>
    %34 = vector.broadcast %28 : f32 to vector<16x16xf32>
    %35 = arith.mulf %34, %33 : vector<16x16xf32>
    %36 = arith.addf %32, %35 : vector<16x16xf32>
    %c21 = arith.constant 21 : index
    %37 = memref.load %arg1[%c21] : memref<98xf32, #tpu.memory_space<smem>>
    %c70 = arith.constant 70 : index
    %38 = memref.load %arg1[%c70] : memref<98xf32, #tpu.memory_space<smem>>
    %39 = vector.extract_strided_slice %5 {offsets = [3, 0], sizes = [16, 16], strides = [1, 1]} : vector<22x16xf32> to vector<16x16xf32>
    %40 = vector.broadcast %37 : f32 to vector<16x16xf32>
    %41 = arith.mulf %40, %39 : vector<16x16xf32>
    %42 = arith.addf %36, %41 : vector<16x16xf32>
    %43 = vector.extract_strided_slice %6 {offsets = [3, 0], sizes = [16, 16], strides = [1, 1]} : vector<22x16xf32> to vector<16x16xf32>
    %44 = vector.broadcast %38 : f32 to vector<16x16xf32>
    %45 = arith.mulf %44, %43 : vector<16x16xf32>
    %46 = arith.addf %42, %45 : vector<16x16xf32>
    %c28 = arith.constant 28 : index
    %47 = memref.load %arg1[%c28] : memref<98xf32, #tpu.memory_space<smem>>
    %c77 = arith.constant 77 : index
    %48 = memref.load %arg1[%c77] : memref<98xf32, #tpu.memory_space<smem>>
    %49 = vector.extract_strided_slice %5 {offsets = [4, 0], sizes = [16, 16], strides = [1, 1]} : vector<22x16xf32> to vector<16x16xf32>
    %50 = vector.broadcast %47 : f32 to vector<16x16xf32>
    %51 = arith.mulf %50, %49 : vector<16x16xf32>
    %52 = arith.addf %46, %51 : vector<16x16xf32>
    %53 = vector.extract_strided_slice %6 {offsets = [4, 0], sizes = [16, 16], strides = [1, 1]} : vector<22x16xf32> to vector<16x16xf32>
    %54 = vector.broadcast %48 : f32 to vector<16x16xf32>
    %55 = arith.mulf %54, %53 : vector<16x16xf32>
    %56 = arith.addf %52, %55 : vector<16x16xf32>
    %c35 = arith.constant 35 : index
    %57 = memref.load %arg1[%c35] : memref<98xf32, #tpu.memory_space<smem>>
    %c84 = arith.constant 84 : index
    %58 = memref.load %arg1[%c84] : memref<98xf32, #tpu.memory_space<smem>>
    %59 = vector.extract_strided_slice %5 {offsets = [5, 0], sizes = [16, 16], strides = [1, 1]} : vector<22x16xf32> to vector<16x16xf32>
    %60 = vector.broadcast %57 : f32 to vector<16x16xf32>
    %61 = arith.mulf %60, %59 : vector<16x16xf32>
    %62 = arith.addf %56, %61 : vector<16x16xf32>
    %63 = vector.extract_strided_slice %6 {offsets = [5, 0], sizes = [16, 16], strides = [1, 1]} : vector<22x16xf32> to vector<16x16xf32>
    %64 = vector.broadcast %58 : f32 to vector<16x16xf32>
    %65 = arith.mulf %64, %63 : vector<16x16xf32>
    %66 = arith.addf %62, %65 : vector<16x16xf32>
    %c42 = arith.constant 42 : index
    %67 = memref.load %arg1[%c42] : memref<98xf32, #tpu.memory_space<smem>>
    %c91 = arith.constant 91 : index
    %68 = memref.load %arg1[%c91] : memref<98xf32, #tpu.memory_space<smem>>
    %69 = vector.extract_strided_slice %5 {offsets = [6, 0], sizes = [16, 16], strides = [1, 1]} : vector<22x16xf32> to vector<16x16xf32>
    %70 = vector.broadcast %67 : f32 to vector<16x16xf32>
    %71 = arith.mulf %70, %69 : vector<16x16xf32>
    %72 = arith.addf %66, %71 : vector<16x16xf32>
    %73 = vector.extract_strided_slice %6 {offsets = [6, 0], sizes = [16, 16], strides = [1, 1]} : vector<22x16xf32> to vector<16x16xf32>
    %74 = vector.broadcast %68 : f32 to vector<16x16xf32>
    %75 = arith.mulf %74, %73 : vector<16x16xf32>
    %76 = arith.addf %72, %75 : vector<16x16xf32>
    %77 = vector.extract_strided_slice %1 {offsets = [0, 1], sizes = [22, 16], strides = [1, 1]} : vector<22x22xf32> to vector<22x16xf32>
    %78 = vector.extract_strided_slice %3 {offsets = [0, 1], sizes = [22, 16], strides = [1, 1]} : vector<22x22xf32> to vector<22x16xf32>
    %c1_7 = arith.constant 1 : index
    %79 = memref.load %arg1[%c1_7] : memref<98xf32, #tpu.memory_space<smem>>
    %c50 = arith.constant 50 : index
    %80 = memref.load %arg1[%c50] : memref<98xf32, #tpu.memory_space<smem>>
    %81 = vector.extract_strided_slice %77 {offsets = [0, 0], sizes = [16, 16], strides = [1, 1]} : vector<22x16xf32> to vector<16x16xf32>
    %82 = vector.broadcast %79 : f32 to vector<16x16xf32>
    %83 = arith.mulf %82, %81 : vector<16x16xf32>
    %84 = arith.addf %76, %83 : vector<16x16xf32>
    %85 = vector.extract_strided_slice %78 {offsets = [0, 0], sizes = [16, 16], strides = [1, 1]} : vector<22x16xf32> to vector<16x16xf32>
    %86 = vector.broadcast %80 : f32 to vector<16x16xf32>
    %87 = arith.mulf %86, %85 : vector<16x16xf32>
    %88 = arith.addf %84, %87 : vector<16x16xf32>
    %c8 = arith.constant 8 : index
    %89 = memref.load %arg1[%c8] : memref<98xf32, #tpu.memory_space<smem>>
    %c57 = arith.constant 57 : index
    %90 = memref.load %arg1[%c57] : memref<98xf32, #tpu.memory_space<smem>>
    %91 = vector.extract_strided_slice %77 {offsets = [1, 0], sizes = [16, 16], strides = [1, 1]} : vector<22x16xf32> to vector<16x16xf32>
    %92 = vector.broadcast %89 : f32 to vector<16x16xf32>
    %93 = arith.mulf %92, %91 : vector<16x16xf32>
    %94 = arith.addf %88, %93 : vector<16x16xf32>
    %95 = vector.extract_strided_slice %78 {offsets = [1, 0], sizes = [16, 16], strides = [1, 1]} : vector<22x16xf32> to vector<16x16xf32>
    %96 = vector.broadcast %90 : f32 to vector<16x16xf32>
    %97 = arith.mulf %96, %95 : vector<16x16xf32>
    %98 = arith.addf %94, %97 : vector<16x16xf32>
    %c15 = arith.constant 15 : index
    %99 = memref.load %arg1[%c15] : memref<98xf32, #tpu.memory_space<smem>>
    %c64 = arith.constant 64 : index
    %100 = memref.load %arg1[%c64] : memref<98xf32, #tpu.memory_space<smem>>
    %101 = vector.extract_strided_slice %77 {offsets = [2, 0], sizes = [16, 16], strides = [1, 1]} : vector<22x16xf32> to vector<16x16xf32>
    %102 = vector.broadcast %99 : f32 to vector<16x16xf32>
    %103 = arith.mulf %102, %101 : vector<16x16xf32>
    %104 = arith.addf %98, %103 : vector<16x16xf32>
    %105 = vector.extract_strided_slice %78 {offsets = [2, 0], sizes = [16, 16], strides = [1, 1]} : vector<22x16xf32> to vector<16x16xf32>
    %106 = vector.broadcast %100 : f32 to vector<16x16xf32>
    %107 = arith.mulf %106, %105 : vector<16x16xf32>
    %108 = arith.addf %104, %107 : vector<16x16xf32>
    %c22 = arith.constant 22 : index
    %109 = memref.load %arg1[%c22] : memref<98xf32, #tpu.memory_space<smem>>
    %c71 = arith.constant 71 : index
    %110 = memref.load %arg1[%c71] : memref<98xf32, #tpu.memory_space<smem>>
    %111 = vector.extract_strided_slice %77 {offsets = [3, 0], sizes = [16, 16], strides = [1, 1]} : vector<22x16xf32> to vector<16x16xf32>
    %112 = vector.broadcast %109 : f32 to vector<16x16xf32>
    %113 = arith.mulf %112, %111 : vector<16x16xf32>
    %114 = arith.addf %108, %113 : vector<16x16xf32>
    %115 = vector.extract_strided_slice %78 {offsets = [3, 0], sizes = [16, 16], strides = [1, 1]} : vector<22x16xf32> to vector<16x16xf32>
    %116 = vector.broadcast %110 : f32 to vector<16x16xf32>
    %117 = arith.mulf %116, %115 : vector<16x16xf32>
    %118 = arith.addf %114, %117 : vector<16x16xf32>
    %c29 = arith.constant 29 : index
    %119 = memref.load %arg1[%c29] : memref<98xf32, #tpu.memory_space<smem>>
    %c78 = arith.constant 78 : index
    %120 = memref.load %arg1[%c78] : memref<98xf32, #tpu.memory_space<smem>>
    %121 = vector.extract_strided_slice %77 {offsets = [4, 0], sizes = [16, 16], strides = [1, 1]} : vector<22x16xf32> to vector<16x16xf32>
    %122 = vector.broadcast %119 : f32 to vector<16x16xf32>
    %123 = arith.mulf %122, %121 : vector<16x16xf32>
    %124 = arith.addf %118, %123 : vector<16x16xf32>
    %125 = vector.extract_strided_slice %78 {offsets = [4, 0], sizes = [16, 16], strides = [1, 1]} : vector<22x16xf32> to vector<16x16xf32>
    %126 = vector.broadcast %120 : f32 to vector<16x16xf32>
    %127 = arith.mulf %126, %125 : vector<16x16xf32>
    %128 = arith.addf %124, %127 : vector<16x16xf32>
    %c36 = arith.constant 36 : index
    %129 = memref.load %arg1[%c36] : memref<98xf32, #tpu.memory_space<smem>>
    %c85 = arith.constant 85 : index
    %130 = memref.load %arg1[%c85] : memref<98xf32, #tpu.memory_space<smem>>
    %131 = vector.extract_strided_slice %77 {offsets = [5, 0], sizes = [16, 16], strides = [1, 1]} : vector<22x16xf32> to vector<16x16xf32>
    %132 = vector.broadcast %129 : f32 to vector<16x16xf32>
    %133 = arith.mulf %132, %131 : vector<16x16xf32>
    %134 = arith.addf %128, %133 : vector<16x16xf32>
    %135 = vector.extract_strided_slice %78 {offsets = [5, 0], sizes = [16, 16], strides = [1, 1]} : vector<22x16xf32> to vector<16x16xf32>
    %136 = vector.broadcast %130 : f32 to vector<16x16xf32>
    %137 = arith.mulf %136, %135 : vector<16x16xf32>
    %138 = arith.addf %134, %137 : vector<16x16xf32>
    %c43 = arith.constant 43 : index
    %139 = memref.load %arg1[%c43] : memref<98xf32, #tpu.memory_space<smem>>
    %c92 = arith.constant 92 : index
    %140 = memref.load %arg1[%c92] : memref<98xf32, #tpu.memory_space<smem>>
    %141 = vector.extract_strided_slice %77 {offsets = [6, 0], sizes = [16, 16], strides = [1, 1]} : vector<22x16xf32> to vector<16x16xf32>
    %142 = vector.broadcast %139 : f32 to vector<16x16xf32>
    %143 = arith.mulf %142, %141 : vector<16x16xf32>
    %144 = arith.addf %138, %143 : vector<16x16xf32>
    %145 = vector.extract_strided_slice %78 {offsets = [6, 0], sizes = [16, 16], strides = [1, 1]} : vector<22x16xf32> to vector<16x16xf32>
    %146 = vector.broadcast %140 : f32 to vector<16x16xf32>
    %147 = arith.mulf %146, %145 : vector<16x16xf32>
    %148 = arith.addf %144, %147 : vector<16x16xf32>
    %149 = vector.extract_strided_slice %1 {offsets = [0, 2], sizes = [22, 16], strides = [1, 1]} : vector<22x22xf32> to vector<22x16xf32>
    %150 = vector.extract_strided_slice %3 {offsets = [0, 2], sizes = [22, 16], strides = [1, 1]} : vector<22x22xf32> to vector<22x16xf32>
    %c2 = arith.constant 2 : index
    %151 = memref.load %arg1[%c2] : memref<98xf32, #tpu.memory_space<smem>>
    %c51 = arith.constant 51 : index
    %152 = memref.load %arg1[%c51] : memref<98xf32, #tpu.memory_space<smem>>
    %153 = vector.extract_strided_slice %149 {offsets = [0, 0], sizes = [16, 16], strides = [1, 1]} : vector<22x16xf32> to vector<16x16xf32>
    %154 = vector.broadcast %151 : f32 to vector<16x16xf32>
    %155 = arith.mulf %154, %153 : vector<16x16xf32>
    %156 = arith.addf %148, %155 : vector<16x16xf32>
    %157 = vector.extract_strided_slice %150 {offsets = [0, 0], sizes = [16, 16], strides = [1, 1]} : vector<22x16xf32> to vector<16x16xf32>
    %158 = vector.broadcast %152 : f32 to vector<16x16xf32>
    %159 = arith.mulf %158, %157 : vector<16x16xf32>
    %160 = arith.addf %156, %159 : vector<16x16xf32>
    %c9 = arith.constant 9 : index
    %161 = memref.load %arg1[%c9] : memref<98xf32, #tpu.memory_space<smem>>
    %c58 = arith.constant 58 : index
    %162 = memref.load %arg1[%c58] : memref<98xf32, #tpu.memory_space<smem>>
    %163 = vector.extract_strided_slice %149 {offsets = [1, 0], sizes = [16, 16], strides = [1, 1]} : vector<22x16xf32> to vector<16x16xf32>
    %164 = vector.broadcast %161 : f32 to vector<16x16xf32>
    %165 = arith.mulf %164, %163 : vector<16x16xf32>
    %166 = arith.addf %160, %165 : vector<16x16xf32>
    %167 = vector.extract_strided_slice %150 {offsets = [1, 0], sizes = [16, 16], strides = [1, 1]} : vector<22x16xf32> to vector<16x16xf32>
    %168 = vector.broadcast %162 : f32 to vector<16x16xf32>
    %169 = arith.mulf %168, %167 : vector<16x16xf32>
    %170 = arith.addf %166, %169 : vector<16x16xf32>
    %c16 = arith.constant 16 : index
    %171 = memref.load %arg1[%c16] : memref<98xf32, #tpu.memory_space<smem>>
    %c65 = arith.constant 65 : index
    %172 = memref.load %arg1[%c65] : memref<98xf32, #tpu.memory_space<smem>>
    %173 = vector.extract_strided_slice %149 {offsets = [2, 0], sizes = [16, 16], strides = [1, 1]} : vector<22x16xf32> to vector<16x16xf32>
    %174 = vector.broadcast %171 : f32 to vector<16x16xf32>
    %175 = arith.mulf %174, %173 : vector<16x16xf32>
    %176 = arith.addf %170, %175 : vector<16x16xf32>
    %177 = vector.extract_strided_slice %150 {offsets = [2, 0], sizes = [16, 16], strides = [1, 1]} : vector<22x16xf32> to vector<16x16xf32>
    %178 = vector.broadcast %172 : f32 to vector<16x16xf32>
    %179 = arith.mulf %178, %177 : vector<16x16xf32>
    %180 = arith.addf %176, %179 : vector<16x16xf32>
    %c23 = arith.constant 23 : index
    %181 = memref.load %arg1[%c23] : memref<98xf32, #tpu.memory_space<smem>>
    %c72 = arith.constant 72 : index
    %182 = memref.load %arg1[%c72] : memref<98xf32, #tpu.memory_space<smem>>
    %183 = vector.extract_strided_slice %149 {offsets = [3, 0], sizes = [16, 16], strides = [1, 1]} : vector<22x16xf32> to vector<16x16xf32>
    %184 = vector.broadcast %181 : f32 to vector<16x16xf32>
    %185 = arith.mulf %184, %183 : vector<16x16xf32>
    %186 = arith.addf %180, %185 : vector<16x16xf32>
    %187 = vector.extract_strided_slice %150 {offsets = [3, 0], sizes = [16, 16], strides = [1, 1]} : vector<22x16xf32> to vector<16x16xf32>
    %188 = vector.broadcast %182 : f32 to vector<16x16xf32>
    %189 = arith.mulf %188, %187 : vector<16x16xf32>
    %190 = arith.addf %186, %189 : vector<16x16xf32>
    %c30 = arith.constant 30 : index
    %191 = memref.load %arg1[%c30] : memref<98xf32, #tpu.memory_space<smem>>
    %c79 = arith.constant 79 : index
    %192 = memref.load %arg1[%c79] : memref<98xf32, #tpu.memory_space<smem>>
    %193 = vector.extract_strided_slice %149 {offsets = [4, 0], sizes = [16, 16], strides = [1, 1]} : vector<22x16xf32> to vector<16x16xf32>
    %194 = vector.broadcast %191 : f32 to vector<16x16xf32>
    %195 = arith.mulf %194, %193 : vector<16x16xf32>
    %196 = arith.addf %190, %195 : vector<16x16xf32>
    %197 = vector.extract_strided_slice %150 {offsets = [4, 0], sizes = [16, 16], strides = [1, 1]} : vector<22x16xf32> to vector<16x16xf32>
    %198 = vector.broadcast %192 : f32 to vector<16x16xf32>
    %199 = arith.mulf %198, %197 : vector<16x16xf32>
    %200 = arith.addf %196, %199 : vector<16x16xf32>
    %c37 = arith.constant 37 : index
    %201 = memref.load %arg1[%c37] : memref<98xf32, #tpu.memory_space<smem>>
    %c86 = arith.constant 86 : index
    %202 = memref.load %arg1[%c86] : memref<98xf32, #tpu.memory_space<smem>>
    %203 = vector.extract_strided_slice %149 {offsets = [5, 0], sizes = [16, 16], strides = [1, 1]} : vector<22x16xf32> to vector<16x16xf32>
    %204 = vector.broadcast %201 : f32 to vector<16x16xf32>
    %205 = arith.mulf %204, %203 : vector<16x16xf32>
    %206 = arith.addf %200, %205 : vector<16x16xf32>
    %207 = vector.extract_strided_slice %150 {offsets = [5, 0], sizes = [16, 16], strides = [1, 1]} : vector<22x16xf32> to vector<16x16xf32>
    %208 = vector.broadcast %202 : f32 to vector<16x16xf32>
    %209 = arith.mulf %208, %207 : vector<16x16xf32>
    %210 = arith.addf %206, %209 : vector<16x16xf32>
    %c44 = arith.constant 44 : index
    %211 = memref.load %arg1[%c44] : memref<98xf32, #tpu.memory_space<smem>>
    %c93 = arith.constant 93 : index
    %212 = memref.load %arg1[%c93] : memref<98xf32, #tpu.memory_space<smem>>
    %213 = vector.extract_strided_slice %149 {offsets = [6, 0], sizes = [16, 16], strides = [1, 1]} : vector<22x16xf32> to vector<16x16xf32>
    %214 = vector.broadcast %211 : f32 to vector<16x16xf32>
    %215 = arith.mulf %214, %213 : vector<16x16xf32>
    %216 = arith.addf %210, %215 : vector<16x16xf32>
    %217 = vector.extract_strided_slice %150 {offsets = [6, 0], sizes = [16, 16], strides = [1, 1]} : vector<22x16xf32> to vector<16x16xf32>
    %218 = vector.broadcast %212 : f32 to vector<16x16xf32>
    %219 = arith.mulf %218, %217 : vector<16x16xf32>
    %220 = arith.addf %216, %219 : vector<16x16xf32>
    %221 = vector.extract_strided_slice %1 {offsets = [0, 3], sizes = [22, 16], strides = [1, 1]} : vector<22x22xf32> to vector<22x16xf32>
    %222 = vector.extract_strided_slice %3 {offsets = [0, 3], sizes = [22, 16], strides = [1, 1]} : vector<22x22xf32> to vector<22x16xf32>
    %c3 = arith.constant 3 : index
    %223 = memref.load %arg1[%c3] : memref<98xf32, #tpu.memory_space<smem>>
    %c52 = arith.constant 52 : index
    %224 = memref.load %arg1[%c52] : memref<98xf32, #tpu.memory_space<smem>>
    %225 = vector.extract_strided_slice %221 {offsets = [0, 0], sizes = [16, 16], strides = [1, 1]} : vector<22x16xf32> to vector<16x16xf32>
    %226 = vector.broadcast %223 : f32 to vector<16x16xf32>
    %227 = arith.mulf %226, %225 : vector<16x16xf32>
    %228 = arith.addf %220, %227 : vector<16x16xf32>
    %229 = vector.extract_strided_slice %222 {offsets = [0, 0], sizes = [16, 16], strides = [1, 1]} : vector<22x16xf32> to vector<16x16xf32>
    %230 = vector.broadcast %224 : f32 to vector<16x16xf32>
    %231 = arith.mulf %230, %229 : vector<16x16xf32>
    %232 = arith.addf %228, %231 : vector<16x16xf32>
    %c10 = arith.constant 10 : index
    %233 = memref.load %arg1[%c10] : memref<98xf32, #tpu.memory_space<smem>>
    %c59 = arith.constant 59 : index
    %234 = memref.load %arg1[%c59] : memref<98xf32, #tpu.memory_space<smem>>
    %235 = vector.extract_strided_slice %221 {offsets = [1, 0], sizes = [16, 16], strides = [1, 1]} : vector<22x16xf32> to vector<16x16xf32>
    %236 = vector.broadcast %233 : f32 to vector<16x16xf32>
    %237 = arith.mulf %236, %235 : vector<16x16xf32>
    %238 = arith.addf %232, %237 : vector<16x16xf32>
    %239 = vector.extract_strided_slice %222 {offsets = [1, 0], sizes = [16, 16], strides = [1, 1]} : vector<22x16xf32> to vector<16x16xf32>
    %240 = vector.broadcast %234 : f32 to vector<16x16xf32>
    %241 = arith.mulf %240, %239 : vector<16x16xf32>
    %242 = arith.addf %238, %241 : vector<16x16xf32>
    %c17 = arith.constant 17 : index
    %243 = memref.load %arg1[%c17] : memref<98xf32, #tpu.memory_space<smem>>
    %c66 = arith.constant 66 : index
    %244 = memref.load %arg1[%c66] : memref<98xf32, #tpu.memory_space<smem>>
    %245 = vector.extract_strided_slice %221 {offsets = [2, 0], sizes = [16, 16], strides = [1, 1]} : vector<22x16xf32> to vector<16x16xf32>
    %246 = vector.broadcast %243 : f32 to vector<16x16xf32>
    %247 = arith.mulf %246, %245 : vector<16x16xf32>
    %248 = arith.addf %242, %247 : vector<16x16xf32>
    %249 = vector.extract_strided_slice %222 {offsets = [2, 0], sizes = [16, 16], strides = [1, 1]} : vector<22x16xf32> to vector<16x16xf32>
    %250 = vector.broadcast %244 : f32 to vector<16x16xf32>
    %251 = arith.mulf %250, %249 : vector<16x16xf32>
    %252 = arith.addf %248, %251 : vector<16x16xf32>
    %c24 = arith.constant 24 : index
    %253 = memref.load %arg1[%c24] : memref<98xf32, #tpu.memory_space<smem>>
    %c73 = arith.constant 73 : index
    %254 = memref.load %arg1[%c73] : memref<98xf32, #tpu.memory_space<smem>>
    %255 = vector.extract_strided_slice %221 {offsets = [3, 0], sizes = [16, 16], strides = [1, 1]} : vector<22x16xf32> to vector<16x16xf32>
    %256 = vector.broadcast %253 : f32 to vector<16x16xf32>
    %257 = arith.mulf %256, %255 : vector<16x16xf32>
    %258 = arith.addf %252, %257 : vector<16x16xf32>
    %259 = vector.extract_strided_slice %222 {offsets = [3, 0], sizes = [16, 16], strides = [1, 1]} : vector<22x16xf32> to vector<16x16xf32>
    %260 = vector.broadcast %254 : f32 to vector<16x16xf32>
    %261 = arith.mulf %260, %259 : vector<16x16xf32>
    %262 = arith.addf %258, %261 : vector<16x16xf32>
    %c31 = arith.constant 31 : index
    %263 = memref.load %arg1[%c31] : memref<98xf32, #tpu.memory_space<smem>>
    %c80 = arith.constant 80 : index
    %264 = memref.load %arg1[%c80] : memref<98xf32, #tpu.memory_space<smem>>
    %265 = vector.extract_strided_slice %221 {offsets = [4, 0], sizes = [16, 16], strides = [1, 1]} : vector<22x16xf32> to vector<16x16xf32>
    %266 = vector.broadcast %263 : f32 to vector<16x16xf32>
    %267 = arith.mulf %266, %265 : vector<16x16xf32>
    %268 = arith.addf %262, %267 : vector<16x16xf32>
    %269 = vector.extract_strided_slice %222 {offsets = [4, 0], sizes = [16, 16], strides = [1, 1]} : vector<22x16xf32> to vector<16x16xf32>
    %270 = vector.broadcast %264 : f32 to vector<16x16xf32>
    %271 = arith.mulf %270, %269 : vector<16x16xf32>
    %272 = arith.addf %268, %271 : vector<16x16xf32>
    %c38 = arith.constant 38 : index
    %273 = memref.load %arg1[%c38] : memref<98xf32, #tpu.memory_space<smem>>
    %c87 = arith.constant 87 : index
    %274 = memref.load %arg1[%c87] : memref<98xf32, #tpu.memory_space<smem>>
    %275 = vector.extract_strided_slice %221 {offsets = [5, 0], sizes = [16, 16], strides = [1, 1]} : vector<22x16xf32> to vector<16x16xf32>
    %276 = vector.broadcast %273 : f32 to vector<16x16xf32>
    %277 = arith.mulf %276, %275 : vector<16x16xf32>
    %278 = arith.addf %272, %277 : vector<16x16xf32>
    %279 = vector.extract_strided_slice %222 {offsets = [5, 0], sizes = [16, 16], strides = [1, 1]} : vector<22x16xf32> to vector<16x16xf32>
    %280 = vector.broadcast %274 : f32 to vector<16x16xf32>
    %281 = arith.mulf %280, %279 : vector<16x16xf32>
    %282 = arith.addf %278, %281 : vector<16x16xf32>
    %c45 = arith.constant 45 : index
    %283 = memref.load %arg1[%c45] : memref<98xf32, #tpu.memory_space<smem>>
    %c94 = arith.constant 94 : index
    %284 = memref.load %arg1[%c94] : memref<98xf32, #tpu.memory_space<smem>>
    %285 = vector.extract_strided_slice %221 {offsets = [6, 0], sizes = [16, 16], strides = [1, 1]} : vector<22x16xf32> to vector<16x16xf32>
    %286 = vector.broadcast %283 : f32 to vector<16x16xf32>
    %287 = arith.mulf %286, %285 : vector<16x16xf32>
    %288 = arith.addf %282, %287 : vector<16x16xf32>
    %289 = vector.extract_strided_slice %222 {offsets = [6, 0], sizes = [16, 16], strides = [1, 1]} : vector<22x16xf32> to vector<16x16xf32>
    %290 = vector.broadcast %284 : f32 to vector<16x16xf32>
    %291 = arith.mulf %290, %289 : vector<16x16xf32>
    %292 = arith.addf %288, %291 : vector<16x16xf32>
    %293 = vector.extract_strided_slice %1 {offsets = [0, 4], sizes = [22, 16], strides = [1, 1]} : vector<22x22xf32> to vector<22x16xf32>
    %294 = vector.extract_strided_slice %3 {offsets = [0, 4], sizes = [22, 16], strides = [1, 1]} : vector<22x22xf32> to vector<22x16xf32>
    %c4 = arith.constant 4 : index
    %295 = memref.load %arg1[%c4] : memref<98xf32, #tpu.memory_space<smem>>
    %c53 = arith.constant 53 : index
    %296 = memref.load %arg1[%c53] : memref<98xf32, #tpu.memory_space<smem>>
    %297 = vector.extract_strided_slice %293 {offsets = [0, 0], sizes = [16, 16], strides = [1, 1]} : vector<22x16xf32> to vector<16x16xf32>
    %298 = vector.broadcast %295 : f32 to vector<16x16xf32>
    %299 = arith.mulf %298, %297 : vector<16x16xf32>
    %300 = arith.addf %292, %299 : vector<16x16xf32>
    %301 = vector.extract_strided_slice %294 {offsets = [0, 0], sizes = [16, 16], strides = [1, 1]} : vector<22x16xf32> to vector<16x16xf32>
    %302 = vector.broadcast %296 : f32 to vector<16x16xf32>
    %303 = arith.mulf %302, %301 : vector<16x16xf32>
    %304 = arith.addf %300, %303 : vector<16x16xf32>
    %c11 = arith.constant 11 : index
    %305 = memref.load %arg1[%c11] : memref<98xf32, #tpu.memory_space<smem>>
    %c60 = arith.constant 60 : index
    %306 = memref.load %arg1[%c60] : memref<98xf32, #tpu.memory_space<smem>>
    %307 = vector.extract_strided_slice %293 {offsets = [1, 0], sizes = [16, 16], strides = [1, 1]} : vector<22x16xf32> to vector<16x16xf32>
    %308 = vector.broadcast %305 : f32 to vector<16x16xf32>
    %309 = arith.mulf %308, %307 : vector<16x16xf32>
    %310 = arith.addf %304, %309 : vector<16x16xf32>
    %311 = vector.extract_strided_slice %294 {offsets = [1, 0], sizes = [16, 16], strides = [1, 1]} : vector<22x16xf32> to vector<16x16xf32>
    %312 = vector.broadcast %306 : f32 to vector<16x16xf32>
    %313 = arith.mulf %312, %311 : vector<16x16xf32>
    %314 = arith.addf %310, %313 : vector<16x16xf32>
    %c18 = arith.constant 18 : index
    %315 = memref.load %arg1[%c18] : memref<98xf32, #tpu.memory_space<smem>>
    %c67 = arith.constant 67 : index
    %316 = memref.load %arg1[%c67] : memref<98xf32, #tpu.memory_space<smem>>
    %317 = vector.extract_strided_slice %293 {offsets = [2, 0], sizes = [16, 16], strides = [1, 1]} : vector<22x16xf32> to vector<16x16xf32>
    %318 = vector.broadcast %315 : f32 to vector<16x16xf32>
    %319 = arith.mulf %318, %317 : vector<16x16xf32>
    %320 = arith.addf %314, %319 : vector<16x16xf32>
    %321 = vector.extract_strided_slice %294 {offsets = [2, 0], sizes = [16, 16], strides = [1, 1]} : vector<22x16xf32> to vector<16x16xf32>
    %322 = vector.broadcast %316 : f32 to vector<16x16xf32>
    %323 = arith.mulf %322, %321 : vector<16x16xf32>
    %324 = arith.addf %320, %323 : vector<16x16xf32>
    %c25 = arith.constant 25 : index
    %325 = memref.load %arg1[%c25] : memref<98xf32, #tpu.memory_space<smem>>
    %c74 = arith.constant 74 : index
    %326 = memref.load %arg1[%c74] : memref<98xf32, #tpu.memory_space<smem>>
    %327 = vector.extract_strided_slice %293 {offsets = [3, 0], sizes = [16, 16], strides = [1, 1]} : vector<22x16xf32> to vector<16x16xf32>
    %328 = vector.broadcast %325 : f32 to vector<16x16xf32>
    %329 = arith.mulf %328, %327 : vector<16x16xf32>
    %330 = arith.addf %324, %329 : vector<16x16xf32>
    %331 = vector.extract_strided_slice %294 {offsets = [3, 0], sizes = [16, 16], strides = [1, 1]} : vector<22x16xf32> to vector<16x16xf32>
    %332 = vector.broadcast %326 : f32 to vector<16x16xf32>
    %333 = arith.mulf %332, %331 : vector<16x16xf32>
    %334 = arith.addf %330, %333 : vector<16x16xf32>
    %c32 = arith.constant 32 : index
    %335 = memref.load %arg1[%c32] : memref<98xf32, #tpu.memory_space<smem>>
    %c81 = arith.constant 81 : index
    %336 = memref.load %arg1[%c81] : memref<98xf32, #tpu.memory_space<smem>>
    %337 = vector.extract_strided_slice %293 {offsets = [4, 0], sizes = [16, 16], strides = [1, 1]} : vector<22x16xf32> to vector<16x16xf32>
    %338 = vector.broadcast %335 : f32 to vector<16x16xf32>
    %339 = arith.mulf %338, %337 : vector<16x16xf32>
    %340 = arith.addf %334, %339 : vector<16x16xf32>
    %341 = vector.extract_strided_slice %294 {offsets = [4, 0], sizes = [16, 16], strides = [1, 1]} : vector<22x16xf32> to vector<16x16xf32>
    %342 = vector.broadcast %336 : f32 to vector<16x16xf32>
    %343 = arith.mulf %342, %341 : vector<16x16xf32>
    %344 = arith.addf %340, %343 : vector<16x16xf32>
    %c39 = arith.constant 39 : index
    %345 = memref.load %arg1[%c39] : memref<98xf32, #tpu.memory_space<smem>>
    %c88 = arith.constant 88 : index
    %346 = memref.load %arg1[%c88] : memref<98xf32, #tpu.memory_space<smem>>
    %347 = vector.extract_strided_slice %293 {offsets = [5, 0], sizes = [16, 16], strides = [1, 1]} : vector<22x16xf32> to vector<16x16xf32>
    %348 = vector.broadcast %345 : f32 to vector<16x16xf32>
    %349 = arith.mulf %348, %347 : vector<16x16xf32>
    %350 = arith.addf %344, %349 : vector<16x16xf32>
    %351 = vector.extract_strided_slice %294 {offsets = [5, 0], sizes = [16, 16], strides = [1, 1]} : vector<22x16xf32> to vector<16x16xf32>
    %352 = vector.broadcast %346 : f32 to vector<16x16xf32>
    %353 = arith.mulf %352, %351 : vector<16x16xf32>
    %354 = arith.addf %350, %353 : vector<16x16xf32>
    %c46 = arith.constant 46 : index
    %355 = memref.load %arg1[%c46] : memref<98xf32, #tpu.memory_space<smem>>
    %c95 = arith.constant 95 : index
    %356 = memref.load %arg1[%c95] : memref<98xf32, #tpu.memory_space<smem>>
    %357 = vector.extract_strided_slice %293 {offsets = [6, 0], sizes = [16, 16], strides = [1, 1]} : vector<22x16xf32> to vector<16x16xf32>
    %358 = vector.broadcast %355 : f32 to vector<16x16xf32>
    %359 = arith.mulf %358, %357 : vector<16x16xf32>
    %360 = arith.addf %354, %359 : vector<16x16xf32>
    %361 = vector.extract_strided_slice %294 {offsets = [6, 0], sizes = [16, 16], strides = [1, 1]} : vector<22x16xf32> to vector<16x16xf32>
    %362 = vector.broadcast %356 : f32 to vector<16x16xf32>
    %363 = arith.mulf %362, %361 : vector<16x16xf32>
    %364 = arith.addf %360, %363 : vector<16x16xf32>
    %365 = vector.extract_strided_slice %1 {offsets = [0, 5], sizes = [22, 16], strides = [1, 1]} : vector<22x22xf32> to vector<22x16xf32>
    %366 = vector.extract_strided_slice %3 {offsets = [0, 5], sizes = [22, 16], strides = [1, 1]} : vector<22x22xf32> to vector<22x16xf32>
    %c5 = arith.constant 5 : index
    %367 = memref.load %arg1[%c5] : memref<98xf32, #tpu.memory_space<smem>>
    %c54 = arith.constant 54 : index
    %368 = memref.load %arg1[%c54] : memref<98xf32, #tpu.memory_space<smem>>
    %369 = vector.extract_strided_slice %365 {offsets = [0, 0], sizes = [16, 16], strides = [1, 1]} : vector<22x16xf32> to vector<16x16xf32>
    %370 = vector.broadcast %367 : f32 to vector<16x16xf32>
    %371 = arith.mulf %370, %369 : vector<16x16xf32>
    %372 = arith.addf %364, %371 : vector<16x16xf32>
    %373 = vector.extract_strided_slice %366 {offsets = [0, 0], sizes = [16, 16], strides = [1, 1]} : vector<22x16xf32> to vector<16x16xf32>
    %374 = vector.broadcast %368 : f32 to vector<16x16xf32>
    %375 = arith.mulf %374, %373 : vector<16x16xf32>
    %376 = arith.addf %372, %375 : vector<16x16xf32>
    %c12 = arith.constant 12 : index
    %377 = memref.load %arg1[%c12] : memref<98xf32, #tpu.memory_space<smem>>
    %c61 = arith.constant 61 : index
    %378 = memref.load %arg1[%c61] : memref<98xf32, #tpu.memory_space<smem>>
    %379 = vector.extract_strided_slice %365 {offsets = [1, 0], sizes = [16, 16], strides = [1, 1]} : vector<22x16xf32> to vector<16x16xf32>
    %380 = vector.broadcast %377 : f32 to vector<16x16xf32>
    %381 = arith.mulf %380, %379 : vector<16x16xf32>
    %382 = arith.addf %376, %381 : vector<16x16xf32>
    %383 = vector.extract_strided_slice %366 {offsets = [1, 0], sizes = [16, 16], strides = [1, 1]} : vector<22x16xf32> to vector<16x16xf32>
    %384 = vector.broadcast %378 : f32 to vector<16x16xf32>
    %385 = arith.mulf %384, %383 : vector<16x16xf32>
    %386 = arith.addf %382, %385 : vector<16x16xf32>
    %c19 = arith.constant 19 : index
    %387 = memref.load %arg1[%c19] : memref<98xf32, #tpu.memory_space<smem>>
    %c68 = arith.constant 68 : index
    %388 = memref.load %arg1[%c68] : memref<98xf32, #tpu.memory_space<smem>>
    %389 = vector.extract_strided_slice %365 {offsets = [2, 0], sizes = [16, 16], strides = [1, 1]} : vector<22x16xf32> to vector<16x16xf32>
    %390 = vector.broadcast %387 : f32 to vector<16x16xf32>
    %391 = arith.mulf %390, %389 : vector<16x16xf32>
    %392 = arith.addf %386, %391 : vector<16x16xf32>
    %393 = vector.extract_strided_slice %366 {offsets = [2, 0], sizes = [16, 16], strides = [1, 1]} : vector<22x16xf32> to vector<16x16xf32>
    %394 = vector.broadcast %388 : f32 to vector<16x16xf32>
    %395 = arith.mulf %394, %393 : vector<16x16xf32>
    %396 = arith.addf %392, %395 : vector<16x16xf32>
    %c26 = arith.constant 26 : index
    %397 = memref.load %arg1[%c26] : memref<98xf32, #tpu.memory_space<smem>>
    %c75 = arith.constant 75 : index
    %398 = memref.load %arg1[%c75] : memref<98xf32, #tpu.memory_space<smem>>
    %399 = vector.extract_strided_slice %365 {offsets = [3, 0], sizes = [16, 16], strides = [1, 1]} : vector<22x16xf32> to vector<16x16xf32>
    %400 = vector.broadcast %397 : f32 to vector<16x16xf32>
    %401 = arith.mulf %400, %399 : vector<16x16xf32>
    %402 = arith.addf %396, %401 : vector<16x16xf32>
    %403 = vector.extract_strided_slice %366 {offsets = [3, 0], sizes = [16, 16], strides = [1, 1]} : vector<22x16xf32> to vector<16x16xf32>
    %404 = vector.broadcast %398 : f32 to vector<16x16xf32>
    %405 = arith.mulf %404, %403 : vector<16x16xf32>
    %406 = arith.addf %402, %405 : vector<16x16xf32>
    %c33 = arith.constant 33 : index
    %407 = memref.load %arg1[%c33] : memref<98xf32, #tpu.memory_space<smem>>
    %c82 = arith.constant 82 : index
    %408 = memref.load %arg1[%c82] : memref<98xf32, #tpu.memory_space<smem>>
    %409 = vector.extract_strided_slice %365 {offsets = [4, 0], sizes = [16, 16], strides = [1, 1]} : vector<22x16xf32> to vector<16x16xf32>
    %410 = vector.broadcast %407 : f32 to vector<16x16xf32>
    %411 = arith.mulf %410, %409 : vector<16x16xf32>
    %412 = arith.addf %406, %411 : vector<16x16xf32>
    %413 = vector.extract_strided_slice %366 {offsets = [4, 0], sizes = [16, 16], strides = [1, 1]} : vector<22x16xf32> to vector<16x16xf32>
    %414 = vector.broadcast %408 : f32 to vector<16x16xf32>
    %415 = arith.mulf %414, %413 : vector<16x16xf32>
    %416 = arith.addf %412, %415 : vector<16x16xf32>
    %c40 = arith.constant 40 : index
    %417 = memref.load %arg1[%c40] : memref<98xf32, #tpu.memory_space<smem>>
    %c89 = arith.constant 89 : index
    %418 = memref.load %arg1[%c89] : memref<98xf32, #tpu.memory_space<smem>>
    %419 = vector.extract_strided_slice %365 {offsets = [5, 0], sizes = [16, 16], strides = [1, 1]} : vector<22x16xf32> to vector<16x16xf32>
    %420 = vector.broadcast %417 : f32 to vector<16x16xf32>
    %421 = arith.mulf %420, %419 : vector<16x16xf32>
    %422 = arith.addf %416, %421 : vector<16x16xf32>
    %423 = vector.extract_strided_slice %366 {offsets = [5, 0], sizes = [16, 16], strides = [1, 1]} : vector<22x16xf32> to vector<16x16xf32>
    %424 = vector.broadcast %418 : f32 to vector<16x16xf32>
    %425 = arith.mulf %424, %423 : vector<16x16xf32>
    %426 = arith.addf %422, %425 : vector<16x16xf32>
    %c47 = arith.constant 47 : index
    %427 = memref.load %arg1[%c47] : memref<98xf32, #tpu.memory_space<smem>>
    %c96 = arith.constant 96 : index
    %428 = memref.load %arg1[%c96] : memref<98xf32, #tpu.memory_space<smem>>
    %429 = vector.extract_strided_slice %365 {offsets = [6, 0], sizes = [16, 16], strides = [1, 1]} : vector<22x16xf32> to vector<16x16xf32>
    %430 = vector.broadcast %427 : f32 to vector<16x16xf32>
    %431 = arith.mulf %430, %429 : vector<16x16xf32>
    %432 = arith.addf %426, %431 : vector<16x16xf32>
    %433 = vector.extract_strided_slice %366 {offsets = [6, 0], sizes = [16, 16], strides = [1, 1]} : vector<22x16xf32> to vector<16x16xf32>
    %434 = vector.broadcast %428 : f32 to vector<16x16xf32>
    %435 = arith.mulf %434, %433 : vector<16x16xf32>
    %436 = arith.addf %432, %435 : vector<16x16xf32>
    %437 = vector.extract_strided_slice %1 {offsets = [0, 6], sizes = [22, 16], strides = [1, 1]} : vector<22x22xf32> to vector<22x16xf32>
    %438 = vector.extract_strided_slice %3 {offsets = [0, 6], sizes = [22, 16], strides = [1, 1]} : vector<22x22xf32> to vector<22x16xf32>
    %c6 = arith.constant 6 : index
    %439 = memref.load %arg1[%c6] : memref<98xf32, #tpu.memory_space<smem>>
    %c55 = arith.constant 55 : index
    %440 = memref.load %arg1[%c55] : memref<98xf32, #tpu.memory_space<smem>>
    %441 = vector.extract_strided_slice %437 {offsets = [0, 0], sizes = [16, 16], strides = [1, 1]} : vector<22x16xf32> to vector<16x16xf32>
    %442 = vector.broadcast %439 : f32 to vector<16x16xf32>
    %443 = arith.mulf %442, %441 : vector<16x16xf32>
    %444 = arith.addf %436, %443 : vector<16x16xf32>
    %445 = vector.extract_strided_slice %438 {offsets = [0, 0], sizes = [16, 16], strides = [1, 1]} : vector<22x16xf32> to vector<16x16xf32>
    %446 = vector.broadcast %440 : f32 to vector<16x16xf32>
    %447 = arith.mulf %446, %445 : vector<16x16xf32>
    %448 = arith.addf %444, %447 : vector<16x16xf32>
    %c13 = arith.constant 13 : index
    %449 = memref.load %arg1[%c13] : memref<98xf32, #tpu.memory_space<smem>>
    %c62 = arith.constant 62 : index
    %450 = memref.load %arg1[%c62] : memref<98xf32, #tpu.memory_space<smem>>
    %451 = vector.extract_strided_slice %437 {offsets = [1, 0], sizes = [16, 16], strides = [1, 1]} : vector<22x16xf32> to vector<16x16xf32>
    %452 = vector.broadcast %449 : f32 to vector<16x16xf32>
    %453 = arith.mulf %452, %451 : vector<16x16xf32>
    %454 = arith.addf %448, %453 : vector<16x16xf32>
    %455 = vector.extract_strided_slice %438 {offsets = [1, 0], sizes = [16, 16], strides = [1, 1]} : vector<22x16xf32> to vector<16x16xf32>
    %456 = vector.broadcast %450 : f32 to vector<16x16xf32>
    %457 = arith.mulf %456, %455 : vector<16x16xf32>
    %458 = arith.addf %454, %457 : vector<16x16xf32>
    %c20 = arith.constant 20 : index
    %459 = memref.load %arg1[%c20] : memref<98xf32, #tpu.memory_space<smem>>
    %c69 = arith.constant 69 : index
    %460 = memref.load %arg1[%c69] : memref<98xf32, #tpu.memory_space<smem>>
    %461 = vector.extract_strided_slice %437 {offsets = [2, 0], sizes = [16, 16], strides = [1, 1]} : vector<22x16xf32> to vector<16x16xf32>
    %462 = vector.broadcast %459 : f32 to vector<16x16xf32>
    %463 = arith.mulf %462, %461 : vector<16x16xf32>
    %464 = arith.addf %458, %463 : vector<16x16xf32>
    %465 = vector.extract_strided_slice %438 {offsets = [2, 0], sizes = [16, 16], strides = [1, 1]} : vector<22x16xf32> to vector<16x16xf32>
    %466 = vector.broadcast %460 : f32 to vector<16x16xf32>
    %467 = arith.mulf %466, %465 : vector<16x16xf32>
    %468 = arith.addf %464, %467 : vector<16x16xf32>
    %c27 = arith.constant 27 : index
    %469 = memref.load %arg1[%c27] : memref<98xf32, #tpu.memory_space<smem>>
    %c76 = arith.constant 76 : index
    %470 = memref.load %arg1[%c76] : memref<98xf32, #tpu.memory_space<smem>>
    %471 = vector.extract_strided_slice %437 {offsets = [3, 0], sizes = [16, 16], strides = [1, 1]} : vector<22x16xf32> to vector<16x16xf32>
    %472 = vector.broadcast %469 : f32 to vector<16x16xf32>
    %473 = arith.mulf %472, %471 : vector<16x16xf32>
    %474 = arith.addf %468, %473 : vector<16x16xf32>
    %475 = vector.extract_strided_slice %438 {offsets = [3, 0], sizes = [16, 16], strides = [1, 1]} : vector<22x16xf32> to vector<16x16xf32>
    %476 = vector.broadcast %470 : f32 to vector<16x16xf32>
    %477 = arith.mulf %476, %475 : vector<16x16xf32>
    %478 = arith.addf %474, %477 : vector<16x16xf32>
    %c34 = arith.constant 34 : index
    %479 = memref.load %arg1[%c34] : memref<98xf32, #tpu.memory_space<smem>>
    %c83 = arith.constant 83 : index
    %480 = memref.load %arg1[%c83] : memref<98xf32, #tpu.memory_space<smem>>
    %481 = vector.extract_strided_slice %437 {offsets = [4, 0], sizes = [16, 16], strides = [1, 1]} : vector<22x16xf32> to vector<16x16xf32>
    %482 = vector.broadcast %479 : f32 to vector<16x16xf32>
    %483 = arith.mulf %482, %481 : vector<16x16xf32>
    %484 = arith.addf %478, %483 : vector<16x16xf32>
    %485 = vector.extract_strided_slice %438 {offsets = [4, 0], sizes = [16, 16], strides = [1, 1]} : vector<22x16xf32> to vector<16x16xf32>
    %486 = vector.broadcast %480 : f32 to vector<16x16xf32>
    %487 = arith.mulf %486, %485 : vector<16x16xf32>
    %488 = arith.addf %484, %487 : vector<16x16xf32>
    %c41 = arith.constant 41 : index
    %489 = memref.load %arg1[%c41] : memref<98xf32, #tpu.memory_space<smem>>
    %c90 = arith.constant 90 : index
    %490 = memref.load %arg1[%c90] : memref<98xf32, #tpu.memory_space<smem>>
    %491 = vector.extract_strided_slice %437 {offsets = [5, 0], sizes = [16, 16], strides = [1, 1]} : vector<22x16xf32> to vector<16x16xf32>
    %492 = vector.broadcast %489 : f32 to vector<16x16xf32>
    %493 = arith.mulf %492, %491 : vector<16x16xf32>
    %494 = arith.addf %488, %493 : vector<16x16xf32>
    %495 = vector.extract_strided_slice %438 {offsets = [5, 0], sizes = [16, 16], strides = [1, 1]} : vector<22x16xf32> to vector<16x16xf32>
    %496 = vector.broadcast %490 : f32 to vector<16x16xf32>
    %497 = arith.mulf %496, %495 : vector<16x16xf32>
    %498 = arith.addf %494, %497 : vector<16x16xf32>
    %c48 = arith.constant 48 : index
    %499 = memref.load %arg1[%c48] : memref<98xf32, #tpu.memory_space<smem>>
    %c97 = arith.constant 97 : index
    %500 = memref.load %arg1[%c97] : memref<98xf32, #tpu.memory_space<smem>>
    %501 = vector.extract_strided_slice %437 {offsets = [6, 0], sizes = [16, 16], strides = [1, 1]} : vector<22x16xf32> to vector<16x16xf32>
    %502 = vector.broadcast %499 : f32 to vector<16x16xf32>
    %503 = arith.mulf %502, %501 : vector<16x16xf32>
    %504 = arith.addf %498, %503 : vector<16x16xf32>
    %505 = vector.extract_strided_slice %438 {offsets = [6, 0], sizes = [16, 16], strides = [1, 1]} : vector<22x16xf32> to vector<16x16xf32>
    %506 = vector.broadcast %500 : f32 to vector<16x16xf32>
    %507 = arith.mulf %506, %505 : vector<16x16xf32>
    %508 = arith.addf %504, %507 : vector<16x16xf32>
    %509 = arith.negf %508 : vector<16x16xf32>
    %510 = math.exp %509 : vector<16x16xf32>
    %cst_8 = arith.constant 1.000000e+00 : f32
    %511 = vector.broadcast %cst_8 : f32 to vector<16x16xf32>
    %512 = arith.addf %511, %510 : vector<16x16xf32>
    %513 = arith.divf %511, %512 : vector<16x16xf32>
    %c0_9 = arith.constant 0 : index
    %c0_10 = arith.constant 0 : index
    %c0_11 = arith.constant 0 : index
    %c0_12 = arith.constant 0 : index
    %514 = vector.load %arg3[%c0_9, %c0_10, %c0_11, %c0_12] : memref<1x1x16x16xf32, #tpu.memory_space<vmem>>, vector<1x1x16x16xf32>
    %515 = vector.shape_cast %514 : vector<1x1x16x16xf32> to vector<16x16xf32>
    %516 = vector.shape_cast %513 : vector<16x16xf32> to vector<1x1x16x16xf32>
    tpu.vector_store %arg3[%c0_9, %c0_10, %c0_11, %c0_12], %516 {strides = array<i32>} : memref<1x1x16x16xf32, #tpu.memory_space<vmem>>, vector<1x1x16x16xf32>,
    return
  }
  func.func @transform_0(%arg0: i32) -> i32 {
    %c0_i32 = arith.constant 0 : i32
    %c0_i32_0 = arith.constant 0 : i32
    return %c0_i32 : i32
  }
  func.func @transform_1(%arg0: i32) -> (i32, i32, i32, i32) {
    %c0_i32 = arith.constant 0 : i32
    %c0_i32_0 = arith.constant 0 : i32
    %c0_i32_1 = arith.constant 0 : i32
    %c0_i32_2 = arith.constant 0 : i32
    return %arg0, %c0_i32, %c0_i32_0, %c0_i32_1 : i32, i32, i32, i32
  }
  func.func @transform_2(%arg0: i32) -> (i32, i32, i32, i32) {
    %c0_i32 = arith.constant 0 : i32
    %c0_i32_0 = arith.constant 0 : i32
    %c0_i32_1 = arith.constant 0 : i32
    %c0_i32_2 = arith.constant 0 : i32
    return %arg0, %c0_i32, %c0_i32_0, %c0_i32_1 : i32, i32, i32, i32
  }
}

</mosaic_0001>

<bundles_post_ra>
// kernel: spatial_attention_pallas.2
= control target key start
LH: loop header
LB: loop body
LE: loop exit
PB: predicated region body
PF: predicated region fallthrough
CT: control target
= control target key end

     0   :  { %vm16_vm0 = vcmask 1043456   ;;  %v85_v0 = vlaneseq  ;;  %v271_v2 = vmov 1966171168   ;;  %s310_s0 = inlined_call_operand.vmem [shape: f32[2,4,256], index: 0, kind: input, shape index: {}]   ;;  %s311_s1 = inlined_call_operand.vmem [shape: f32[2,2,256], index: 1, kind: output, shape index: {}]  }
   0x1   :  { %v8_v1 = vld [vmem:[%s310_s0] sm:$0xff]  ;;  %v83_v3 = vunpack.c.l.s4 %v271_v2  ;;  %v9_v4 = vld [vmem:[%s310_s0 + $0x8] sm:$0xff] }
   0x2   :  { %v12_v5 = vcombine.high %v8_v1, %v8_v1  ;;  %v17_v6 = vsel %vm16_vm0, %v8_v1, 0.0  ;;  %v86_v8 = vshrl.u32 %v85_v0, 7  ;;  %v13_v9 = vcombine.high %v9_v4, %v9_v4 }
   0x3   :  { %v18_v7 = vrot.slane %v17_v6, 4  ;;  %v31_v10 = vsel %vm16_vm0, %v9_v4, 0.0  ;;  %v45_v13 = vsel %vm16_vm0, %v8_v1, -inf  ;;  %v84_v17 = vunpack.c.0.s8 %v83_v3 }
   0x4   :  { %v24_v11 = vsel %vm16_vm0, %v12_v5, 0.0  ;;  %v32_v12 = vrot.slane %v31_v10, 4  ;;  %v52_v14 = vsel %vm16_vm0, %v12_v5, -inf  ;;  %v38_v18 = vsel %vm16_vm0, %v13_v9, 0.0 }
   0x5   :  { %v19_v15 = vadd.f32 %v18_v7, %v17_v6  ;;  %v25_v16 = vrot.slane %v24_v11, 4  ;;  %v39_v20 = vrot.slane %v38_v18, 4  ;;  %v46_v21 = vrot.slane %v45_v13, 4 }
   0x6   :  { %v33_v19 = vadd.f32 %v32_v12, %v31_v10  ;;  %v53_v22 = vrot.slane %v52_v14, 4  ;;  %v59_v25 = vsel %vm16_vm0, %v9_v4, -inf  ;;  %v66_v26 = vsel %vm16_vm0, %v13_v9, -inf }
   0x7   :  { %v20_v23 = vrot.slane %v19_v15, 2  ;;  %v26_v24 = vadd.f32 %v25_v16, %v24_v11  ;;  %v40_v28 = vadd.f32 %v39_v20, %v38_v18  ;;  %v47_v29 = vmax.f32 %v45_v13, %v46_v21 }
   0x8   :  { %v34_v27 = vrot.slane %v33_v19, 2  ;;  %v54_v30 = vmax.f32 %v52_v14, %v53_v22  ;;  %v60_v33 = vrot.slane %v59_v25, 4  ;;  %v67_v34 = vrot.slane %v66_v26, 4 }
   0x9   :  { %v21_v31 = vadd.f32 %v20_v23, %v19_v15  ;;  %v27_v32 = vrot.slane %v26_v24, 2  ;;  %v41_v36 = vrot.slane %v40_v28, 2  ;;  %v48_v37 = vrot.slane %v47_v29, 2 }
   0xa   :  { %v35_v35 = vadd.f32 %v34_v27, %v33_v19  ;;  %v55_v38 = vrot.slane %v54_v30, 2  ;;  %v61_v41 = vmax.f32 %v59_v25, %v60_v33  ;;  %v68_v42 = vmax.f32 %v66_v26, %v67_v34 }
   0xb   :  { %v22_v39 = vrot.slane %v21_v31, 1  ;;  %v28_v40 = vadd.f32 %v27_v32, %v26_v24  ;;  %v42_v44 = vadd.f32 %v41_v36, %v40_v28  ;;  %v49_v45 = vmax.f32 %v47_v29, %v48_v37 }
   0xc   :  { %v36_v43 = vrot.slane %v35_v35, 1  ;;  %v56_v46 = vmax.f32 %v54_v30, %v55_v38  ;;  %v62_v49 = vrot.slane %v61_v41, 2  ;;  %v69_v50 = vrot.slane %v68_v42, 2 }
   0xd   :  { %v23_v47 = vadd.f32 %v22_v39, %v21_v31  ;;  %v29_v48 = vrot.slane %v28_v40, 1  ;;  %v43_v52 = vrot.slane %v42_v44, 1  ;;  %v50_v53 = vrot.slane %v49_v45, 1 }
   0xe   :  { %v37_v51 = vadd.f32 %v36_v43, %v35_v35  ;;  %v57_v54 = vrot.slane %v56_v46, 1  ;;  %v87_v56 = vsub.s32 %v84_v17, %v86_v8  ;;  %v63_v57 = vmax.f32 %v61_v41, %v62_v49 }
   0xf   :  { %v30_v55 = vadd.f32 %v29_v48, %v28_v40  ;;  %v70_v58 = vmax.f32 %v68_v42, %v69_v50  ;;  %v44_v59 = vadd.f32 %v43_v52, %v42_v44  ;;  %v51_v60 = vmax.f32 %v49_v45, %v50_v53 }
  0x10   :  { %v58_v61 = vmax.f32 %v56_v46, %v57_v54  ;;  %v64_v63 = vrot.slane %v63_v57, 1  ;;  %vm115_vm1 = vcmp.lt.s32.totalorder %v85_v0, 256 }
  0x11   :  { %v81_v62 = vcombine.low %v23_v47, %v30_v55  ;;  %v71_v1 = vrot.slane %v70_v58, 1  ;;  %v96_v2 = vcombine.low %v37_v51, %v44_v59 }
  0x12   :  { %v124_v3 = vcombine.low %v51_v60, %v58_v61  ;;  %v65_v5 = vmax.f32 %v63_v57, %v64_v63 }
  0x13   :  { %v88_v4 = vrot.slane %v81_v62, %v87_v56  ;;  %v72_v6 = vmax.f32 %v70_v58, %v71_v1  ;;  %v103_v7 = vrot.slane %v96_v2, %v87_v56 }
  0x14   :  { %v131_v9 = vrot.slane %v124_v3, %v87_v56 }
  0x15   :  { %v95_v10 = vrot.slane %v88_v4, %v87_v56  ;;  %v139_v11 = vcombine.low %v65_v5, %v72_v6  ;;  %v110_v8 = vrot.slane %v103_v7, %v87_v56 }
  0x16   :  { %v138_v12 = vrot.slane %v131_v9, %v87_v56 }
  0x17   :  { %117 = vst.msk [vmem:[%s311_s1] ss:$2 sm:$0x3] %vm115_vm1, %v95_v10  ;;  %v146_v13 = vrot.slane %v139_v11, %v87_v56  ;;  %259 = vst.msk [vmem:[%s311_s1 + $0x4] ss:$2 sm:$0x3] %vm115_vm1, %v110_v8 }
  0x18   :  { %260 = vst.msk [vmem:[%s311_s1 + $0x1] ss:$2 sm:$0x3] %vm115_vm1, %v138_v12 }
  0x19   :  { %v153_v0 = vrot.slane %v146_v13, %v87_v56 }
  0x1b   :  { %261 = vst.msk [vmem:[%s311_s1 + $0x5] ss:$2 sm:$0x3] %vm115_vm1, %v153_v0 }

// kernel: spatial_attention_pallas.3
= control target key start
LH: loop header
LB: loop body
LE: loop exit
PB: predicated region body
PF: predicated region fallthrough
CT: control target
= control target key end

     0   :  { %7 = vsyncpa [#allocation4], 0  ;;  %s3771_s0 = inlined_call_operand.vmem [shape: f32[98], index: 0, kind: input, shape index: {}]   ;;  %s3772_s1 = inlined_call_operand.vmem [shape: f32[2,2,22,22], index: 1, kind: input, shape index: {}]   ;;  %s3773_s2 = inlined_call_operand.hbm [shape: f32[2,1,16,16], index: 2, kind: output, shape index: {}]  }
   0x1   :  { %8 = vsyncpa [#allocation3], 0 }
   0x2   :  { %10 = vsyncpa [#allocation3 + $0x1], 0  ;;  %s2469_s9 = smov 0   ;;  %s2471_s10 = smov 0  }
   0x3   :  { %s2473_s11 = smov 0   ;;  %s2475_s12 = smov 0  }
   0x4 LB: > { %s2490_s13 = sadd.s32 4294967295, %s2442_s12   ;;  %s2168_s14 = sadd.s32 4294967294, %s2442_s12   ;;  %s2442_s12 = sphi %s2475_s12, %s3786_s12   ;;  %s2438_s11 = sphi %s2473_s11, %s3785_s11   ;;  %s2434_s10 = sphi %s2471_s10, %s3784_s10   ;;  %s2430_s9 = sphi %s2469_s9, %s3783_s9  }
   0x5   : > { %s2494_s15 = sadd.s32 1, %s2442_s12   ;;  %s70_s16 = sadd.s32 1, %s2438_s11 }
   0x6   : > { %s67_s17 = ssub.s32 %s2442_s12, %s2494_s15  ;;  %p80_p0 = scmp.ne.s32.totalorder %s2438_s11, %s2434_s10 }
   0x7   : > { %p68_p1 = scmp.eq.s32.totalorder %s67_s17, 0  ;;  %p81_p2 = scmp.eq.s32.totalorder %s2490_s13, 1 }
   0x8   : > { %p86_p3 = scmp.ne.s32.totalorder %s2434_s10, %s2430_s9  ;;  %p87_p4 = scmp.eq.s32.totalorder %s2168_s14, 1 }
   0x9   : > { %s2505_s18 = scalar_select %p68_p1, %s2438_s11, %s70_s16  }
   0xa   : > { %p2507_p5 = por %p81_p2, %p80_p0  ;;  %p2511_p6 = por %p87_p4, %p86_p3 }
   0xb   : > { %p2169_p7 = scmp.ge.s32.totalorder %s2442_s12, 1  ;;  %p94_p8 = scmp.lt.s32.totalorder %s2442_s12, 3 }
   0xc   : > { %p2299_p9 = scmp.eq.s32.totalorder %s2490_s13, 0  ;;  %s107_s24 = sshll.u32 %s3771_s0, 4  ;;  %s108_s24 = int_to_ptr.vmem [resolvable:$true] %s107_s24 }
   0xd   : > { %p2518_p10 = pnand %p2169_p7, %p94_p8  ;;  %s2363_s25 = scalar_lea.vmem %s108_s24, 16 }
   0xe   : > { %p2364_p13 = scmp.ne.s32.totalorder %s108_s24, %s2363_s25  ;;  %p2371_p3 = scmp.lt.s32.totalorder %s108_s24, %s108_s24 }
   0xf   : > { %p2291_p11 = pneg %p2518_p10  ;;  %p2372_p4 = scmp.lt.s32.totalorder %s2363_s25, %s2363_s25 }
  0x11   : > { %p2292_p12 = pnand %p2299_p9, %p2291_p11  ;;  %p2373_p7 = por %p2372_p4, %p2371_p3 }
  0x13   : > { %p2365_p0 = pneg %p2292_p12 }
  0x15   : > { %p2366_p1 = pnand %p2365_p0, %p2364_p13 }
  0x17   : > { %p2367_p2 = pneg %p2366_p1 }
  0x19   : > { %p2374_p8 = pnand %p2373_p7, %p2367_p2 }
  0x1b   : > { %2377 = shalt.err (!%p2374_p8)
}
  0x1c   : > { %s2444_s26 = smov [#allocation2]   ;;  %128 = sbr.rel (%p2518_p10) target bundleno = 542 (0x21e), region = 28 }
  0x1d   : > { %2294 = dma.vmem_to_smem (!%p2292_p12), %s108_s24, 16, %s2444_s26, [#allocation4]  }
  0x21   : > { %2421 = dma.done.wait (%p2299_p9), [#allocation4], 16  }
  0x22   : > { %2423 = vsyncadd (%p2299_p9), [#allocation4], 4294967280 }
  0x23   : > { %134 = sfence }
  0x24   : > { %p151_p11 = scmp.lt.s32.totalorder %s2490_s13, 1  ;;  %s2193_s27 = sld [smem:[#allocation2 + $0x32]]  ;;  %vm184_vm0 = vcmask 1046528   ;;  %vm219_vm1 = vcmask 1045504   ;;  %vm254_vm2 = vcmask 1044480   ;;  %vm289_vm3 = vcmask 1043456  }
  0x25   : > { %s2192_s28 = sld [smem:[#allocation2 + $0x1]]  ;;  %s2445_s16 = smov 127   ;;  %vm324_vm4 = vcmask 1042432   ;;  %vm359_vm5 = vcmask 1041408   ;;  %vm2077_vm6 = vcmask 130048  }
  0x26   : > { %s152_s29 = scalar_select %p151_p11, %s2490_s13, 1 }
  0x27   : > { %s2194_s30 = sld [smem:[#allocation2 + $0x8]]  ;;  %s2446_s6 = smov 126  }
  0x28   : > { %s2284_s3 = smul.u32 48, %s152_s29  ;;  %s2195_s4 = sld [smem:[#allocation2 + $0x39]] }
  0x29   : > { %s2196_s5 = sld [smem:[#allocation2 + $0xf]] }
  0x2a   : > { %s2540_s8 = scalar_lea.vmem %s3772_s1, %s2284_s3  ;;  %v400_v0 = vstv %s2193_s27  ;;  %s2551_s14 = sld [smem:[#allocation2 + $0x40]] }
  0x2b   : > { %v2543_v1 = vld [vmem:[%s2540_s8 + $0x18] sm:$0xff]  ;;  %v2546_v2 = vld [vmem:[%s2540_s8 + $0x20] sm:$0xff]  ;;  %v387_v4 = vstv %s2192_s28  ;;  %v2555_v6 = vld [vmem:[%s2540_s8 + $0x8] sm:$0xff]  ;;  %s2198_s17 = sld [smem:[#allocation2 + $0x16]] }
  0x2c   : > { %v2549_v3 = vld [vmem:[%s2540_s8] sm:$0xff]  ;;  %v401_v5 = vmul.f32 %v2543_v1, %v400_v0  ;;  %v2559_v8 = vld [vmem:[%s2540_s8 + $0x10] sm:$0x3f]  ;;  %v2562_v9 = vld [vmem:[%s2540_s8 + $0x28] sm:$0x3f]  ;;  %v402_v10 = vmul.f32 %v2546_v2, %v400_v0  ;;  %v389_v11 = vmul.f32 %v387_v4, %v2555_v6  ;;  %s2199_s21 = sld [smem:[#allocation2 + $0x47]] }
  0x2d   : > { %v388_v7 = vmul.f32 %v387_v4, %v2549_v3  ;;  %v415_v12 = vstv %s2194_s30  ;;  %s2200_s22 = sld [smem:[#allocation2 + $0x1d]] }
  0x2e   : > { %405 = vrot.lane.b32.xlu1 %v401_v5, %s2445_s16  ;;  %v417_v13 = vmul.f32 %v415_v12, %v2555_v6  ;;  %v418_v14 = vmul.f32 %v415_v12, %v2559_v8  ;;  %v416_v15 = vmul.f32 %v415_v12, %v2549_v3  ;;  %v435_v16 = vstv %s2195_s4  ;;  %s2201_s23 = sld [smem:[#allocation2 + $0x4e]] }
  0x2f   : > { %392 = vrot.lane.b32.xlu0 %v388_v7, %s2445_s16  ;;  %v437_v17 = vmul.f32 %v2546_v2, %v435_v16  ;;  %v438_v18 = vmul.f32 %v2562_v9, %v435_v16  ;;  %v436_v19 = vmul.f32 %v2543_v1, %v435_v16  ;;  %v457_v20 = vstv %s2196_s5  ;;  %s2202_s24 = sld [smem:[#allocation2 + $0x24]] }
  0x30   : > { %v423_v21 = vrot.slane %v417_v13, 1  ;;  %v425_v22 = vrot.slane %v418_v14, 1  ;;  %v422_v23 = vrot.slane %v416_v15, 1  ;;  %v459_v24 = vmul.f32 %v457_v20, %v2555_v6  ;;  %s2203_s25 = sld [smem:[#allocation2 + $0x55]] }
  0x31   : > { %v460_v25 = vmul.f32 %v457_v20, %v2559_v8  ;;  %v443_v26 = vrot.slane %v437_v17, 1  ;;  %v445_v27 = vrot.slane %v438_v18, 1  ;;  %v442_v28 = vrot.slane %v436_v19, 1  ;;  %s2204_s26 = sld [smem:[#allocation2 + $0x2b]] }
  0x32   : > { %407 = vrot.lane.b32.xlu1 %v402_v10, %s2445_s16  ;;  %v426_v29 = vsel %vm184_vm0, %v423_v21, %v425_v22  ;;  %v424_v30 = vsel %vm184_vm0, %v422_v23, %v423_v21  ;;  %v458_v31 = vmul.f32 %v457_v20, %v2549_v3  ;;  %v477_v32 = vstv %s2551_s14  ;;  %s2205_s27 = sld [smem:[#allocation2 + $0x5c]] }
  0x33   : > { %394 = vrot.lane.b32.xlu0 %v389_v11, %s2445_s16  ;;  %v465_v33 = vrot.slane %v459_v24, 2  ;;  %v467_v34 = vrot.slane %v460_v25, 2  ;;  %v479_v35 = vmul.f32 %v2546_v2, %v477_v32  ;;  %v480_v36 = vmul.f32 %v2562_v9, %v477_v32  ;;  %s2206_s28 = sld [smem:[#allocation2 + $0x2]] }
  0x34   : > { %v478_v37 = vmul.f32 %v2543_v1, %v477_v32  ;;  %v446_v38 = vsel %vm184_vm0, %v443_v26, %v445_v27  ;;  %v444_v39 = vsel %vm184_vm0, %v442_v28, %v443_v26  ;;  %v464_v40 = vrot.slane %v458_v31, 2  ;;  %s2208_s29 = sld [smem:[#allocation2 + $0x9]] }
  0x35   : > { %v499_v41 = vstv %s2198_s17  ;;  %v468_v42 = vsel %vm219_vm1, %v465_v33, %v467_v34  ;;  %v485_v43 = vrot.slane %v479_v35, 2  ;;  %v487_v44 = vrot.slane %v480_v36, 2  ;;  %s2645_s30 = sld [smem:[#allocation2 + $0x33]] }
  0x36   : > { %429 = vrot.lane.b32.xlu1 %v426_v29, %s2445_s16  ;;  %v484_v45 = vrot.slane %v478_v37, 2  ;;  %v519_v46 = vstv %s2199_s21  ;;  %v466_v47 = vsel %vm219_vm1, %v464_v40, %v465_v33  ;;  %v501_v48 = vmul.f32 %v499_v41, %v2555_v6  ;;  %s2209_s3 = sld [smem:[#allocation2 + $0x3a]] }
  0x37   : > { %427 = vrot.lane.b32.xlu0 %v424_v30, %s2445_s16  ;;  %v502_v49 = vmul.f32 %v499_v41, %v2559_v8  ;;  %v500_v50 = vmul.f32 %v499_v41, %v2549_v3  ;;  %v521_v51 = vmul.f32 %v2546_v2, %v519_v46  ;;  %v488_v52 = vsel %vm219_vm1, %v485_v43, %v487_v44  ;;  %s2210_s4 = sld [smem:[#allocation2 + $0x10]] }
  0x38   : > { %v486_v53 = vsel %vm219_vm1, %v484_v45, %v485_v43  ;;  %v522_v54 = vmul.f32 %v2562_v9, %v519_v46  ;;  %v541_v55 = vstv %s2200_s22  ;;  %v507_v56 = vrot.slane %v501_v48, 3  ;;  %s2211_s5 = sld [smem:[#allocation2 + $0x41]] }
  0x39   : > { %v509_v57 = vrot.slane %v502_v49, 3  ;;  %v506_v58 = vrot.slane %v500_v50, 3  ;;  %v520_v59 = vmul.f32 %v2543_v1, %v519_v46  ;;  %v527_v60 = vrot.slane %v521_v51, 3  ;;  %s2212_s7 = sld [smem:[#allocation2 + $0x17]] }
  0x3a   : > { %449 = vrot.lane.b32.xlu1 %v446_v38, %s2445_s16  ;;  %v529_v61 = vrot.slane %v522_v54, 3  ;;  %v543_v62 = vmul.f32 %v541_v55, %v2555_v6  ;;  %v544_v63 = vmul.f32 %v541_v55, %v2559_v8  ;;  %v561_v0 = vstv %s2201_s23  ;;  %s2213_s14 = sld [smem:[#allocation2 + $0x48]] }
  0x3b   : > { %447 = vrot.lane.b32.xlu0 %v444_v39, %s2445_s16  ;;  %v510_v4 = vsel %vm254_vm2, %v507_v56, %v509_v57  ;;  %v508_v5 = vsel %vm254_vm2, %v506_v58, %v507_v56  ;;  %v526_v7 = vrot.slane %v520_v59, 3  ;;  %v542_v10 = vmul.f32 %v541_v55, %v2549_v3  ;;  %s2215_s17 = sld [smem:[#allocation2 + $0x4f]] }
  0x3c   : > { %v563_v11 = vmul.f32 %v2546_v2, %v561_v0  ;;  %v564_v12 = vmul.f32 %v2562_v9, %v561_v0  ;;  %v549_v13 = vrot.slane %v543_v62, 4  ;;  %v551_v14 = vrot.slane %v544_v63, 4  ;;  %s2216_s21 = sld [smem:[#allocation2 + $0x25]] }
  0x3d   : > { %v562_v15 = vmul.f32 %v2543_v1, %v561_v0  ;;  %v530_v16 = vsel %vm254_vm2, %v527_v60, %v529_v61  ;;  %v528_v17 = vsel %vm254_vm2, %v526_v7, %v527_v60  ;;  %v548_v18 = vrot.slane %v542_v10, 4  ;;  %s2217_s22 = sld [smem:[#allocation2 + $0x56]] }
  0x3e   : > { %471 = vrot.lane.b32.xlu1 %v468_v42, %s2445_s16  ;;  %v583_v19 = vstv %s2202_s24  ;;  %v569_v20 = vrot.slane %v563_v11, 4  ;;  %v571_v21 = vrot.slane %v564_v12, 4  ;;  %v552_v22 = vsel %vm289_vm3, %v549_v13, %v551_v14  ;;  %s2218_s23 = sld [smem:[#allocation2 + $0x2c]] }
  0x3f   : > { %469 = vrot.lane.b32.xlu0 %v466_v47, %s2445_s16  ;;  %v568_v23 = vrot.slane %v562_v15, 4  ;;  %v603_v24 = vstv %s2203_s25  ;;  %v550_v25 = vsel %vm289_vm3, %v548_v18, %v549_v13  ;;  %v585_v26 = vmul.f32 %v583_v19, %v2555_v6  ;;  %s2219_s24 = sld [smem:[#allocation2 + $0x5d]] }
  0x40   : > { %v586_v27 = vmul.f32 %v583_v19, %v2559_v8  ;;  %v584_v28 = vmul.f32 %v583_v19, %v2549_v3  ;;  %v572_v29 = vsel %vm289_vm3, %v569_v20, %v571_v21  ;;  %v605_v30 = vmul.f32 %v2546_v2, %v603_v24  ;;  %s2726_s25 = sld [smem:[#allocation2 + $0x3]] }
  0x41   : > { %v570_v31 = vsel %vm289_vm3, %v568_v23, %v569_v20  ;;  %v606_v32 = vmul.f32 %v2562_v9, %v603_v24  ;;  %v604_v33 = vmul.f32 %v2543_v1, %v603_v24  ;;  %v591_v34 = vrot.slane %v585_v26, 5 }
  0x42   : > { %491 = vrot.lane.b32.xlu1 %v488_v52, %s2445_s16  ;;  %v593_v35 = vrot.slane %v586_v27, 5  ;;  %v590_v36 = vrot.slane %v584_v28, 5  ;;  %v625_v37 = vstv %s2204_s26  ;;  %v611_v38 = vrot.slane %v605_v30, 5  ;;  %s2728_s26 = sld [smem:[#allocation2]] }
  0x43   : > { %489 = vrot.lane.b32.xlu0 %v486_v53, %s2445_s16  ;;  %v613_v39 = vrot.slane %v606_v32, 5  ;;  %v610_v40 = vrot.slane %v604_v33, 5  ;;  %v627_v41 = vmul.f32 %v625_v37, %v2555_v6  ;;  %v645_v42 = vstv %s2205_s27  ;;  %s2731_s27 = sld [smem:[#allocation2 + $0x7]] }
  0x44   : > { %v594_v43 = vsel %vm324_vm4, %v591_v34, %v593_v35  ;;  %v592_v44 = vsel %vm324_vm4, %v590_v36, %v591_v34  ;;  %v628_v45 = vmul.f32 %v625_v37, %v2559_v8  ;;  %v626_v46 = vmul.f32 %v625_v37, %v2549_v3 }
  0x45   : > { %v614_v47 = vsel %vm324_vm4, %v611_v38, %v613_v39  ;;  %v612_v48 = vsel %vm324_vm4, %v610_v40, %v611_v38  ;;  %v633_v49 = vrot.slane %v627_v41, 6  ;;  %v647_v50 = vmul.f32 %v2546_v2, %v645_v42 }
  0x46   : > { %513 = vrot.lane.b32.xlu1 %v510_v4, %s2445_s16  ;;  %v635_v51 = vrot.slane %v628_v45, 6  ;;  %v632_v52 = vrot.slane %v626_v46, 6  ;;  %v648_v53 = vmul.f32 %v2562_v9, %v645_v42  ;;  %v646_v54 = vmul.f32 %v2543_v1, %v645_v42 }
  0x47   : > { %511 = vrot.lane.b32.xlu0 %v508_v5, %s2445_s16  ;;  %v653_v55 = vrot.slane %v647_v50, 6  ;;  %v667_v62 = vstv %s2206_s28  ;;  %v695_v63 = vstv %s2208_s29  ;;  %v680_v5 = vstv %s2645_s30  ;;  %s2181_s28 = sld [smem:[#allocation2 + $0x38]] }
  0x48   : > { %v636_v56 = vsel %vm359_vm5, %v633_v49, %v635_v51  ;;  %v634_v57 = vsel %vm359_vm5, %v632_v52, %v633_v49  ;;  %v655_v58 = vrot.slane %v648_v53, 6  ;;  %v652_v59 = vrot.slane %v646_v54, 6  ;;  %s2739_s29 = sld [smem:[#allocation2 + $0x31]] }
  0x49   : > { %v669_v0 = vmul.f32 %v667_v62, %v2555_v6  ;;  %v668_v4 = vmul.f32 %v667_v62, %v2549_v3  ;;  %v715_v7 = vstv %s2209_s3  ;;  %v697_v10 = vmul.f32 %v695_v63, %v2555_v6  ;;  %s2741_s30 = sld [smem:[#allocation2 + $0xe]] }
  0x4a   : > { %533 = vrot.lane.b32.xlu1 %v530_v16, %s2445_s16  ;;  %v656_v60 = vsel %vm359_vm5, %v653_v55, %v655_v58  ;;  %v654_v61 = vsel %vm359_vm5, %v652_v59, %v653_v55  ;;  %v698_v11 = vmul.f32 %v695_v63, %v2559_v8  ;;  %v696_v12 = vmul.f32 %v695_v63, %v2549_v3  ;;  %s2743_s3 = sld [smem:[#allocation2 + $0x3f]] }
  0x4b   : > { %531 = vrot.lane.b32.xlu0 %v528_v17, %s2445_s16  ;;  %v682_v13 = vmul.f32 %v2546_v2, %v680_v5  ;;  %v717_v14 = vmul.f32 %v2546_v2, %v715_v7  ;;  %v681_v15 = vmul.f32 %v2543_v1, %v680_v5  ;;  %v718_v16 = vmul.f32 %v2562_v9, %v715_v7 }
  0x4c   : > { %v716_v17 = vmul.f32 %v2543_v1, %v715_v7  ;;  %v703_v18 = vrot.slane %v697_v10, 1  ;;  %v705_v19 = vrot.slane %v698_v11, 1  ;;  %v702_v20 = vrot.slane %v696_v12, 1 }
  0x4d   : > { %v737_v21 = vstv %s2210_s4  ;;  %v757_v23 = vstv %s2211_s5  ;;  %v725_v24 = vrot.slane %v718_v16, 1  ;;  %v779_v39 = vstv %s2212_s7  ;;  %s2749_s4 = sld [smem:[#allocation2 + $0x15]] }
  0x4e   : > { %555 = vrot.lane.b32.xlu1 %v552_v22, %s2445_s16  ;;  %v723_v22 = vrot.slane %v717_v14, 1  ;;  %v739_v26 = vmul.f32 %v737_v21, %v2555_v6  ;;  %v740_v27 = vmul.f32 %v737_v21, %v2559_v8  ;;  %v706_v28 = vsel %vm184_vm0, %v703_v18, %v705_v19  ;;  %s2222_s5 = sld [smem:[#allocation2 + $0xa]] }
  0x4f   : > { %553 = vrot.lane.b32.xlu0 %v550_v25, %s2445_s16  ;;  %v722_v25 = vrot.slane %v716_v17, 1  ;;  %v738_v30 = vmul.f32 %v737_v21, %v2549_v3  ;;  %v760_v37 = vmul.f32 %v2562_v9, %v757_v23  ;;  %v758_v38 = vmul.f32 %v2543_v1, %v757_v23  ;;  %s2754_s7 = sld [smem:[#allocation2 + $0x46]] }
  0x50   : > { %v726_v32 = vsel %vm184_vm0, %v723_v22, %v725_v24  ;;  %v745_v34 = vrot.slane %v739_v26, 2  ;;  %v747_v35 = vrot.slane %v740_v27, 2  ;;  %v781_v42 = vmul.f32 %v779_v39, %v2555_v6 }
  0x51   : > { %v724_v33 = vsel %vm184_vm0, %v722_v25, %v723_v22  ;;  %v744_v36 = vrot.slane %v738_v30, 2  ;;  %v767_v46 = vrot.slane %v760_v37, 2  ;;  %v841_v62 = vstv %s2215_s17  ;;  %s2770_s17 = sld [smem:[#allocation2 + $0x1c]] }
  0x52   : > { %575 = vrot.lane.b32.xlu1 %v572_v29, %s2445_s16  ;;  %v704_v29 = vsel %vm184_vm0, %v702_v20, %v703_v18  ;;  %v748_v41 = vsel %vm219_vm1, %v745_v34, %v747_v35  ;;  %v787_v51 = vrot.slane %v781_v42, 3  ;;  %v843_v11 = vmul.f32 %v2546_v2, %v841_v62 }
  0x53   : > { %573 = vrot.lane.b32.xlu0 %v570_v31, %s2445_s16  ;;  %v759_v31 = vmul.f32 %v2546_v2, %v757_v23  ;;  %v746_v45 = vsel %vm219_vm1, %v744_v36, %v745_v34  ;;  %v844_v12 = vmul.f32 %v2562_v9, %v841_v62  ;;  %v842_v17 = vmul.f32 %v2543_v1, %v841_v62 }
  0x54   : > { %v849_v20 = vrot.slane %v843_v11, 4  ;;  %v883_v26 = vstv %s2217_s22  ;;  %v905_v35 = vstv %s2218_s23  ;;  %v165_v11 = vstv %s2728_s26  ;;  %s2810_s22 = sld [smem:[#allocation2 + $0x11]] }
  0x55   : > { %v765_v40 = vrot.slane %v759_v31, 2  ;;  %v851_v21 = vrot.slane %v844_v12, 4  ;;  %v848_v25 = vrot.slane %v842_v17, 4  ;;  %v885_v31 = vmul.f32 %v2546_v2, %v883_v26  ;;  %s2816_s23 = sld [smem:[#allocation2 + $0x23]] }
  0x56   : > { %597 = vrot.lane.b32.xlu1 %v594_v43, %s2445_s16  ;;  %v782_v43 = vmul.f32 %v779_v39, %v2559_v8  ;;  %v884_v34 = vmul.f32 %v2543_v1, %v883_v26  ;;  %v2808_v17 = vstv %s2749_s4  ;;  %s2953_s26 = sld [smem:[#allocation2 + $0x50]] }
  0x57   : > { %595 = vrot.lane.b32.xlu0 %v592_v44, %s2445_s16  ;;  %v799_v44 = vstv %s2213_s14  ;;  %v768_v54 = vsel %vm219_vm1, %v765_v40, %v767_v46  ;;  %s2756_s14 = sld [smem:[#allocation2 + $0x34]] }
  0x58   : > { %v801_v49 = vmul.f32 %v2546_v2, %v799_v44  ;;  %v802_v50 = vmul.f32 %v2562_v9, %v799_v44  ;;  %v789_v52 = vrot.slane %v782_v43, 3  ;;  %v800_v53 = vmul.f32 %v2543_v1, %v799_v44  ;;  %s3009_s4 = sld [smem:[#allocation2 + $0x57]] }
  0x59   : > { %v890_v42 = vrot.slane %v884_v34, 5  ;;  %v906_v43 = vmul.f32 %v905_v35, %v2549_v3  ;;  %v925_v44 = vstv %s2219_s24  ;;  %s2447_s24 = smov 125  }
  0x5a   : > { %617 = vrot.lane.b32.xlu1 %v614_v47, %s2445_s16  ;;  %v764_v47 = vrot.slane %v758_v38, 2  ;;  %v807_v58 = vrot.slane %v801_v49, 3  ;;  %v809_v59 = vrot.slane %v802_v50, 3  ;;  %v891_v38 = vrot.slane %v885_v31, 5 }
  0x5b   : > { %615 = vrot.lane.b32.xlu0 %v612_v48, %s2445_s16  ;;  %v780_v48 = vmul.f32 %v779_v39, %v2549_v3  ;;  %v907_v39 = vmul.f32 %v905_v35, %v2555_v6 }
  0x5c   : > { %v766_v55 = vsel %vm219_vm1, %v764_v47, %v765_v40  ;;  %v810_v7 = vsel %vm254_vm2, %v807_v58, %v809_v59  ;;  %v908_v40 = vmul.f32 %v905_v35, %v2559_v8  ;;  %v927_v47 = vmul.f32 %v2546_v2, %v925_v44 }
  0x5d   : > { %v892_v50 = vsel %vm324_vm4, %v890_v42, %v891_v38 }
  0x5e   : > { %639 = vrot.lane.b32.xlu1 %v636_v56, %s2445_s16  ;;  %v786_v56 = vrot.slane %v780_v48, 3  ;;  %v915_v46 = vrot.slane %v908_v40, 6  ;;  %v928_v48 = vmul.f32 %v2562_v9, %v925_v44 }
  0x5f   : > { %637 = vrot.lane.b32.xlu0 %v634_v57, %s2445_s16 }
  0x60   : > { %v788_v63 = vsel %vm254_vm2, %v786_v56, %v787_v51  ;;  %v2763_v56 = vstv %s2181_s28  ;;  %s2909_s28 = sld [smem:[#allocation2 + $0x49]] }
  0x61   : > { %v2791_v12 = vmul.f32 %v2546_v2, %v2763_v56 }
  0x62   : > { %659 = vrot.lane.b32.xlu1 %v656_v60, %s2445_s16  ;;  %v790_v60 = vsel %vm254_vm2, %v787_v51, %v789_v52  ;;  %v912_v51 = vrot.slane %v906_v43, 6  ;;  %v926_v52 = vmul.f32 %v2543_v1, %v925_v44 }
  0x63   : > { %657 = vrot.lane.b32.xlu0 %v654_v61, %s2445_s16  ;;  %s2214_s16 = sld [smem:[#allocation2 + $0x1e]]  ;;  %v806_v61 = vrot.slane %v800_v53, 3  ;;  %v933_v53 = vrot.slane %v927_v47, 6 }
  0x64   : > { %v932_v59 = vrot.slane %v926_v52, 6 }
  0x65   : > { %v808_v10 = vsel %vm254_vm2, %v806_v61, %v807_v58  ;;  %v170_v61 = vstv %s2739_s29  ;;  %s2984_s29 = sld [smem:[#allocation2 + $0x26]] }
  0x66   : > { %674 = vrot.lane.b32.xlu1 %v669_v0, %s2446_s6 }
  0x67   : > { %672 = vrot.lane.b32.xlu0 %v668_v4, %s2446_s6 }
  0x69   : > { %v821_v57 = vstv %s2214_s16  ;;  %s2765_s16 = sld [smem:[#allocation2 + $0x3b]] }
  0x6a   : > { %687 = vrot.lane.b32.xlu1 %v682_v13, %s2446_s6  ;;  %v823_v0 = vmul.f32 %v821_v57, %v2555_v6  ;;  %v824_v4 = vmul.f32 %v821_v57, %v2559_v8  ;;  %v822_v5 = vmul.f32 %v821_v57, %v2549_v3  ;;  %v863_v13 = vstv %s2216_s21  ;;  %s2793_s21 = sld [smem:[#allocation2 + $0x4d]] }
  0x6b   : > { %685 = vrot.lane.b32.xlu0 %v681_v15, %s2446_s6  ;;  %v865_v18 = vmul.f32 %v863_v13, %v2555_v6  ;;  %v866_v19 = vmul.f32 %v863_v13, %v2559_v8  ;;  %v864_v22 = vmul.f32 %v863_v13, %v2549_v3  ;;  %v975_v13 = vstv %s2222_s5  ;;  %s3036_s5 = sld [smem:[#allocation2 + $0x2d]] }
  0x6c   : > { %v829_v14 = vrot.slane %v823_v0, 4  ;;  %v831_v15 = vrot.slane %v824_v4, 4  ;;  %v828_v16 = vrot.slane %v822_v5, 4  ;;  %v2780_v0 = vstv %s2741_s30  ;;  %s2930_s30 = sld [smem:[#allocation2 + $0x1f]] }
  0x6d   : > { %v871_v27 = vrot.slane %v865_v18, 5  ;;  %v870_v30 = vrot.slane %v864_v22, 5  ;;  %v977_v22 = vmul.f32 %v975_v13, %v2555_v6 }
  0x6e   : > { %709 = vrot.lane.b32.xlu1 %v706_v28, %s2446_s6  ;;  %v832_v23 = vsel %vm289_vm3, %v829_v14, %v831_v15  ;;  %v830_v24 = vsel %vm289_vm3, %v828_v16, %v829_v14  ;;  %v873_v28 = vrot.slane %v866_v19, 5  ;;  %v2798_v14 = vmul.f32 %v2543_v1, %v170_v61 }
  0x6f   : > { %707 = vrot.lane.b32.xlu0 %v704_v29, %s2446_s6  ;;  %v852_v29 = vsel %vm289_vm3, %v849_v20, %v851_v21  ;;  %v872_v37 = vsel %vm324_vm4, %v870_v30, %v871_v27  ;;  %v2802_v15 = vmul.f32 %v2780_v0, %v2555_v6  ;;  %v2805_v16 = vstv %s2743_s3  ;;  %s3000_s3 = sld [smem:[#allocation2 + $0x2a]] }
  0x70   : > { %v874_v36 = vsel %vm324_vm4, %v871_v27, %v873_v28  ;;  %v960_v21 = vstv %s2756_s14  ;;  %v230_v27 = vmul.f32 %v2543_v1, %v2805_v16  ;;  %v2830_v28 = vmul.f32 %v2546_v2, %v2805_v16  ;;  %s3102_s14 = sld [smem:[#allocation2 + $0x5b]] }
  0x71   : > { %v221_v30 = vrot.slane %v2802_v15, 2  ;;  %v962_v34 = vmul.f32 %v2546_v2, %v960_v21  ;;  %v961_v35 = vmul.f32 %v2543_v1, %v960_v21  ;;  %v2875_v52 = vstv %s2793_s21  ;;  %s3172_s21 = sld [smem:[#allocation2 + $0x35]] }
  0x72   : > { %729 = vrot.lane.b32.xlu1 %v726_v32, %s2446_s6  ;;  %v850_v32 = vsel %vm289_vm3, %v848_v25, %v849_v20  ;;  %v2814_v20 = vstv %s2754_s7  ;;  %v995_v25 = vstv %s2765_s16  ;;  %v236_v43 = vrot.slane %v230_v27, 2  ;;  %s3045_s7 = sld [smem:[#allocation2 + $0x5e]] }
  0x73   : > { %727 = vrot.lane.b32.xlu0 %v724_v33, %s2446_s6  ;;  %v886_v33 = vmul.f32 %v2562_v9, %v883_v26  ;;  %v202_v26 = vrot.slane %v2791_v12, 1  ;;  %v265_v31 = vmul.f32 %v2543_v1, %v2814_v20  ;;  %v237_v44 = vrot.slane %v2830_v28, 2  ;;  %s3146_s16 = sld [smem:[#allocation2 + $0x4]] }
  0x74   : > { %v2901_v21 = vmul.f32 %v2543_v1, %v2875_v52  ;;  %v2918_v27 = vmul.f32 %v2546_v2, %v2875_v52 }
  0x75   : > { %v271_v47 = vrot.slane %v265_v31, 3 }
  0x76   : > { %751 = vrot.lane.b32.xlu1 %v748_v41, %s2446_s6  ;;  %v893_v41 = vrot.slane %v886_v33, 5  ;;  %v2846_v33 = vstv %s2770_s17  ;;  %s3150_s17 = sld [smem:[#allocation2 + $0xb]] }
  0x77   : > { %749 = vrot.lane.b32.xlu0 %v746_v45, %s2446_s6  ;;  %v913_v45 = vrot.slane %v907_v39, 6 }
  0x78   : > { %v894_v49 = vsel %vm324_vm4, %v891_v38, %v893_v41  ;;  %v983_v38 = vrot.slane %v977_v22, 1  ;;  %v996_v41 = vmul.f32 %v2543_v1, %v995_v25 }
  0x79   : > { %v916_v57 = vsel %vm359_vm5, %v913_v45, %v915_v46  ;;  %v914_v58 = vsel %vm359_vm5, %v912_v51, %v913_v45  ;;  %v1017_v51 = vstv %s2810_s22  ;;  %s3176_s22 = sld [smem:[#allocation2 + $0x3c]] }
  0x7a   : > { %771 = vrot.lane.b32.xlu1 %v768_v54, %s2446_s6  ;;  %v935_v54 = vrot.slane %v928_v48, 6 }
  0x7b   : > { %769 = vrot.lane.b32.xlu0 %v766_v55, %s2446_s6  ;;  %v2761_v55 = vstv %s2731_s27  ;;  %s2887_s27 = sld [smem:[#allocation2 + $0x54]] }
  0x7c   : > { %v2775_v62 = vmul.f32 %v2761_v55, %v2555_v6  ;;  %v936_v4 = vsel %vm359_vm5, %v933_v53, %v935_v54  ;;  %v178_v22 = vmul.f32 %v2761_v55, %v2549_v3  ;;  %v180_v31 = vmul.f32 %v2761_v55, %v2559_v8 }
  0x7e   : > { %793 = vrot.lane.b32.xlu1 %v790_v60, %s2446_s6  ;;  %v947_v60 = vstv %s2726_s25  ;;  %v186_v18 = vrot.slane %v2775_v62, 1  ;;  %s2855_s25 = sld [smem:[#allocation2 + $0x18]] }
  0x7f   : > { %791 = vrot.lane.b32.xlu0 %v788_v63, %s2446_s6  ;;  %v195_v63 = vmul.f32 %v2543_v1, %v2763_v56  ;;  %v949_v5 = vmul.f32 %v947_v60, %v2555_v6 }
  0x81   : > { %v201_v19 = vrot.slane %v195_v63, 1  ;;  %v1002_v63 = vrot.slane %v996_v41, 1 }
  0x82   : > { %813 = vrot.lane.b32.xlu1 %v810_v7, %s2446_s6  ;;  %v948_v7 = vmul.f32 %v947_v60, %v2549_v3 }
  0x83   : > { %811 = vrot.lane.b32.xlu0 %v808_v10, %s2446_s6  ;;  %v934_v10 = vsel %vm359_vm5, %v932_v59, %v933_v53  ;;  %v2860_v42 = vsel %vm184_vm0, %v201_v19, %v202_v26  ;;  %v2878_v53 = vstv %s2816_s23  ;;  %s3193_s23 = sld [smem:[#allocation2 + $0x12]] }
  0x84   : > { %v2934_v55 = vmul.f32 %v2878_v53, %v2555_v6 }
  0x86   : > { %835 = vrot.lane.b32.xlu1 %v832_v23, %s2446_s6  ;;  %v978_v23 = vmul.f32 %v975_v13, %v2559_v8 }
  0x87   : > { %833 = vrot.lane.b32.xlu0 %v830_v24, %s2446_s6  ;;  %v976_v24 = vmul.f32 %v975_v13, %v2549_v3  ;;  %v2896_v13 = vsel %vm219_vm1, %v236_v43, %v237_v44 }
  0x88   : > { %v985_v39 = vrot.slane %v978_v23, 1 }
  0x89   : > { %v982_v40 = vrot.slane %v976_v24, 1 }
  0x8a   : > { %855 = vrot.lane.b32.xlu1 %v852_v29, %s2446_s6  ;;  %v2834_v29 = vmul.f32 %v2808_v17, %v2555_v6  ;;  %v986_v59 = vsel %vm184_vm0, %v983_v38, %v985_v39 }
  0x8b   : > { %853 = vrot.lane.b32.xlu0 %v850_v32, %s2446_s6  ;;  %v2843_v32 = vmul.f32 %v2546_v2, %v2814_v20  ;;  %v984_v60 = vsel %vm184_vm0, %v982_v40, %v983_v38  ;;  %v1059_v38 = vstv %s2855_s25  ;;  %s3237_s25 = sld [smem:[#allocation2 + $0x19]] }
  0x8d   : > { %v3774_v48 = vrot.slane %v2843_v32, 3 }
  0x8e   : > { %877 = vrot.lane.b32.xlu1 %v874_v36, %s2446_s6  ;;  %v997_v36 = vmul.f32 %v2546_v2, %v995_v25 }
  0x8f   : > { %875 = vrot.lane.b32.xlu0 %v872_v37, %s2446_s6  ;;  %v998_v37 = vmul.f32 %v2562_v9, %v995_v25  ;;  %v2914_v25 = vsel %vm254_vm2, %v271_v47, %v3774_v48  ;;  %v185_v47 = vrot.slane %v178_v22, 1  ;;  %v2956_v22 = vstv %s2887_s27  ;;  %s3241_s27 = sld [smem:[#allocation2 + $0x4a]] }
  0x90   : > { %v1003_v54 = vrot.slane %v997_v36, 1 }
  0x92   : > { %897 = vrot.lane.b32.xlu1 %v894_v49, %s2446_s6  ;;  %v2869_v49 = vmul.f32 %v2846_v33, %v2555_v6  ;;  %v1004_v39 = vsel %vm184_vm0, %v1002_v63, %v1003_v54  ;;  %v197_v63 = vmul.f32 %v2562_v9, %v2763_v56 }
  0x93   : > { %895 = vrot.lane.b32.xlu0 %v892_v50, %s2446_s6 }
  0x96   : > { %919 = vrot.lane.b32.xlu1 %v916_v57, %s2446_s6  ;;  %v1005_v57 = vrot.slane %v998_v37, 1 }
  0x97   : > { %917 = vrot.lane.b32.xlu0 %v914_v58, %s2446_s6  ;;  %v166_v58 = vmul.f32 %v165_v11, %v2549_v3 }
  0x99   : > { %v173_v56 = vadd.f32 %v2798_v14, %v166_v58  ;;  %v1079_v14 = vstv %s2909_s28  ;;  %s3258_s28 = sld [smem:[#allocation2 + $0x20]] }
  0x9a   : > { %939 = vrot.lane.b32.xlu1 %v936_v4, %s2446_s6  ;;  %v1019_v4 = vmul.f32 %v1017_v51, %v2555_v6  ;;  %v1081_v45 = vmul.f32 %v2546_v2, %v1079_v14 }
  0x9b   : > { %937 = vrot.lane.b32.xlu0 %v934_v10, %s2446_s6  ;;  %s2836_s6 = sld [smem:[#allocation2 + $0x42]] }
  0x9c   : > { %v1025_v40 = vrot.slane %v1019_v4, 2  ;;  %v1061_v4 = vmul.f32 %v1059_v38, %v2555_v6 }
  0x9e   : > { %954 = vrot.lane.b32.xlu1 %v949_v5, %s2447_s24  ;;  %v1020_v5 = vmul.f32 %v1017_v51, %v2559_v8 }
  0x9f   : > { %952 = vrot.lane.b32.xlu0 %v948_v7, %s2447_s24  ;;  %v1018_v7 = vmul.f32 %v1017_v51, %v2549_v3  ;;  %v167_v51 = vmul.f32 %v165_v11, %v2555_v6 }
  0xa0   : > { %v2864_v46 = vpop.permute.xlu1 %405  ;;  %v1027_v41 = vrot.slane %v1020_v5, 2  ;;  %v1062_v5 = vmul.f32 %v1059_v38, %v2559_v8 }
  0xa1   : > { %v2871_v50 = vpop.permute.xlu0 %392  ;;  %v1037_v10 = vstv %s2836_s6  ;;  %v1024_v43 = vrot.slane %v1018_v7, 2  ;;  %s3213_s6 = sld [smem:[#allocation2 + $0x43]] }
  0xa2   : > { %967 = vrot.lane.b32.xlu1 %v962_v34, %s2447_s24  ;;  %v1006_v34 = vsel %vm184_vm0, %v1003_v54, %v1005_v57  ;;  %v1040_v36 = vmul.f32 %v2562_v9, %v1037_v10  ;;  %v1038_v37 = vmul.f32 %v2543_v1, %v1037_v10  ;;  %v172_v57 = vmul.f32 %v2546_v2, %v170_v61 }
  0xa3   : > { %965 = vrot.lane.b32.xlu0 %v961_v35, %s2447_s24  ;;  %v1039_v35 = vmul.f32 %v2546_v2, %v1037_v10  ;;  %v1060_v10 = vmul.f32 %v1059_v38, %v2549_v3  ;;  %v1026_v19 = vsel %vm219_vm1, %v1024_v43, %v1025_v40 }
  0xa4   : > { %v2905_v23 = vpop.permute.xlu1 %407  ;;  %v1047_v7 = vrot.slane %v1040_v36, 2  ;;  %v1044_v61 = vrot.slane %v1038_v37, 2  ;;  %v215_v36 = vmul.f32 %v2780_v0, %v2559_v8  ;;  %v174_v58 = vadd.f32 %v172_v57, %v167_v51 }
  0xa5   : > { %v2907_v24 = vpop.permute.xlu0 %394  ;;  %v1045_v11 = vrot.slane %v1039_v35, 2  ;;  %v213_v35 = vmul.f32 %v2780_v0, %v2549_v3  ;;  %v1066_v48 = vrot.slane %v1060_v10, 3  ;;  %v1082_v51 = vmul.f32 %v2562_v9, %v1079_v14 }
  0xa6   : > { %989 = vrot.lane.b32.xlu1 %v986_v59, %s2447_s24  ;;  %v1080_v57 = vmul.f32 %v2543_v1, %v1079_v14 }
  0xa7   : > { %987 = vrot.lane.b32.xlu0 %v984_v60, %s2447_s24  ;;  %v188_v60 = vrot.slane %v180_v31, 1  ;;  %v1028_v31 = vsel %vm219_vm1, %v1025_v40, %v1027_v41  ;;  %v1067_v41 = vrot.slane %v1061_v4, 3  ;;  %v1069_v40 = vrot.slane %v1062_v5, 3 }
  0xa8   : > { %v2942_v59 = vpop.permute.xlu1 %429  ;;  %v1048_v0 = vsel %vm219_vm1, %v1045_v11, %v1047_v7  ;;  %v1089_v12 = vrot.slane %v1082_v51, 3  ;;  %v1086_v14 = vrot.slane %v1080_v57, 3  ;;  %v1143_v57 = vstv %s2984_s29  ;;  %s3306_s29 = sld [smem:[#allocation2 + $0x58]] }
  0xa9   : > { %v2944_v54 = vpop.permute.xlu0 %427  ;;  %v189_v43 = vsel %vm184_vm0, %v186_v18, %v188_v60  ;;  %v232_v60 = vmul.f32 %v2562_v9, %v2805_v16  ;;  %v1070_v10 = vsel %vm254_vm2, %v1067_v41, %v1069_v40  ;;  %v1068_v16 = vsel %vm254_vm2, %v1066_v48, %v1067_v41 }
  0xaa   : > { %1009 = vrot.lane.b32.xlu1 %v1006_v34, %s2447_s24  ;;  %v187_v34 = vsel %vm184_vm0, %v185_v47, %v186_v18  ;;  %v1046_v47 = vsel %vm219_vm1, %v1044_v61, %v1045_v11  ;;  %v220_v18 = vrot.slane %v213_v35, 2  ;;  %v193_v11 = vadd.f32 %v189_v43, %v174_v58 }
  0xab   : > { %1007 = vrot.lane.b32.xlu0 %v1004_v39, %s2447_s24  ;;  %v204_v39 = vrot.slane %v197_v63, 1  ;;  %v1101_v63 = vstv %s2930_s30  ;;  %v192_v62 = vadd.f32 %v187_v34, %v173_v56  ;;  %v223_v61 = vrot.slane %v215_v36, 2  ;;  %s3282_s30 = sld [smem:[#allocation2 + $0x51]] }
  0xac   : > { %v2968_v37 = vpop.permute.xlu1 %449  ;;  %v1103_v56 = vmul.f32 %v1101_v63, %v2555_v6  ;;  %v1121_v34 = vstv %s2953_s26  ;;  %v1087_v35 = vrot.slane %v1081_v45, 3  ;;  %v222_v58 = vsel %vm219_vm1, %v220_v18, %v221_v30  ;;  %s3287_s26 = sld [smem:[#allocation2 + $0x27]] }
  0xad   : > { %v2970_v38 = vpop.permute.xlu0 %447  ;;  %v205_v7 = vsel %vm184_vm0, %v202_v26, %v204_v39  ;;  %v1102_v26 = vmul.f32 %v1101_v63, %v2549_v3  ;;  %v208_v36 = vadd.f32 %v2860_v42, %v192_v62  ;;  %v3017_v48 = vmul.f32 %v2846_v33, %v2549_v3 }
  0xae   : > { %1031 = vrot.lane.b32.xlu1 %v1028_v31, %s2447_s24  ;;  %v1104_v31 = vmul.f32 %v1101_v63, %v2559_v8  ;;  %v250_v6 = vmul.f32 %v2808_v17, %v2559_v8  ;;  %v209_v41 = vadd.f32 %v205_v7, %v193_v11  ;;  %v1123_v40 = vmul.f32 %v2546_v2, %v1121_v34 }
  0xaf   : > { %1029 = vrot.lane.b32.xlu0 %v1026_v19, %s2447_s24  ;;  %v2988_v19 = vmul.f32 %v2808_v17, %v2549_v3  ;;  %v1124_v42 = vmul.f32 %v2562_v9, %v1121_v34  ;;  %v1122_v43 = vmul.f32 %v2543_v1, %v1121_v34  ;;  %v224_v3 = vsel %vm219_vm1, %v221_v30, %v223_v61 }
  0xb0   : > { %v2992_v4 = vpop.permute.xlu1 %471  ;;  %v1109_v8 = vrot.slane %v1103_v56, 4  ;;  %v1111_v17 = vrot.slane %v1104_v31, 4  ;;  %v1088_v2 = vsel %vm254_vm2, %v1086_v14, %v1087_v35  ;;  %v1108_v51 = vrot.slane %v1102_v26, 4  ;;  %v3062_v31 = vld [vmem:[%s2540_s8 + $0x10] sm:$0x3f] }
  0xb1   : > { %v2994_v5 = vpop.permute.xlu0 %469  ;;  %v227_v1 = vadd.f32 %v222_v58, %v208_v36  ;;  %v255_v15 = vrot.slane %v2988_v19, 3  ;;  %v258_v30 = vrot.slane %v250_v6, 3  ;;  %v267_v63 = vmul.f32 %v2562_v9, %v2814_v20  ;;  %v3057_v20 = vld [vmem:[%s2540_s8 + $0x8] sm:$0xff] }
  0xb2   : > { %1051 = vrot.lane.b32.xlu1 %v1048_v0, %s2447_s24  ;;  %v239_v0 = vrot.slane %v232_v60, 2  ;;  %v228_v60 = vadd.f32 %v224_v3, %v209_v41  ;;  %v1129_v11 = vrot.slane %v1123_v40, 4  ;;  %v1131_v7 = vrot.slane %v1124_v42, 4 }
  0xb3   : > { %1049 = vrot.lane.b32.xlu0 %v1046_v47, %s2447_s24  ;;  %v1090_v47 = vsel %vm254_vm2, %v1087_v35, %v1089_v12  ;;  %v1128_v61 = vrot.slane %v1122_v43, 4  ;;  %v1112_v9 = vsel %vm289_vm3, %v1109_v8, %v1111_v17  ;;  %v1110_v56 = vsel %vm289_vm3, %v1108_v51, %v1109_v8  ;;  %v3066_v35 = vld [vmem:[%s2540_s8] sm:$0xff]  ;;  %v3093_v17 = vld [vmem:[%s2540_s8 + $0x28] sm:$0x3f] }
  0xb4   : > { %v3021_v45 = vpop.permute.xlu1 %491  ;;  %v240_v19 = vsel %vm219_vm1, %v237_v44, %v239_v0  ;;  %v1146_v34 = vmul.f32 %v3062_v31, %v1143_v57  ;;  %v1144_v28 = vmul.f32 %v3066_v35, %v1143_v57  ;;  %v1163_v44 = vstv %s3009_s4  ;;  %s3343_s4 = sld [smem:[#allocation2 + $0x5f]] }
  0xb5   : > { %v3023_v39 = vpop.permute.xlu0 %489  ;;  %v243_v12 = vadd.f32 %v2896_v13, %v227_v1  ;;  %v3778_v14 = vrot.slane %v2834_v29, 3  ;;  %v274_v36 = vrot.slane %v267_v63, 3  ;;  %v285_v58 = vmul.f32 %v3062_v31, %v2846_v33  ;;  %v3089_v33 = vld [vmem:[%s2540_s8 + $0x20] sm:$0xff] }
  0xb6   : > { %1073 = vrot.lane.b32.xlu1 %v1070_v10, %s2447_s24  ;;  %v3048_v10 = vstv %s3000_s3  ;;  %v244_v40 = vadd.f32 %v240_v19, %v228_v60  ;;  %v1132_v13 = vsel %vm289_vm3, %v1129_v11, %v1131_v7  ;;  %v1130_v3 = vsel %vm289_vm3, %v1128_v61, %v1129_v11  ;;  %s3327_s3 = sld [smem:[#allocation2 + $0x2e]] }
  0xb7   : > { %1071 = vrot.lane.b32.xlu0 %v1068_v16, %s2447_s24  ;;  %v1145_v16 = vmul.f32 %v3057_v20, %v1143_v57  ;;  %v257_v26 = vsel %vm254_vm2, %v255_v15, %v3778_v14  ;;  %v3779_v42 = vmov %v3778_v14  ;;  %v306_v0 = vrot.slane %v2901_v21, 4 }
  0xb8   : > { %v3041_v62 = vpop.permute.xlu1 %513  ;;  %v259_v43 = vsel %vm254_vm2, %v3779_v42, %v258_v30  ;;  %v1165_v8 = vmul.f32 %v3089_v33, %v1163_v44  ;;  %v1166_v29 = vmul.f32 %v3093_v17, %v1163_v44  ;;  %v1153_v57 = vrot.slane %v1146_v34, 5 }
  0xb9   : > { %v3043_v18 = vpop.permute.xlu0 %511  ;;  %v1151_v51 = vrot.slane %v1145_v16, 5  ;;  %v1150_v1 = vrot.slane %v1144_v28, 5  ;;  %v1185_v15 = vstv %s3036_s5  ;;  %v307_v30 = vrot.slane %v2918_v27, 4  ;;  %s3386_s5 = sld [smem:[#allocation2 + $0x5]] }
  0xba   : > { %1093 = vrot.lane.b32.xlu1 %v1090_v47, %s2447_s24  ;;  %v3097_v47 = vld [vmem:[%s2540_s8 + $0x18] sm:$0xff]  ;;  %v262_v63 = vadd.f32 %v257_v26, %v243_v12  ;;  %v290_v60 = vrot.slane %v3017_v48, 4  ;;  %v3780_v11 = vrot.slane %v2843_v32, 3  ;;  %v293_v16 = vrot.slane %v285_v58, 4 }
  0xbb   : > { %1091 = vrot.lane.b32.xlu0 %v1088_v2, %s2447_s24  ;;  %v1164_v2 = vmul.f32 %v3097_v47, %v1163_v44  ;;  %v1205_v34 = vstv %s3045_s7  ;;  %v1171_v27 = vrot.slane %v1165_v8, 5  ;;  %v1173_v48 = vrot.slane %v1166_v29, 5  ;;  %s2250_s7 = sld [smem:[#allocation2 + $0xc]] }
  0xbc   : > { %v3076_v6 = vpop.permute.xlu1 %533  ;;  %v275_v7 = vsel %vm254_vm2, %v3780_v11, %v274_v36  ;;  %v1187_v32 = vmul.f32 %v3057_v20, %v1185_v15  ;;  %v1154_v44 = vsel %vm324_vm4, %v1151_v51, %v1153_v57  ;;  %v1152_v12 = vsel %vm324_vm4, %v1150_v1, %v1151_v51 }
  0xbd   : > { %v3078_v41 = vpop.permute.xlu0 %531  ;;  %v1170_v28 = vrot.slane %v1164_v2, 5  ;;  %v1188_v14 = vmul.f32 %v3062_v31, %v1185_v15  ;;  %v1186_v26 = vmul.f32 %v3066_v35, %v1185_v15  ;;  %v3781_v36 = vrot.slane %v2869_v49, 4 }
  0xbe   : > { %1115 = vrot.lane.b32.xlu1 %v1112_v9, %s2447_s24  ;;  %v263_v9 = vadd.f32 %v259_v43, %v244_v40  ;;  %v318_v40 = vmul.f32 %v3066_v35, %v2878_v53  ;;  %v320_v42 = vmul.f32 %v3062_v31, %v2878_v53  ;;  %v1174_v57 = vsel %vm324_vm4, %v1171_v27, %v1173_v48 }
  0xbf   : > { %1113 = vrot.lane.b32.xlu0 %v1110_v56, %s2447_s24  ;;  %v302_v56 = vmul.f32 %v3093_v17, %v2875_v52  ;;  %v3124_v52 = vmul.f32 %v3097_v47, %v2956_v22  ;;  %v292_v58 = vsel %vm289_vm3, %v290_v60, %v3781_v36  ;;  %v3782_v29 = vmov %v3781_v36 }
  0xc0   : > { %v3108_v61 = vpop.permute.xlu1 %555  ;;  %v279_v8 = vadd.f32 %v275_v7, %v263_v9  ;;  %v294_v2 = vsel %vm289_vm3, %v3782_v29, %v293_v16  ;;  %v1172_v53 = vsel %vm324_vm4, %v1170_v28, %v1171_v27  ;;  %v1193_v1 = vrot.slane %v1187_v32, 6 }
  0xc1   : > { %v3110_v19 = vpop.permute.xlu0 %553  ;;  %v309_v51 = vrot.slane %v302_v56, 4  ;;  %v1207_v15 = vmul.f32 %v3089_v33, %v1205_v34  ;;  %v1208_v49 = vmul.f32 %v3093_v17, %v1205_v34  ;;  %v1206_v60 = vmul.f32 %v3097_v47, %v1205_v34 }
  0xc2   : > { %1135 = vrot.lane.b32.xlu1 %v1132_v13, %s2447_s24  ;;  %v326_v11 = vrot.slane %v2934_v55, 5  ;;  %v336_v7 = vmul.f32 %v3089_v33, %v2956_v22  ;;  %v3157_v9 = vmul.f32 %v3057_v20, %v3048_v10  ;;  %v369_v16 = vstv %s3102_s14  ;;  %s3401_s14 = sld [smem:[#allocation2 + $0x36]] }
  0xc3   : > { %1133 = vrot.lane.b32.xlu0 %v1130_v3, %s2447_s24  ;;  %v278_v3 = vadd.f32 %v2914_v25, %v262_v63  ;;  %v1195_v25 = vrot.slane %v1188_v14, 6  ;;  %v1192_v63 = vrot.slane %v1186_v26, 6  ;;  %v308_v34 = vsel %vm289_vm3, %v306_v0, %v307_v30 }
  0xc4   : > { %v3133_v43 = vpop.permute.xlu1 %575  ;;  %v298_v28 = vadd.f32 %v294_v2, %v279_v8  ;;  %v337_v55 = vmul.f32 %v3093_v17, %v2956_v22  ;;  %v325_v32 = vrot.slane %v318_v40, 5  ;;  %v1213_v14 = vrot.slane %v1207_v15, 6 }
  0xc5   : > { %v3135_v13 = vpop.permute.xlu0 %573  ;;  %v297_v48 = vadd.f32 %v292_v58, %v278_v3  ;;  %v1196_v21 = vsel %vm359_vm5, %v1193_v1, %v1195_v25  ;;  %v1194_v0 = vsel %vm359_vm5, %v1192_v63, %v1193_v1  ;;  %v1215_v26 = vrot.slane %v1208_v49, 6 }
  0xc6   : > { %1157 = vrot.lane.b32.xlu1 %v1154_v44, %s2447_s24  ;;  %v310_v44 = vsel %vm289_vm3, %v307_v30, %v309_v51  ;;  %v1212_v36 = vrot.slane %v1206_v60, 6  ;;  %v341_v22 = vrot.slane %v3124_v52, 5  ;;  %v342_v58 = vrot.slane %v336_v7, 5 }
  0xc7   : > { %1155 = vrot.lane.b32.xlu0 %v1152_v12, %s2447_s24  ;;  %v328_v12 = vrot.slane %v320_v42, 5  ;;  %v353_v30 = vmul.f32 %v3066_v35, %v3048_v10  ;;  %v313_v3 = vadd.f32 %v308_v34, %v297_v48  ;;  %v314_v8 = vadd.f32 %v310_v44, %v298_v28 }
  0xc8   : > { %v3160_v56 = vpop.permute.xlu1 %597  ;;  %v344_v29 = vrot.slane %v337_v55, 5  ;;  %v355_v2 = vmul.f32 %v3062_v31, %v3048_v10  ;;  %v361_v51 = vrot.slane %v3157_v9, 6  ;;  %v370_v52 = vmul.f32 %v3097_v47, %v369_v16 }
  0xc9   : > { %v3162_v27 = vpop.permute.xlu0 %595  ;;  %v1216_v1 = vsel %vm359_vm5, %v1213_v14, %v1215_v26  ;;  %v1214_v15 = vsel %vm359_vm5, %v1212_v36, %v1213_v14  ;;  %v1227_v25 = vstv %s3146_s16  ;;  %v1255_v10 = vstv %s3150_s17  ;;  %s2251_s16 = sld [smem:[#allocation2 + $0x3d]] }
  0xca   : > { %1177 = vrot.lane.b32.xlu1 %v1174_v57, %s2447_s24  ;;  %v327_v57 = vsel %vm324_vm4, %v325_v32, %v326_v11  ;;  %v343_v63 = vsel %vm324_vm4, %v341_v22, %v342_v58  ;;  %v371_v49 = vmul.f32 %v3089_v33, %v369_v16  ;;  %v360_v60 = vrot.slane %v353_v30, 6  ;;  %s3416_s17 = sld [smem:[#allocation2 + $0x13]] }
  0xcb   : > { %1175 = vrot.lane.b32.xlu0 %v1172_v53, %s2447_s24  ;;  %v329_v53 = vsel %vm324_vm4, %v326_v11, %v328_v12  ;;  %v372_v11 = vmul.f32 %v3093_v17, %v369_v16  ;;  %v332_v34 = vadd.f32 %v327_v57, %v313_v3  ;;  %v345_v28 = vsel %vm324_vm4, %v342_v58, %v344_v29 }
  0xcc   : > { %v3181_v40 = vpop.permute.xlu1 %617  ;;  %v333_v48 = vadd.f32 %v329_v53, %v314_v8  ;;  %v363_v55 = vrot.slane %v355_v2, 6  ;;  %v1229_v32 = vmul.f32 %v3057_v20, %v1227_v25  ;;  %v1228_v44 = vmul.f32 %v3066_v35, %v1227_v25 }
  0xcd   : > { %v3183_v42 = vpop.permute.xlu0 %615  ;;  %v1240_v12 = vstv %s3172_s21  ;;  %v1257_v16 = vmul.f32 %v3057_v20, %v1255_v10  ;;  %v1258_v14 = vmul.f32 %v3062_v31, %v1255_v10  ;;  %v376_v26 = vrot.slane %v370_v52, 6  ;;  %s3440_s21 = sld [smem:[#allocation2 + $0x44]] }
  0xce   : > { %1199 = vrot.lane.b32.xlu1 %v1196_v21, %s2447_s24  ;;  %v1256_v21 = vmul.f32 %v3066_v35, %v1255_v10  ;;  %v377_v36 = vrot.slane %v371_v49, 6  ;;  %v362_v22 = vsel %vm359_vm5, %v360_v60, %v361_v51  ;;  %v379_v58 = vrot.slane %v372_v11, 6 }
  0xcf   : > { %1197 = vrot.lane.b32.xlu0 %v1194_v0, %s2447_s24  ;;  %v1275_v0 = vstv %s3176_s22  ;;  %v348_v8 = vadd.f32 %v343_v63, %v332_v34  ;;  %v349_v29 = vadd.f32 %v345_v28, %v333_v48  ;;  %v364_v2 = vsel %vm359_vm5, %v361_v51, %v363_v55  ;;  %s3451_s22 = sld [smem:[#allocation2 + $0x1a]] }
  0xd0   : > { %v3202_v7 = vpop.permute.xlu1 %639  ;;  %v1242_v57 = vmul.f32 %v3089_v33, %v1240_v12  ;;  %v1241_v52 = vmul.f32 %v3097_v47, %v1240_v12  ;;  %v1263_v53 = vrot.slane %v1257_v16, 1  ;;  %v1265_v25 = vrot.slane %v1258_v14, 1 }
  0xd1   : > { %v3204_v9 = vpop.permute.xlu0 %637  ;;  %v1262_v10 = vrot.slane %v1256_v21, 1  ;;  %v1278_v63 = vmul.f32 %v3093_v17, %v1275_v0  ;;  %v1276_v51 = vmul.f32 %v3097_v47, %v1275_v0  ;;  %v378_v49 = vsel %vm359_vm5, %v376_v26, %v377_v36 }
  0xd2   : > { %1219 = vrot.lane.b32.xlu1 %v1216_v1, %s2447_s24  ;;  %v1277_v1 = vmul.f32 %v3089_v33, %v1275_v0  ;;  %v367_v34 = vadd.f32 %v362_v22, %v348_v8  ;;  %v368_v48 = vadd.f32 %v364_v2, %v349_v29  ;;  %v380_v28 = vsel %vm359_vm5, %v377_v36, %v379_v58 }
  0xd3   : > { %1217 = vrot.lane.b32.xlu0 %v1214_v15, %s2447_s24  ;;  %s2448_s24 = smov 124   ;;  %v1297_v15 = vstv %s3193_s23  ;;  %v1317_v16 = vstv %s3213_s6  ;;  %v1266_v14 = vsel %vm184_vm0, %v1263_v53, %v1265_v25  ;;  %v1264_v21 = vsel %vm184_vm0, %v1262_v10, %v1263_v53  ;;  %s2449_s23 = smov 123  }
  0xd4   : > { %v3219_v30 = vpop.permute.xlu1 %659  ;;  %v1299_v55 = vmul.f32 %v3057_v20, %v1297_v15  ;;  %v1298_v12 = vmul.f32 %v3066_v35, %v1297_v15  ;;  %v1285_v0 = vrot.slane %v1278_v63, 1  ;;  %v1282_v26 = vrot.slane %v1276_v51, 1  ;;  %s3469_s6 = sld [smem:[#allocation2 + $0x4b]] }
  0xd5   : > { %v3221_v3 = vpop.permute.xlu0 %657  ;;  %v383_v58 = vadd.f32 %v378_v49, %v367_v34  ;;  %v384_v8 = vadd.f32 %v380_v28, %v368_v48  ;;  %v1320_v53 = vmul.f32 %v3093_v17, %v1317_v16  ;;  %v1318_v25 = vmul.f32 %v3097_v47, %v1317_v16 }
  0xd6   : > { %1234 = vrot.lane.b32.xlu1 %v1229_v32, %s2448_s24  ;;  %v1283_v32 = vrot.slane %v1277_v1, 1  ;;  %v1305_v29 = vrot.slane %v1299_v55, 2  ;;  %v1339_v51 = vstv %s3237_s25  ;;  %v1359_v48 = vstv %s3241_s27  ;;  %s3501_s25 = sld [smem:[#allocation2 + $0x52]] }
  0xd7   : > { %1232 = vrot.lane.b32.xlu0 %v1228_v44, %s2448_s24  ;;  %v1300_v44 = vmul.f32 %v3062_v31, %v1297_v15  ;;  %v398_v49 = vadd.f32 %v2871_v50, %v383_v58  ;;  %v399_v34 = vadd.f32 %v2907_v24, %v384_v8  ;;  %v1340_v50 = vmul.f32 %v3066_v35, %v1339_v51  ;;  %s3513_s27 = sld [smem:[#allocation2 + $0x28]] }
  0xd8   : > { %v3233_v60 = vpop.permute.xlu1 %674  ;;  %v1286_v1 = vsel %vm184_vm0, %v1283_v32, %v1285_v0  ;;  %v1284_v15 = vsel %vm184_vm0, %v1282_v26, %v1283_v32  ;;  %v1361_v58 = vmul.f32 %v3089_v33, %v1359_v48 }
  0xd9   : > { %v3235_v11 = vpop.permute.xlu0 %672  ;;  %v1307_v2 = vrot.slane %v1300_v44, 2  ;;  %v1327_v44 = vrot.slane %v1320_v53, 2  ;;  %v411_v0 = vadd.f32 %v2864_v46, %v398_v49  ;;  %v412_v26 = vadd.f32 %v2905_v23, %v399_v34 }
  0xda   : > { %1247 = vrot.lane.b32.xlu1 %v1242_v57, %s2448_s24  ;;  %v1304_v57 = vrot.slane %v1298_v12, 2  ;;  %v1324_v12 = vrot.slane %v1318_v25, 2  ;;  %v1346_v23 = vrot.slane %v1340_v50, 3  ;;  %v1367_v49 = vrot.slane %v1361_v58, 3 }
  0xdb   : > { %1245 = vrot.lane.b32.xlu0 %v1241_v52, %s2448_s24  ;;  %v1319_v52 = vmul.f32 %v3089_v33, %v1317_v16  ;;  %v1308_v28 = vsel %vm219_vm1, %v1305_v29, %v1307_v2  ;;  %v1341_v16 = vmul.f32 %v3057_v20, %v1339_v51  ;;  %v1360_v2 = vmul.f32 %v3097_v47, %v1359_v48 }
  0xdc   : > { %v3250_v36 = vpop.permute.xlu1 %687  ;;  %v1306_v55 = vsel %vm219_vm1, %v1304_v57, %v1305_v29  ;;  %v1362_v29 = vmul.f32 %v3093_v17, %v1359_v48  ;;  %v1381_v57 = vstv %s3258_s28  ;;  %v434_v25 = vadd.f32 %v2942_v59, %v412_v26  ;;  %s3533_s28 = sld [smem:[#allocation2 + $0x59]] }
  0xdd   : > { %v3252_v22 = vpop.permute.xlu0 %685  ;;  %v1325_v32 = vrot.slane %v1319_v52, 2  ;;  %v1347_v46 = vrot.slane %v1341_v16, 3  ;;  %v1366_v48 = vrot.slane %v1360_v2, 3  ;;  %v1423_v26 = vstv %s3287_s26  ;;  %s3556_s26 = sld [smem:[#allocation2 + $0x60]] }
  0xde   : > { %1269 = vrot.lane.b32.xlu1 %v1266_v14, %s2448_s24  ;;  %v1342_v14 = vmul.f32 %v3062_v31, %v1339_v51  ;;  %v433_v51 = vadd.f32 %v2944_v54, %v411_v0  ;;  %v1369_v34 = vrot.slane %v1362_v29, 3 }
  0xdf   : > { %1267 = vrot.lane.b32.xlu0 %v1264_v21, %s2448_s24  ;;  %v1328_v8 = vsel %vm219_vm1, %v1325_v32, %v1327_v44  ;;  %v1326_v52 = vsel %vm219_vm1, %v1324_v12, %v1325_v32  ;;  %v454_v32 = vadd.f32 %v2968_v37, %v434_v25  ;;  %v1348_v54 = vsel %vm254_vm2, %v1346_v23, %v1347_v46 }
  0xe0   : > { %v3263_v10 = vpop.permute.xlu1 %709  ;;  %v1349_v53 = vrot.slane %v1342_v14, 3  ;;  %v1382_v44 = vmul.f32 %v3066_v35, %v1381_v57  ;;  %v1401_v14 = vstv %s3282_s30  ;;  %v453_v50 = vadd.f32 %v2970_v38, %v433_v51  ;;  %s3546_s30 = sld [smem:[#allocation2 + $0x2f]] }
  0xe1   : > { %v3265_v63 = vpop.permute.xlu0 %707  ;;  %v476_v0 = vadd.f32 %v2992_v4, %v454_v32  ;;  %v1370_v37 = vsel %vm254_vm2, %v1367_v49, %v1369_v34  ;;  %v1368_v58 = vsel %vm254_vm2, %v1366_v48, %v1367_v49  ;;  %v1402_v38 = vmul.f32 %v3097_v47, %v1401_v14 }
  0xe2   : > { %1289 = vrot.lane.b32.xlu1 %v1286_v1, %s2448_s24  ;;  %v1350_v59 = vsel %vm254_vm2, %v1347_v46, %v1349_v53  ;;  %v1388_v2 = vrot.slane %v1382_v44, 4  ;;  %v475_v4 = vadd.f32 %v2994_v5, %v453_v50  ;;  %v1425_v23 = vmul.f32 %v3057_v20, %v1423_v26 }
  0xe3   : > { %1287 = vrot.lane.b32.xlu0 %v1284_v15, %s2448_s24  ;;  %v1426_v25 = vmul.f32 %v3062_v31, %v1423_v26  ;;  %v496_v51 = vadd.f32 %v3021_v45, %v476_v0  ;;  %v1424_v5 = vmul.f32 %v3066_v35, %v1423_v26  ;;  %v1443_v48 = vstv %s3306_s29  ;;  %s3583_s29 = sld [smem:[#allocation2 + $0x6]] }
  0xe4   : > { %v3278_v24 = vpop.permute.xlu1 %729  ;;  %v495_v49 = vadd.f32 %v3023_v39, %v475_v4  ;;  %v1445_v0 = vmul.f32 %v3089_v33, %v1443_v48  ;;  %v1446_v26 = vmul.f32 %v3093_v17, %v1443_v48 }
  0xe5   : > { %v3280_v21 = vpop.permute.xlu0 %727  ;;  %v518_v45 = vadd.f32 %v3041_v62, %v496_v51  ;;  %v1433_v50 = vrot.slane %v1426_v25, 5  ;;  %v1430_v62 = vrot.slane %v1424_v5, 5 }
  0xe6   : > { %1311 = vrot.lane.b32.xlu1 %v1308_v28, %s2448_s24  ;;  %v1383_v28 = vmul.f32 %v3057_v20, %v1381_v57  ;;  %v517_v39 = vadd.f32 %v3043_v18, %v495_v49  ;;  %v1451_v4 = vrot.slane %v1445_v0, 5 }
  0xe7   : > { %1309 = vrot.lane.b32.xlu0 %v1306_v55, %s2448_s24  ;;  %v1384_v55 = vmul.f32 %v3062_v31, %v1381_v57  ;;  %v1403_v57 = vmul.f32 %v3089_v33, %v1401_v14 }
  0xe8   : > { %v3296_v1 = vpop.permute.xlu1 %751 }
  0xe9   : > { %v3298_v15 = vpop.permute.xlu0 %749  ;;  %v1391_v29 = vrot.slane %v1384_v55, 4  ;;  %v1409_v55 = vrot.slane %v1403_v57, 4 }
  0xea   : > { %1331 = vrot.lane.b32.xlu1 %v1328_v8, %s2448_s24  ;;  %v1389_v8 = vrot.slane %v1383_v28, 4 }
  0xeb   : > { %1329 = vrot.lane.b32.xlu0 %v1326_v52, %s2448_s24  ;;  %v1404_v52 = vmul.f32 %v3093_v17, %v1401_v14  ;;  %v1431_v14 = vrot.slane %v1425_v23, 5  ;;  %v1453_v23 = vrot.slane %v1446_v26, 5 }
  0xec   : > { %v3312_v12 = vpop.permute.xlu1 %771  ;;  %v1392_v34 = vsel %vm289_vm3, %v1389_v8, %v1391_v29  ;;  %v1390_v28 = vsel %vm289_vm3, %v1388_v2, %v1389_v8  ;;  %v1444_v29 = vmul.f32 %v3097_v47, %v1443_v48  ;;  %v1465_v2 = vstv %s3327_s3  ;;  %s2264_s3 = sld [smem:[#allocation2 + $0xd]] }
  0xed   : > { %v3314_v16 = vpop.permute.xlu0 %769  ;;  %v1411_v32 = vrot.slane %v1404_v52, 4  ;;  %v1432_v25 = vsel %vm324_vm4, %v1430_v62, %v1431_v14  ;;  %v1467_v51 = vmul.f32 %v3057_v20, %v1465_v2  ;;  %v1468_v49 = vmul.f32 %v3062_v31, %v1465_v2 }
  0xee   : > { %1353 = vrot.lane.b32.xlu1 %v1350_v59, %s2448_s24  ;;  %v1408_v59 = vrot.slane %v1402_v38, 4 }
  0xef   : > { %1351 = vrot.lane.b32.xlu0 %v1348_v54, %s2448_s24  ;;  %v1412_v18 = vsel %vm289_vm3, %v1409_v55, %v1411_v32 }
  0xf0   : > { %v3330_v46 = vpop.permute.xlu1 %793  ;;  %v1410_v8 = vsel %vm289_vm3, %v1408_v59, %v1409_v55 }
  0xf1   : > { %v3332_v53 = vpop.permute.xlu0 %791 }
  0xf2   : > { %1373 = vrot.lane.b32.xlu1 %v1370_v37, %s2448_s24  ;;  %v538_v37 = vadd.f32 %v3076_v6, %v518_v45  ;;  %v1434_v6 = vsel %vm324_vm4, %v1431_v14, %v1433_v50  ;;  %v1454_v45 = vsel %vm324_vm4, %v1451_v4, %v1453_v23  ;;  %v1507_v23 = vstv %s3386_s5  ;;  %s2265_s5 = sld [smem:[#allocation2 + $0x3e]] }
  0xf3   : > { %1371 = vrot.lane.b32.xlu0 %v1368_v58, %s2448_s24  ;;  %v537_v58 = vadd.f32 %v3078_v41, %v517_v39 }
  0xf4   : > { %v3348_v54 = vpop.permute.xlu1 %813  ;;  %v560_v41 = vadd.f32 %v3108_v61, %v538_v37  ;;  %v1450_v61 = vrot.slane %v1444_v29, 5 }
  0xf5   : > { %v3350_v44 = vpop.permute.xlu0 %811  ;;  %v559_v38 = vadd.f32 %v3110_v19, %v537_v58  ;;  %v1466_v19 = vmul.f32 %v3066_v35, %v1465_v2 }
  0xf6   : > { %1395 = vrot.lane.b32.xlu1 %v1392_v34, %s2448_s24  ;;  %v1485_v34 = vstv %s3343_s4  ;;  %v580_v5 = vadd.f32 %v3133_v43, %v560_v41  ;;  %v1473_v43 = vrot.slane %v1467_v51, 6  ;;  %v1452_v0 = vsel %vm324_vm4, %v1450_v61, %v1451_v4  ;;  %s3601_s4 = sld [smem:[#allocation2 + $0x37]] }
  0xf7   : > { %1393 = vrot.lane.b32.xlu0 %v1390_v28, %s2448_s24  ;;  %v579_v48 = vadd.f32 %v3135_v13, %v559_v38  ;;  %v1487_v39 = vmul.f32 %v3089_v33, %v1485_v34  ;;  %v1475_v13 = vrot.slane %v1468_v49, 6  ;;  %v1488_v14 = vmul.f32 %v3093_v17, %v1485_v34 }
  0xf8   : > { %v3362_v57 = vpop.permute.xlu1 %835  ;;  %v602_v32 = vadd.f32 %v3160_v56, %v580_v5  ;;  %v1486_v50 = vmul.f32 %v3097_v47, %v1485_v34  ;;  %v1472_v26 = vrot.slane %v1466_v19, 6  ;;  %v1520_v61 = vstv %s3401_s14  ;;  %s2450_s14 = smov 122  }
  0xf9   : > { %v3364_v52 = vpop.permute.xlu0 %833  ;;  %v601_v59 = vadd.f32 %v3162_v27, %v579_v48 }
  0xfa   : > { %1415 = vrot.lane.b32.xlu1 %v1412_v18, %s2448_s24  ;;  %v622_v56 = vadd.f32 %v3181_v40, %v602_v32  ;;  %v1476_v40 = vsel %vm359_vm5, %v1473_v43, %v1475_v13  ;;  %v1521_v13 = vmul.f32 %v3097_v47, %v1520_v61 }
  0xfb   : > { %1413 = vrot.lane.b32.xlu0 %v1410_v8, %s2448_s24  ;;  %v621_v27 = vadd.f32 %v3183_v42, %v601_v59  ;;  %v1493_v42 = vrot.slane %v1487_v39, 6  ;;  %v1495_v8 = vrot.slane %v1488_v14, 6 }
  0xfc   : > { %v3378_v28 = vpop.permute.xlu1 %855  ;;  %v644_v62 = vadd.f32 %v3202_v7, %v622_v56  ;;  %v1492_v7 = vrot.slane %v1486_v50, 6 }
  0xfd   : > { %v3380_v55 = vpop.permute.xlu0 %853  ;;  %v643_v18 = vadd.f32 %v3204_v9, %v621_v27  ;;  %v1496_v51 = vsel %vm359_vm5, %v1493_v42, %v1495_v8  ;;  %v1577_v27 = vstv %s3416_s17  ;;  %s3634_s17 = sld [smem:[#allocation2 + $0x4c]] }
  0xfe   : > { %1437 = vrot.lane.b32.xlu1 %v1434_v6, %s2448_s24  ;;  %v664_v29 = vadd.f32 %v3219_v30, %v644_v62  ;;  %v1474_v6 = vsel %vm359_vm5, %v1472_v26, %v1473_v43  ;;  %v1535_v30 = vstv %s2250_s7  ;;  %v1494_v49 = vsel %vm359_vm5, %v1492_v7, %v1493_v42  ;;  %s2267_s7 = sld [smem:[#allocation2 + $0x45]] }
  0xff   : > { %1435 = vrot.lane.b32.xlu0 %v1432_v25, %s2448_s24  ;;  %v663_v2 = vadd.f32 %v3221_v3, %v643_v18  ;;  %v1537_v19 = vmul.f32 %v3057_v20, %v1535_v30  ;;  %v1536_v32 = vmul.f32 %v3066_v35, %v1535_v30  ;;  %v1522_v43 = vmul.f32 %v3089_v33, %v1520_v61 }
 0x100   : > { %v3395_v37 = vpop.permute.xlu1 %877  ;;  %v679_v38 = vadd.f32 %v3233_v60, %v664_v29  ;;  %v1579_v42 = vmul.f32 %v3057_v20, %v1577_v27 }
 0x101   : > { %v3397_v58 = vpop.permute.xlu0 %875  ;;  %v678_v4 = vadd.f32 %v3235_v11, %v663_v2  ;;  %v1509_v11 = vmul.f32 %v3057_v20, %v1507_v23  ;;  %v1543_v56 = vrot.slane %v1537_v19, 1  ;;  %v1580_v2 = vmul.f32 %v3062_v31, %v1577_v27 }
 0x102   : > { %1457 = vrot.lane.b32.xlu1 %v1454_v45, %s2448_s24  ;;  %v692_v3 = vadd.f32 %v3250_v36, %v679_v38  ;;  %v1508_v36 = vmul.f32 %v3066_v35, %v1507_v23  ;;  %v1555_v45 = vstv %s2251_s16  ;;  %v1597_v23 = vstv %s3440_s21  ;;  %s2268_s16 = sld [smem:[#allocation2 + $0x1b]] }
 0x103   : > { %1455 = vrot.lane.b32.xlu0 %v1452_v0, %s2448_s24  ;;  %v691_v25 = vadd.f32 %v3252_v22, %v678_v4  ;;  %v1538_v22 = vmul.f32 %v3062_v31, %v1535_v30  ;;  %v1557_v0 = vmul.f32 %v3089_v33, %v1555_v45  ;;  %v1558_v26 = vmul.f32 %v3093_v17, %v1555_v45  ;;  %s3643_s21 = sld [smem:[#allocation2 + $0x22]] }
 0x104   : > { %v3409_v9 = vpop.permute.xlu1 %897  ;;  %v714_v5 = vadd.f32 %v3263_v10, %v692_v3  ;;  %v1600_v61 = vmul.f32 %v3093_v17, %v1597_v23 }
 0x105   : > { %v3411_v41 = vpop.permute.xlu0 %895  ;;  %v713_v48 = vadd.f32 %v3265_v63, %v691_v25  ;;  %v1563_v7 = vrot.slane %v1557_v0, 1  ;;  %v1565_v38 = vrot.slane %v1558_v26, 1  ;;  %v1585_v25 = vrot.slane %v1579_v42, 2 }
 0x106   : > { %1479 = vrot.lane.b32.xlu1 %v1476_v40, %s2448_s24  ;;  %v734_v59 = vadd.f32 %v3278_v24, %v714_v5  ;;  %v1545_v24 = vrot.slane %v1538_v22, 1  ;;  %v1619_v5 = vstv %s3451_s22  ;;  %s3653_s22 = sld [smem:[#allocation2 + $0x53]] }
 0x107   : > { %1477 = vrot.lane.b32.xlu0 %v1474_v6, %s2448_s24  ;;  %v733_v10 = vadd.f32 %v3280_v21, %v713_v48  ;;  %v1542_v21 = vrot.slane %v1536_v32, 1  ;;  %v1578_v6 = vmul.f32 %v3066_v35, %v1577_v27  ;;  %v1599_v48 = vmul.f32 %v3089_v33, %v1597_v23 }
 0x108   : > { %v3424_v60 = vpop.permute.xlu1 %919  ;;  %v756_v14 = vadd.f32 %v3296_v1, %v734_v59  ;;  %v1621_v59 = vmul.f32 %v3057_v20, %v1619_v5 }
 0x109   : > { %v3426_v34 = vpop.permute.xlu0 %917  ;;  %v755_v50 = vadd.f32 %v3298_v15, %v733_v10  ;;  %v1556_v15 = vmul.f32 %v3097_v47, %v1555_v45 }
 0x10a   : > { %1499 = vrot.lane.b32.xlu1 %v1496_v51, %s2448_s24  ;;  %v776_v62 = vadd.f32 %v3312_v12, %v756_v14  ;;  %v1546_v12 = vsel %vm184_vm0, %v1543_v56, %v1545_v24  ;;  %v1607_v14 = vrot.slane %v1600_v61, 2  ;;  %v1703_v61 = vstv %s3513_s27  ;;  %s148_s27 = sand.u32 1, %s2434_s10  }
 0x10b   : > { %1497 = vrot.lane.b32.xlu0 %v1494_v49, %s2448_s24  ;;  %v775_v1 = vadd.f32 %v3314_v16, %v755_v50  ;;  %v1544_v16 = vsel %vm184_vm0, %v1542_v21, %v1543_v56  ;;  %v1562_v4 = vrot.slane %v1556_v15, 1  ;;  %s3490_s24 = sld [smem:[#allocation2 + $0x21]]  ;;  %v1620_v50 = vmul.f32 %v3066_v35, %v1619_v5 }
 0x10c   : > { %v3442_v63 = vpop.permute.xlu1 %939  ;;  %v798_v8 = vadd.f32 %v3330_v46, %v776_v62 }
 0x10d   : > { %v3444_v39 = vpop.permute.xlu0 %937  ;;  %v797_v29 = vadd.f32 %v3332_v53, %v775_v1  ;;  %v1564_v19 = vsel %vm184_vm0, %v1562_v4, %v1563_v7  ;;  %v1627_v1 = vrot.slane %v1621_v59, 3 }
 0x10e   : > { %1514 = vrot.lane.b32.xlu1 %v1509_v11, %s2449_s23  ;;  %v818_v46 = vadd.f32 %v3348_v54, %v798_v8  ;;  %v1587_v11 = vrot.slane %v1580_v2, 2  ;;  %v1566_v54 = vsel %vm184_vm0, %v1563_v7, %v1565_v38 }
 0x10f   : > { %1512 = vrot.lane.b32.xlu0 %v1508_v36, %s2449_s23  ;;  %v817_v53 = vadd.f32 %v3350_v44, %v797_v29  ;;  %v1584_v44 = vrot.slane %v1578_v6, 2  ;;  %v1598_v36 = vmul.f32 %v3097_v47, %v1597_v23 }
 0x110   : > { %v3460_v18 = vpop.permute.xlu1 %954  ;;  %v840_v51 = vadd.f32 %v3362_v57, %v818_v46 }
 0x111   : > { %v3462_v40 = vpop.permute.xlu0 %952  ;;  %v839_v49 = vadd.f32 %v3364_v52, %v817_v53  ;;  %v1604_v27 = vrot.slane %v1598_v36, 2  ;;  %v1661_v8 = vstv %s3490_s24  ;;  %v1681_v53 = vstv %s3501_s25  ;;  %s3680_s24 = sld [smem:[#allocation2 + $0x30]] }
 0x112   : > { %1527 = vrot.lane.b32.xlu1 %v1522_v43, %s2449_s23  ;;  %v860_v57 = vadd.f32 %v3378_v28, %v840_v51  ;;  %v1622_v43 = vmul.f32 %v3062_v31, %v1619_v5  ;;  %v1588_v28 = vsel %vm219_vm1, %v1585_v25, %v1587_v11  ;;  %v1663_v4 = vmul.f32 %v3057_v20, %v1661_v8  ;;  %s2275_s25 = sld [smem:[#allocation2 + $0x61]] }
 0x113   : > { %1525 = vrot.lane.b32.xlu0 %v1521_v13, %s2449_s23  ;;  %v859_v52 = vadd.f32 %v3380_v55, %v839_v49  ;;  %v1639_v13 = vstv %s3469_s6  ;;  %v1605_v55 = vrot.slane %v1599_v48, 2  ;;  %v1664_v23 = vmul.f32 %v3062_v31, %v1661_v8  ;;  %s3668_s6 = sld [smem:[#allocation2 + $0x5a]] }
 0x114   : > { %v3478_v30 = vpop.permute.xlu1 %967  ;;  %v882_v10 = vadd.f32 %v3395_v37, %v860_v57  ;;  %v1641_v0 = vmul.f32 %v3089_v33, %v1639_v13  ;;  %v1629_v15 = vrot.slane %v1622_v43, 3  ;;  %v1642_v42 = vmul.f32 %v3093_v17, %v1639_v13 }
 0x115   : > { %v3480_v3 = vpop.permute.xlu0 %965  ;;  %v881_v45 = vadd.f32 %v3397_v58, %v859_v52  ;;  %v1586_v58 = vsel %vm219_vm1, %v1584_v44, %v1585_v25  ;;  %v1640_v2 = vmul.f32 %v3097_v47, %v1639_v13  ;;  %v1662_v51 = vmul.f32 %v3066_v35, %v1661_v8 }
 0x116   : > { %1549 = vrot.lane.b32.xlu1 %v1546_v12, %s2449_s23  ;;  %v902_v56 = vadd.f32 %v3409_v9, %v882_v10  ;;  %v1608_v9 = vsel %vm219_vm1, %v1605_v55, %v1607_v14  ;;  %v1630_v46 = vsel %vm254_vm2, %v1627_v1, %v1629_v15  ;;  %v1683_v5 = vmul.f32 %v3089_v33, %v1681_v53 }
 0x117   : > { %1547 = vrot.lane.b32.xlu0 %v1544_v16, %s2449_s23  ;;  %v901_v37 = vadd.f32 %v3411_v41, %v881_v45  ;;  %v1626_v41 = vrot.slane %v1620_v50, 3  ;;  %v1647_v16 = vrot.slane %v1641_v0, 3  ;;  %v1646_v25 = vrot.slane %v1640_v2, 3 }
 0x118   : > { %v990_v22 = vpop.permute.xlu1 %989  ;;  %v924_v26 = vadd.f32 %v3424_v60, %v902_v56  ;;  %v1684_v48 = vmul.f32 %v3093_v17, %v1681_v53  ;;  %v1669_v57 = vrot.slane %v1663_v4, 4  ;;  %v1682_v52 = vmul.f32 %v3097_v47, %v1681_v53  ;;  %v3579_v4 = vld [vmem:[%s2540_s8] sm:$0xff] }
 0x119   : > { %v988_v32 = vpop.permute.xlu0 %987  ;;  %v923_v62 = vadd.f32 %v3426_v34, %v901_v37  ;;  %v1606_v34 = vsel %vm219_vm1, %v1604_v27, %v1605_v55  ;;  %v1648_v59 = vsel %vm254_vm2, %v1646_v25, %v1647_v16  ;;  %v1705_v45 = vmul.f32 %v3057_v20, %v1703_v61 }
 0x11a   : > { %1569 = vrot.lane.b32.xlu1 %v1566_v54, %s2449_s23  ;;  %v944_v29 = vadd.f32 %v3442_v63, %v924_v26  ;;  %v1628_v63 = vsel %vm254_vm2, %v1626_v41, %v1627_v1  ;;  %v1691_v55 = vrot.slane %v1684_v48, 4  ;;  %v1688_v50 = vrot.slane %v1682_v52, 4  ;;  %v3598_v52 = vld [vmem:[%s2540_s8 + $0x18] sm:$0xff] }
 0x11b   : > { %1567 = vrot.lane.b32.xlu0 %v1564_v19, %s2449_s23  ;;  %v943_v60 = vadd.f32 %v3444_v39, %v923_v62  ;;  %v1649_v39 = vrot.slane %v1642_v42, 3  ;;  %v1706_v56 = vmul.f32 %v3062_v31, %v1703_v61  ;;  %v1723_v37 = vstv %s3533_s28  ;;  %s2174_s28 = sshll.u32 %s148_s27, 4 }
 0x11c   : > { %v1010_v24 = vpop.permute.xlu1 %1009  ;;  %v959_v7 = vadd.f32 %v3460_v18, %v944_v29  ;;  %v1704_v20 = vmul.f32 %v3066_v35, %v1703_v61  ;;  %v1711_v26 = vrot.slane %v1705_v45, 5  ;;  %v1726_v35 = vmul.f32 %v3093_v17, %v1723_v37  ;;  %v3590_v61 = vld [vmem:[%s2540_s8 + $0x20] sm:$0xff] }
 0x11d   : > { %v1008_v21 = vpop.permute.xlu0 %1007  ;;  %v958_v38 = vadd.f32 %v3462_v40, %v943_v60  ;;  %v1713_v41 = vrot.slane %v1706_v56, 5  ;;  %v1724_v42 = vmul.f32 %v3097_v47, %v1723_v37  ;;  %v1765_v25 = vstv %s3556_s26  ;;  %s150_s26 = scalar_lea.vmem [#allocation5], %s2174_s28 }
 0x11e   : > { %1591 = vrot.lane.b32.xlu1 %v1588_v28, %s2449_s23  ;;  %v972_v18 = vadd.f32 %v3478_v30, %v959_v7  ;;  %v1650_v30 = vsel %vm254_vm2, %v1647_v16, %v1649_v39  ;;  %v1689_v28 = vrot.slane %v1683_v5, 4  ;;  %v1710_v60 = vrot.slane %v1704_v20, 5 }
 0x11f   : > { %1589 = vrot.lane.b32.xlu0 %v1586_v58, %s2449_s23  ;;  %v971_v40 = vadd.f32 %v3480_v3, %v958_v38  ;;  %v1671_v3 = vrot.slane %v1664_v23, 4  ;;  %v1733_v7 = vrot.slane %v1726_v35, 5  ;;  %v1730_v17 = vrot.slane %v1724_v42, 5  ;;  %v3569_v38 = vld [vmem:[%s2540_s8 + $0x8] sm:$0xff] }
 0x120   : > { %v1032_v6 = vpop.permute.xlu1 %1031  ;;  %v994_v54 = vadd.f32 %v990_v22, %v972_v18  ;;  %v1668_v22 = vrot.slane %v1662_v51, 4  ;;  %v1692_v15 = vsel %vm289_vm3, %v1689_v28, %v1691_v55  ;;  %v1690_v31 = vsel %vm289_vm3, %v1688_v50, %v1689_v28 }
 0x121   : > { %v1030_v12 = vpop.permute.xlu0 %1029  ;;  %v993_v44 = vadd.f32 %v988_v32, %v971_v40  ;;  %v1672_v14 = vsel %vm289_vm3, %v1669_v57, %v1671_v3  ;;  %v1712_v39 = vsel %vm324_vm4, %v1710_v60, %v1711_v26  ;;  %v1835_v35 = vstv %s2265_s5 }
 0x122   : > { %1611 = vrot.lane.b32.xlu1 %v1608_v9, %s2449_s23  ;;  %v1014_v19 = vadd.f32 %v1010_v24, %v994_v54  ;;  %v1670_v24 = vsel %vm289_vm3, %v1668_v22, %v1669_v57  ;;  %v1725_v9 = vmul.f32 %v3089_v33, %v1723_v37  ;;  %v3594_v57 = vld [vmem:[%s2540_s8 + $0x28] sm:$0x3f]  ;;  %v1787_v37 = vstv %s3583_s29  ;;  %s2094_s29 = sshll.u32 %s150_s26, 4  ;;  %s3729_s29 = int_to_ptr.vmem [resolvable:$true] %s2094_s29 }
 0x123   : > { %1609 = vrot.lane.b32.xlu0 %v1606_v34, %s2449_s23  ;;  %v1013_v36 = vadd.f32 %v1008_v21, %v993_v44  ;;  %v1745_v34 = vstv %s3546_s30  ;;  %v1768_v3 = vmul.f32 %v3594_v57, %v1765_v25  ;;  %s2283_s30 = sshll.u32 %s2490_s13, 8  ;;  %s2378_s13 = scalar_lea.vmem %s3729_s29, 256 }
 0x124   : > { %v1052_v49 = vpop.permute.xlu1 %1051  ;;  %v1036_v43 = vadd.f32 %v1032_v6, %v1014_v19  ;;  %v1731_v16 = vrot.slane %v1725_v9, 5  ;;  %v1747_v47 = vmul.f32 %v3569_v38, %v1745_v34  ;;  %v1746_v23 = vmul.f32 %v3579_v4, %v1745_v34  ;;  %s3727_s5 = scalar_lea.hbm %s3773_s2, %s2283_s30  ;;  %p2379_p9 = scmp.ne.s32.totalorder %s3729_s29, %s2378_s13 }
 0x125   : > { %v1050_v11 = vpop.permute.xlu0 %1049  ;;  %v1035_v13 = vadd.f32 %v1030_v12, %v1013_v36  ;;  %v1766_v19 = vmul.f32 %v3598_v52, %v1765_v25 }
 0x126   : > { %1633 = vrot.lane.b32.xlu1 %v1630_v46, %s2449_s23  ;;  %v1056_v58 = vadd.f32 %v1052_v49, %v1036_v43  ;;  %v3573_v46 = vld [vmem:[%s2540_s8 + $0x10] sm:$0x3f]  ;;  %v1732_v5 = vsel %vm324_vm4, %v1730_v17, %v1731_v16  ;;  %v1753_v54 = vrot.slane %v1747_v47, 6  ;;  %v1752_v48 = vrot.slane %v1746_v23, 6  ;;  %s2266_s8 = sld [smem:[#allocation2 + $0x14]]  ;;  %p2380_p10 = pnand %p2379_p9, %p2507_p5 }
 0x127   : > { %1631 = vrot.lane.b32.xlu0 %v1628_v63, %s2449_s23  ;;  %v1055_v27 = vadd.f32 %v1050_v11, %v1035_v13  ;;  %v1748_v53 = vmul.f32 %v3573_v46, %v1745_v34  ;;  %v1714_v63 = vsel %vm324_vm4, %v1711_v26, %v1713_v41  ;;  %v1734_v11 = vsel %vm324_vm4, %v1731_v16, %v1733_v7 }
 0x128   : > { %v1074_v32 = vpop.permute.xlu1 %1073  ;;  %v1754_v45 = vsel %vm359_vm5, %v1752_v48, %v1753_v54  ;;  %v1775_v13 = vrot.slane %v1768_v3, 6  ;;  %v1772_v28 = vrot.slane %v1766_v19, 6  ;;  %v1836_v17 = vmul.f32 %v3598_v52, %v1835_v35  ;;  %p2381_p12 = pneg %p2380_p10 }
 0x129   : > { %v1072_v10 = vpop.permute.xlu0 %1071  ;;  %v1078_v62 = vadd.f32 %v1074_v32, %v1056_v58  ;;  %v1755_v44 = vrot.slane %v1748_v53, 6 }
 0x12a   : > { %1653 = vrot.lane.b32.xlu1 %v1650_v30, %s2449_s23  ;;  %v1077_v1 = vadd.f32 %v1072_v10, %v1055_v27  ;;  %v1767_v30 = vmul.f32 %v3590_v61, %v1765_v25 }
 0x12b   : > { %1651 = vrot.lane.b32.xlu0 %v1648_v59, %s2449_s23  ;;  %v1756_v10 = vsel %vm359_vm5, %v1753_v54, %v1755_v44 }
 0x12c   : > { %v1094_v21 = vpop.permute.xlu1 %1093  ;;  %v1773_v43 = vrot.slane %v1767_v30, 6 }
 0x12d   : > { %v1092_v0 = vpop.permute.xlu0 %1091  ;;  %v1098_v8 = vadd.f32 %v1094_v21, %v1078_v62 }
 0x12e   : > { %1675 = vrot.lane.b32.xlu1 %v1672_v14, %s2449_s23  ;;  %v1097_v29 = vadd.f32 %v1092_v0, %v1077_v1  ;;  %v1776_v58 = vsel %vm359_vm5, %v1773_v43, %v1775_v13  ;;  %v1774_v27 = vsel %vm359_vm5, %v1772_v28, %v1773_v43  ;;  %v1789_v0 = vmul.f32 %v3569_v38, %v1787_v37 }
 0x12f   : > { %1673 = vrot.lane.b32.xlu0 %v1670_v24, %s2449_s23  ;;  %v1815_v24 = vstv %s2264_s3  ;;  %v1788_v1 = vmul.f32 %v3579_v4, %v1787_v37 }
 0x130   : > { %v1116_v2 = vpop.permute.xlu1 %1115  ;;  %v1817_v9 = vmul.f32 %v3569_v38, %v1815_v24  ;;  %v1816_v41 = vmul.f32 %v3579_v4, %v1815_v24 }
 0x131   : > { %v1114_v33 = vpop.permute.xlu0 %1113  ;;  %v1120_v6 = vadd.f32 %v1116_v2, %v1098_v8  ;;  %v1837_v2 = vmul.f32 %v3590_v61, %v1835_v35 }
 0x132   : > { %v1119_v12 = vadd.f32 %v1114_v33, %v1097_v29  ;;  %1695 = vrot.lane.b32.xlu1 %v1692_v15, %s2449_s23  ;;  %v1800_v15 = vstv %s3601_s4  ;;  %v1838_v33 = vmul.f32 %v3594_v57, %v1835_v35  ;;  %v1822_v7 = vrot.slane %v1816_v41, 1 }
 0x133   : > { %1693 = vrot.lane.b32.xlu0 %v1690_v31, %s2449_s23  ;;  %v1818_v31 = vmul.f32 %v3573_v46, %v1815_v24  ;;  %v1802_v29 = vmul.f32 %v3590_v61, %v1800_v15 }
 0x134   : > { %v1136_v18 = vpop.permute.xlu1 %1135 }
 0x135   : > { %v1134_v40 = vpop.permute.xlu0 %1133  ;;  %v1140_v51 = vadd.f32 %v1136_v18, %v1120_v6  ;;  %v1801_v6 = vmul.f32 %v3598_v52, %v1800_v15  ;;  %v1825_v16 = vrot.slane %v1818_v31, 1  ;;  %v1843_v18 = vrot.slane %v1837_v2, 1 }
 0x136   : > { %v1139_v49 = vadd.f32 %v1134_v40, %v1119_v12  ;;  %1717 = vrot.lane.b32.xlu1 %v1714_v63, %s2449_s23  ;;  %v1823_v12 = vrot.slane %v1817_v9, 1  ;;  %v1857_v63 = vstv %s2266_s8  ;;  %v1845_v40 = vrot.slane %v1838_v33, 1  ;;  %s3731_s8 = scalar_lea.sflag [#allocation3], %s148_s27 }
 0x137   : > { %1715 = vrot.lane.b32.xlu0 %v1712_v39, %s2449_s23  ;;  %v1860_v54 = vmul.f32 %v3573_v46, %v1857_v63  ;;  %v1858_v44 = vmul.f32 %v3579_v4, %v1857_v63  ;;  %v1941_v33 = vstv %s3643_s21 }
 0x138   : > { %v1158_v36 = vpop.permute.xlu1 %1157  ;;  %v1826_v25 = vsel %vm184_vm0, %v1823_v12, %v1825_v16 }
 0x139   : > { %v1156_v59 = vpop.permute.xlu0 %1155  ;;  %v1162_v22 = vadd.f32 %v1158_v36, %v1140_v51  ;;  %v1824_v51 = vsel %vm184_vm0, %v1822_v7, %v1823_v12  ;;  %v1846_v36 = vsel %vm184_vm0, %v1843_v18, %v1845_v40  ;;  %v1867_v13 = vrot.slane %v1860_v54, 2 }
 0x13a   : > { %v1161_v32 = vadd.f32 %v1156_v59, %v1139_v49  ;;  %1737 = vrot.lane.b32.xlu1 %v1734_v11, %s2449_s23  ;;  %v1877_v49 = vstv %s2267_s7  ;;  %v1842_v11 = vrot.slane %v1836_v17, 1  ;;  %v1864_v28 = vrot.slane %v1858_v44, 2  ;;  %s2451_s7 = smov [#allocation5]  }
 0x13b   : > { %1735 = vrot.lane.b32.xlu0 %v1732_v5, %s2449_s23  ;;  %v1859_v5 = vmul.f32 %v3569_v38, %v1857_v63  ;;  %v1879_v59 = vmul.f32 %v3590_v61, %v1877_v49  ;;  %v1943_v63 = vmul.f32 %v3569_v38, %v1941_v33  ;;  %v1942_v40 = vmul.f32 %v3579_v4, %v1941_v33 }
 0x13c   : > { %v1178_v55 = vpop.permute.xlu1 %1177 }
 0x13d   : > { %v1176_v14 = vpop.permute.xlu0 %1175  ;;  %v1182_v50 = vadd.f32 %v1178_v55, %v1162_v22  ;;  %v1880_v22 = vmul.f32 %v3594_v57, %v1877_v49  ;;  %v1865_v43 = vrot.slane %v1859_v5, 2 }
 0x13e   : > { %v1181_v56 = vadd.f32 %v1176_v14, %v1161_v32  ;;  %1759 = vrot.lane.b32.xlu1 %v1756_v10, %s2449_s23  ;;  %v1878_v32 = vmul.f32 %v3598_v52, %v1877_v49  ;;  %v1899_v10 = vstv %s2268_s16 }
 0x13f   : > { %1757 = vrot.lane.b32.xlu0 %v1754_v45, %s2449_s23  ;;  %v1844_v45 = vsel %vm184_vm0, %v1842_v11, %v1843_v18  ;;  %v1901_v37 = vmul.f32 %v3569_v38, %v1899_v10  ;;  %v1887_v24 = vrot.slane %v1880_v22, 2 }
 0x140   : > { %v1200_v20 = vpop.permute.xlu1 %1199 }
 0x141   : > { %v1198_v21 = vpop.permute.xlu0 %1197  ;;  %v1204_v26 = vadd.f32 %v1200_v20, %v1182_v50  ;;  %v1884_v20 = vrot.slane %v1878_v32, 2  ;;  %v1907_v41 = vrot.slane %v1901_v37, 3 }
 0x142   : > { %v1203_v62 = vadd.f32 %v1198_v21, %v1181_v56  ;;  %1779 = vrot.lane.b32.xlu1 %v1776_v58, %s2449_s23  ;;  %v1902_v58 = vmul.f32 %v3573_v46, %v1899_v10  ;;  %v1868_v21 = vsel %vm219_vm1, %v1865_v43, %v1867_v13 }
 0x143   : > { %1777 = vrot.lane.b32.xlu0 %v1774_v27, %s2449_s23  ;;  %v1885_v27 = vrot.slane %v1879_v59, 2  ;;  %s2272_s23 = sld [smem:[#allocation2 + $0x29]] }
 0x144   : > { %v1220_v42 = vpop.permute.xlu1 %1219  ;;  %v1909_v35 = vrot.slane %v1902_v58, 3 }
 0x145   : > { %v1218_v8 = vpop.permute.xlu0 %1217  ;;  %v1224_v60 = vadd.f32 %v1220_v42, %v1204_v26  ;;  %v1900_v26 = vmul.f32 %v3579_v4, %v1899_v10  ;;  %v1888_v42 = vsel %vm219_vm1, %v1885_v27, %v1887_v24 }
 0x146   : > { %v1223_v34 = vadd.f32 %v1218_v8, %v1203_v62  ;;  %1794 = vrot.lane.b32.xlu1 %v1789_v0, %s2450_s14  ;;  %v1866_v0 = vsel %vm219_vm1, %v1864_v28, %v1865_v43  ;;  %v1919_v62 = vstv %s3634_s17  ;;  %v1910_v17 = vsel %vm254_vm2, %v1907_v41, %v1909_v35 }
 0x147   : > { %1792 = vrot.lane.b32.xlu0 %v1788_v1, %s2450_s14  ;;  %v1921_v8 = vmul.f32 %v3590_v61, %v1919_v62  ;;  %v1920_v2 = vmul.f32 %v3598_v52, %v1919_v62 }
 0x148   : > { %v1235_v47 = vpop.permute.xlu1 %1234 }
 0x149   : > { %v1233_v53 = vpop.permute.xlu0 %1232  ;;  %v1239_v39 = vadd.f32 %v1235_v47, %v1224_v60  ;;  %v1886_v60 = vsel %vm219_vm1, %v1884_v20, %v1885_v27  ;;  %v1927_v47 = vrot.slane %v1921_v8, 3  ;;  %v1926_v18 = vrot.slane %v1920_v2, 3 }
 0x14a   : > { %v1238_v23 = vadd.f32 %v1233_v53, %v1223_v34  ;;  %1807 = vrot.lane.b32.xlu1 %v1802_v29, %s2450_s14  ;;  %v1922_v29 = vmul.f32 %v3594_v57, %v1919_v62  ;;  %v1906_v34 = vrot.slane %v1900_v26, 3  ;;  %v1983_v54 = vstv %s2272_s23 }
 0x14b   : > { %1805 = vrot.lane.b32.xlu0 %v1801_v6, %s2450_s14  ;;  %v1985_v13 = vmul.f32 %v3569_v38, %v1983_v54  ;;  %v1986_v28 = vmul.f32 %v3573_v46, %v1983_v54  ;;  %v1984_v27 = vmul.f32 %v3579_v4, %v1983_v54 }
 0x14c   : > { %v1248_v48 = vpop.permute.xlu1 %1247  ;;  %v1929_v53 = vrot.slane %v1922_v29, 3 }
 0x14d   : > { %v1246_v30 = vpop.permute.xlu0 %1245  ;;  %v1252_v3 = vadd.f32 %v1248_v48, %v1239_v39  ;;  %v1944_v39 = vmul.f32 %v3573_v46, %v1941_v33  ;;  %v1949_v48 = vrot.slane %v1943_v63, 4  ;;  %v1991_v26 = vrot.slane %v1985_v13, 5 }
 0x14e   : > { %v1251_v19 = vadd.f32 %v1246_v30, %v1238_v23  ;;  %1829 = vrot.lane.b32.xlu1 %v1826_v25, %s2450_s14  ;;  %v1908_v23 = vsel %vm254_vm2, %v1906_v34, %v1907_v41  ;;  %v1961_v25 = vstv %s3653_s22  ;;  %v1930_v44 = vsel %vm254_vm2, %v1927_v47, %v1929_v53 }
 0x14f   : > { %1827 = vrot.lane.b32.xlu0 %v1824_v51, %s2450_s14  ;;  %v1951_v30 = vrot.slane %v1944_v39, 4  ;;  %v1964_v59 = vmul.f32 %v3594_v57, %v1961_v25  ;;  %v1962_v22 = vmul.f32 %v3598_v52, %v1961_v25  ;;  %v1993_v62 = vrot.slane %v1986_v28, 5 }
 0x150   : > { %v1270_v55 = vpop.permute.xlu1 %1269  ;;  %v1990_v35 = vrot.slane %v1984_v27, 5  ;;  %v2045_v53 = vstv %s2275_s25 }
 0x151   : > { %v1268_v14 = vpop.permute.xlu0 %1267  ;;  %v1274_v50 = vadd.f32 %v1270_v55, %v1252_v3  ;;  %v1963_v3 = vmul.f32 %v3590_v61, %v1961_v25  ;;  %v1952_v55 = vsel %vm289_vm3, %v1949_v48, %v1951_v30  ;;  %v1971_v37 = vrot.slane %v1964_v59, 4 }
 0x152   : > { %v1273_v56 = vadd.f32 %v1268_v14, %v1251_v19  ;;  %1849 = vrot.lane.b32.xlu1 %v1846_v36, %s2450_s14  ;;  %v1928_v19 = vsel %vm254_vm2, %v1926_v18, %v1927_v47  ;;  %v1948_v36 = vrot.slane %v1942_v40, 4  ;;  %v1968_v58 = vrot.slane %v1962_v22, 4 }
 0x153   : > { %1847 = vrot.lane.b32.xlu0 %v1844_v45, %s2450_s14  ;;  %v1969_v14 = vrot.slane %v1963_v3, 4  ;;  %v1994_v2 = vsel %vm324_vm4, %v1991_v26, %v1993_v62 }
 0x154   : > { %v1290_v1 = vpop.permute.xlu1 %1289 }
 0x155   : > { %v1288_v15 = vpop.permute.xlu0 %1287  ;;  %v1294_v9 = vadd.f32 %v1290_v1, %v1274_v50  ;;  %v2003_v50 = vstv %s3668_s6  ;;  %v1970_v41 = vsel %vm289_vm3, %v1968_v58, %v1969_v14 }
 0x156   : > { %v1293_v31 = vadd.f32 %v1288_v15, %v1273_v56  ;;  %1871 = vrot.lane.b32.xlu1 %v1868_v21, %s2450_s14  ;;  %v1950_v56 = vsel %vm289_vm3, %v1948_v36, %v1949_v48  ;;  %v2005_v1 = vmul.f32 %v3590_v61, %v2003_v50  ;;  %v2006_v15 = vmul.f32 %v3594_v57, %v2003_v50 }
 0x157   : > { %1869 = vrot.lane.b32.xlu0 %v1866_v0, %s2450_s14 }
 0x158   : > { %v1312_v6 = vpop.permute.xlu1 %1311  ;;  %v2011_v33 = vrot.slane %v2005_v1, 5 }
 0x159   : > { %v1310_v12 = vpop.permute.xlu0 %1309  ;;  %v1316_v16 = vadd.f32 %v1312_v6, %v1294_v9  ;;  %v2004_v9 = vmul.f32 %v3598_v52, %v2003_v50  ;;  %v2013_v6 = vrot.slane %v2006_v15, 5 }
 0x15a   : > { %v1315_v7 = vadd.f32 %v1310_v12, %v1293_v31  ;;  %1891 = vrot.lane.b32.xlu1 %v1888_v42, %s2450_s14  ;;  %v1972_v31 = vsel %vm289_vm3, %v1969_v14, %v1971_v37  ;;  %v2025_v42 = vstv %s3680_s24 }
 0x15b   : > { %1889 = vrot.lane.b32.xlu0 %v1886_v60, %s2450_s14  ;;  %v2010_v12 = vrot.slane %v2004_v9, 5  ;;  %v2026_v47 = vmul.f32 %v3579_v4, %v2025_v42  ;;  %v2014_v40 = vsel %vm324_vm4, %v2011_v33, %v2013_v6  ;;  %v2048_v4 = vmul.f32 %v3594_v57, %v2045_v53 }
 0x15c   : > { %v1332_v51 = vpop.permute.xlu1 %1331 }
 0x15d   : > { %v1330_v49 = vpop.permute.xlu0 %1329  ;;  %v1336_v11 = vadd.f32 %v1332_v51, %v1316_v16  ;;  %v2027_v16 = vmul.f32 %v3569_v38, %v2025_v42  ;;  %v2012_v25 = vsel %vm324_vm4, %v2010_v12, %v2011_v33  ;;  %v2047_v51 = vmul.f32 %v3590_v61, %v2045_v53 }
 0x15e   : > { %v1335_v5 = vadd.f32 %v1330_v49, %v1315_v7  ;;  %1913 = vrot.lane.b32.xlu1 %v1910_v17, %s2450_s14  ;;  %v1992_v7 = vsel %vm324_vm4, %v1990_v35, %v1991_v26  ;;  %v2028_v17 = vmul.f32 %v3573_v46, %v2025_v42  ;;  %v2032_v46 = vrot.slane %v2026_v47, 6 }
 0x15f   : > { %1911 = vrot.lane.b32.xlu0 %v1908_v23, %s2450_s14  ;;  %v2033_v38 = vrot.slane %v2027_v16, 6  ;;  %v2055_v3 = vrot.slane %v2048_v4, 6 }
 0x160   : > { %v1354_v32 = vpop.permute.xlu1 %1353  ;;  %v2035_v49 = vrot.slane %v2028_v17, 6 }
 0x161   : > { %v1352_v10 = vpop.permute.xlu0 %1351  ;;  %v1358_v45 = vadd.f32 %v1354_v32, %v1336_v11  ;;  %v2046_v11 = vmul.f32 %v3598_v52, %v2045_v53  ;;  %v2034_v30 = vsel %vm359_vm5, %v2032_v46, %v2033_v38 }
 0x162   : > { %v1357_v43 = vadd.f32 %v1352_v10, %v1335_v5  ;;  %1933 = vrot.lane.b32.xlu1 %v1930_v44, %s2450_s14  ;;  %v2053_v44 = vrot.slane %v2047_v51, 6  ;;  %v2036_v48 = vsel %vm359_vm5, %v2033_v38, %v2035_v49 }
 0x163   : > { %1931 = vrot.lane.b32.xlu0 %v1928_v19, %s2450_s14  ;;  %v2052_v19 = vrot.slane %v2046_v11, 6 }
 0x164   : > { %v1374_v24 = vpop.permute.xlu1 %1373  ;;  %v2056_v57 = vsel %vm359_vm5, %v2053_v44, %v2055_v3 }
 0x165   : > { %v1372_v20 = vpop.permute.xlu0 %1371  ;;  %v1378_v21 = vadd.f32 %v1374_v24, %v1358_v45  ;;  %v2054_v52 = vsel %vm359_vm5, %v2052_v19, %v2053_v44 }
 0x166   : > { %v1377_v0 = vadd.f32 %v1372_v20, %v1357_v43  ;;  %1955 = vrot.lane.b32.xlu1 %v1952_v55, %s2450_s14 }
 0x167   : > { %1953 = vrot.lane.b32.xlu0 %v1950_v56, %s2450_s14 }
 0x168   : > { %v1396_v8 = vpop.permute.xlu1 %1395 }
 0x169   : > { %v1394_v29 = vpop.permute.xlu0 %1393  ;;  %v1400_v60 = vadd.f32 %v1396_v8, %v1378_v21 }
 0x16a   : > { %v1399_v34 = vadd.f32 %v1394_v29, %v1377_v0  ;;  %1975 = vrot.lane.b32.xlu1 %v1972_v31, %s2450_s14 }
 0x16b   : > { %1973 = vrot.lane.b32.xlu0 %v1970_v41, %s2450_s14 }
 0x16c   : > { %v1416_v63 = vpop.permute.xlu1 %1415 }
 0x16d   : > { %v1414_v39 = vpop.permute.xlu0 %1413  ;;  %v1420_v23 = vadd.f32 %v1416_v63, %v1400_v60 }
 0x16e   : > { %v1419_v18 = vadd.f32 %v1414_v39, %v1399_v34  ;;  %1997 = vrot.lane.b32.xlu1 %v1994_v2, %s2450_s14 }
 0x16f   : > { %1995 = vrot.lane.b32.xlu0 %v1992_v7, %s2450_s14 }
 0x170   : > { %v1438_v5 = vpop.permute.xlu1 %1437 }
 0x171   : > { %v1436_v54 = vpop.permute.xlu0 %1435  ;;  %v1442_v8 = vadd.f32 %v1438_v5, %v1420_v23 }
 0x172   : > { %2017 = vrot.lane.b32.xlu1 %v2014_v40, %s2450_s14  ;;  %v1441_v29 = vadd.f32 %v1436_v54, %v1419_v18 }
 0x173   : > { %2015 = vrot.lane.b32.xlu0 %v2012_v25, %s2450_s14 }
 0x174   : > { %v1458_v61 = vpop.permute.xlu1 %1457 }
 0x175   : > { %v1456_v36 = vpop.permute.xlu0 %1455  ;;  %v1462_v2 = vadd.f32 %v1458_v61, %v1442_v8 }
 0x176   : > { %2039 = vrot.lane.b32.xlu1 %v2036_v48, %s2450_s14  ;;  %v1461_v33 = vadd.f32 %v1456_v36, %v1441_v29 }
 0x177   : > { %2037 = vrot.lane.b32.xlu0 %v2034_v30, %s2450_s14 }
 0x178   : > { %v1480_v59 = vpop.permute.xlu1 %1479 }
 0x179   : > { %v1478_v22 = vpop.permute.xlu0 %1477  ;;  %v1484_v6 = vadd.f32 %v1480_v59, %v1462_v2 }
 0x17a   : > { %2059 = vrot.lane.b32.xlu1 %v2056_v57, %s2450_s14  ;;  %v1483_v12 = vadd.f32 %v1478_v22, %v1461_v33 }
 0x17b   : > { %2057 = vrot.lane.b32.xlu0 %v2054_v52, %s2450_s14  ;;  %s2382_s14 = sshll.u32 %s2451_s7, 4  ;;  %s2383_s14 = int_to_ptr.vmem [resolvable:$false] %s2382_s14 }
 0x17c   : > { %v1500_v32 = vpop.permute.xlu1 %1499  ;;  %s2384_s16 = scalar_lea.vmem %s2383_s14, 512  ;;  %p2385_p13 = scmp.lt.s32.totalorder %s3729_s29, %s2383_s14 }
 0x17d   : > { %v1498_v10 = vpop.permute.xlu0 %1497  ;;  %v1504_v17 = vadd.f32 %v1500_v32, %v1484_v6  ;;  %p2386_p0 = scmp.lt.s32.totalorder %s2384_s16, %s2378_s13 }
 0x17e   : > { %v1503_v47 = vadd.f32 %v1498_v10, %v1483_v12 }
 0x17f   : > { %p2387_p1 = por %p2386_p0, %p2385_p13 }
 0x180   : > { %v1515_v45 = vpop.permute.xlu1 %1514 }
 0x181   : > { %v1513_v43 = vpop.permute.xlu0 %1512  ;;  %v1519_v53 = vadd.f32 %v1515_v45, %v1504_v17  ;;  %p2388_p2 = pnand %p2387_p1, %p2381_p12 }
 0x182   : > { %v1518_v63 = vadd.f32 %v1513_v43, %v1503_v47 }
 0x184   : > { %v1528_v13 = vpop.permute.xlu1 %1527 }
 0x185   : > { %v1526_v28 = vpop.permute.xlu0 %1525  ;;  %v1532_v25 = vadd.f32 %v1528_v13, %v1519_v53 }
 0x186   : > { %v1531_v38 = vadd.f32 %v1526_v28, %v1518_v63 }
 0x188   : > { %v1550_v55 = vpop.permute.xlu1 %1549 }
 0x189   : > { %v1548_v14 = vpop.permute.xlu0 %1547  ;;  %v1554_v51 = vadd.f32 %v1550_v55, %v1532_v25 }
 0x18a   : > { %v1553_v49 = vadd.f32 %v1548_v14, %v1531_v38 }
 0x18c   : > { %v1570_v50 = vpop.permute.xlu1 %1569 }
 0x18d   : > { %v1568_v56 = vpop.permute.xlu0 %1567  ;;  %v1574_v46 = vadd.f32 %v1570_v50, %v1554_v51 }
 0x18e   : > { %v1573_v4 = vadd.f32 %v1568_v56, %v1553_v49 }
 0x190   : > { %v1592_v37 = vpop.permute.xlu1 %1591 }
 0x191   : > { %v1590_v58 = vpop.permute.xlu0 %1589  ;;  %v1596_v11 = vadd.f32 %v1592_v37, %v1574_v46 }
 0x192   : > { %v1595_v5 = vadd.f32 %v1590_v58, %v1573_v4 }
 0x194   : > { %v1612_v27 = vpop.permute.xlu1 %1611 }
 0x195   : > { %v1610_v24 = vpop.permute.xlu0 %1609  ;;  %v1616_v48 = vadd.f32 %v1612_v27, %v1596_v11 }
 0x196   : > { %v1615_v30 = vadd.f32 %v1610_v24, %v1595_v5 }
 0x198   : > { %v1634_v20 = vpop.permute.xlu1 %1633 }
 0x199   : > { %v1632_v21 = vpop.permute.xlu0 %1631  ;;  %v1638_v3 = vadd.f32 %v1634_v20, %v1616_v48 }
 0x19a   : > { %v1637_v19 = vadd.f32 %v1632_v21, %v1615_v30 }
 0x19c   : > { %v1654_v0 = vpop.permute.xlu1 %1653 }
 0x19d   : > { %v1652_v26 = vpop.permute.xlu0 %1651  ;;  %v1658_v57 = vadd.f32 %v1654_v0, %v1638_v3 }
 0x19e   : > { %v1657_v52 = vadd.f32 %v1652_v26, %v1637_v19 }
 0x1a0   : > { %v1676_v62 = vpop.permute.xlu1 %1675 }
 0x1a1   : > { %v1674_v1 = vpop.permute.xlu0 %1673  ;;  %v1680_v59 = vadd.f32 %v1676_v62, %v1658_v57 }
 0x1a2   : > { %v1679_v22 = vadd.f32 %v1674_v1, %v1657_v52 }
 0x1a4   : > { %v1696_v15 = vpop.permute.xlu1 %1695 }
 0x1a5   : > { %v1694_v9 = vpop.permute.xlu0 %1693  ;;  %v1700_v45 = vadd.f32 %v1696_v15, %v1680_v59 }
 0x1a6   : > { %v1699_v43 = vadd.f32 %v1694_v9, %v1679_v22 }
 0x1a8   : > { %v1718_v31 = vpop.permute.xlu1 %1717 }
 0x1a9   : > { %v1716_v41 = vpop.permute.xlu0 %1715  ;;  %v1722_v13 = vadd.f32 %v1718_v31, %v1700_v45 }
 0x1aa   : > { %v1721_v28 = vadd.f32 %v1716_v41, %v1699_v43 }
 0x1ac   : > { %v1738_v35 = vpop.permute.xlu1 %1737 }
 0x1ad   : > { %v1736_v42 = vpop.permute.xlu0 %1735  ;;  %v1742_v50 = vadd.f32 %v1738_v35, %v1722_v13 }
 0x1ae   : > { %v1741_v56 = vadd.f32 %v1736_v42, %v1721_v28 }
 0x1b0   : > { %v1760_v60 = vpop.permute.xlu1 %1759 }
 0x1b1   : > { %v1758_v34 = vpop.permute.xlu0 %1757  ;;  %v1764_v37 = vadd.f32 %v1760_v60, %v1742_v50 }
 0x1b2   : > { %v1763_v58 = vadd.f32 %v1758_v34, %v1741_v56 }
 0x1b4   : > { %v1780_v16 = vpop.permute.xlu1 %1779 }
 0x1b5   : > { %v1778_v7 = vpop.permute.xlu0 %1777  ;;  %v1784_v20 = vadd.f32 %v1780_v16, %v1764_v37 }
 0x1b6   : > { %v1783_v21 = vadd.f32 %v1778_v7, %v1763_v58 }
 0x1b8   : > { %v1795_v39 = vpop.permute.xlu1 %1794 }
 0x1b9   : > { %v1793_v40 = vpop.permute.xlu0 %1792  ;;  %v1799_v0 = vadd.f32 %v1795_v39, %v1784_v20 }
 0x1ba   : > { %v1798_v26 = vadd.f32 %v1793_v40, %v1783_v21 }
 0x1bc   : > { %v1808_v23 = vpop.permute.xlu1 %1807 }
 0x1bd   : > { %v1806_v18 = vpop.permute.xlu0 %1805  ;;  %v1812_v8 = vadd.f32 %v1808_v23, %v1799_v0 }
 0x1be   : > { %v1811_v29 = vadd.f32 %v1806_v18, %v1798_v26 }
 0x1c0   : > { %v1830_v54 = vpop.permute.xlu1 %1829 }
 0x1c1   : > { %v1828_v44 = vpop.permute.xlu0 %1827  ;;  %v1834_v15 = vadd.f32 %v1830_v54, %v1812_v8 }
 0x1c2   : > { %v1833_v9 = vadd.f32 %v1828_v44, %v1811_v29 }
 0x1c4   : > { %v1850_v61 = vpop.permute.xlu1 %1849 }
 0x1c5   : > { %v1848_v36 = vpop.permute.xlu0 %1847  ;;  %v1854_v2 = vadd.f32 %v1850_v61, %v1834_v15 }
 0x1c6   : > { %v1853_v33 = vadd.f32 %v1848_v36, %v1833_v9 }
 0x1c8   : > { %v1872_v32 = vpop.permute.xlu1 %1871 }
 0x1c9   : > { %v1870_v10 = vpop.permute.xlu0 %1869  ;;  %v1876_v35 = vadd.f32 %v1872_v32, %v1854_v2 }
 0x1ca   : > { %v1875_v42 = vadd.f32 %v1870_v10, %v1853_v33 }
 0x1cc   : > { %v1892_v55 = vpop.permute.xlu1 %1891 }
 0x1cd   : > { %v1890_v14 = vpop.permute.xlu0 %1889  ;;  %v1896_v6 = vadd.f32 %v1892_v55, %v1876_v35 }
 0x1ce   : > { %v1895_v12 = vadd.f32 %v1890_v14, %v1875_v42 }
 0x1d0   : > { %v1914_v27 = vpop.permute.xlu1 %1913 }
 0x1d1   : > { %v1912_v24 = vpop.permute.xlu0 %1911  ;;  %v1918_v16 = vadd.f32 %v1914_v27, %v1896_v6 }
 0x1d2   : > { %v1917_v7 = vadd.f32 %v1912_v24, %v1895_v12 }
 0x1d4   : > { %v1934_v62 = vpop.permute.xlu1 %1933 }
 0x1d5   : > { %v1932_v1 = vpop.permute.xlu0 %1931  ;;  %v1938_v53 = vadd.f32 %v1934_v62, %v1918_v16 }
 0x1d6   : > { %v1937_v63 = vadd.f32 %v1932_v1, %v1917_v7 }
 0x1d8   : > { %v1956_v31 = vpop.permute.xlu1 %1955 }
 0x1d9   : > { %v1954_v41 = vpop.permute.xlu0 %1953  ;;  %v1960_v39 = vadd.f32 %v1956_v31, %v1938_v53 }
 0x1da   : > { %v1959_v40 = vadd.f32 %v1954_v41, %v1937_v63 }
 0x1dc   : > { %v1976_v60 = vpop.permute.xlu1 %1975 }
 0x1dd   : > { %v1974_v34 = vpop.permute.xlu0 %1973  ;;  %v1980_v51 = vadd.f32 %v1976_v60, %v1960_v39 }
 0x1de   : > { %v1979_v49 = vadd.f32 %v1974_v34, %v1959_v40 }
 0x1e0   : > { %v1998_v17 = vpop.permute.xlu1 %1997 }
 0x1e1   : > { %v1996_v47 = vpop.permute.xlu0 %1995  ;;  %v2002_v23 = vadd.f32 %v1998_v17, %v1980_v51 }
 0x1e2   : > { %v2001_v18 = vadd.f32 %v1996_v47, %v1979_v49 }
 0x1e4   : > { %v2018_v25 = vpop.permute.xlu1 %2017 }
 0x1e5   : > { %v2016_v38 = vpop.permute.xlu0 %2015  ;;  %v2022_v11 = vadd.f32 %v2018_v25, %v2002_v23 }
 0x1e6   : > { %v2021_v5 = vadd.f32 %v2016_v38, %v2001_v18 }
 0x1e8   : > { %v2040_v46 = vpop.permute.xlu1 %2039 }
 0x1e9   : > { %v2038_v4 = vpop.permute.xlu0 %2037  ;;  %v2044_v54 = vadd.f32 %v2040_v46, %v2022_v11 }
 0x1ea   : > { %v2043_v44 = vadd.f32 %v2038_v4, %v2021_v5 }
 0x1ec   : > { %v2060_v48 = vpop.permute.xlu1 %2059 }
 0x1ed   : > { %v2058_v30 = vpop.permute.xlu0 %2057  ;;  %v2064_v3 = vadd.f32 %v2060_v48, %v2044_v54 }
 0x1ee   : > { %v2063_v19 = vadd.f32 %v2058_v30, %v2043_v44 }
 0x1ef   : > { %v2277_v61 = vmul.f32 -1.442695, %v2064_v3 }
 0x1f0   : > { %v2276_v36 = vmul.f32 -1.442695, %v2063_v19 }
 0x1f1   : > { %2343 = vpow2.f32 %v2277_v61 }
 0x1f2   : > { %2345 = vpow2.f32 %v2276_v36 }
 0x1fe   : > { %v2344_v57 = vpop.eup %2343 }
 0x1ff   : > { %v2346_v52 = vpop.eup %2345  ;;  %v2072_v59 = vadd.f32 1.0, %v2344_v57 }
 0x200   : > { %v2071_v22 = vadd.f32 1.0, %v2346_v52 }
 0x201   : > { %2347 = vrcp.f32 %v2072_v59 }
 0x202   : > { %2349 = vrcp.f32 %v2071_v22 }
 0x20e   : > { %v2348_v32 = vpop.eup %2347 }
 0x20f   : > { %v2350_v10 = vpop.eup %2349  ;;  %2079 = vst.msk [vmem:[%s150_s26 + $0x8] sm:$0xff] %vm2077_vm6, %v2348_v32 }
 0x210   : > { %2078 = vst.msk [vmem:[%s150_s26] sm:$0xff] %vm2077_vm6, %v2350_v10 }
 0x211   : > { %2391 = shalt.err (!%p2388_p2)
}
 0x212   : > { %s2392_s17 = scalar_lea.hbm %s3727_s5, 256  ;;  %s2396_s23 = scalar_lea.hbm %s3773_s2, 512 }
 0x213   : > { %p2393_p3 = scmp.ne.s32.totalorder %s3727_s5, %s2392_s17  ;;  %p2397_p8 = scmp.lt.s32.totalorder %s3727_s5, %s3773_s2 }
 0x214   : > { %p2398_p11 = scmp.lt.s32.totalorder %s2396_s23, %s2392_s17 }
 0x215   : > { %p2394_p4 = pnand %p2393_p3, %p2507_p5 }
 0x216   : > { %p2399_p9 = por %p2398_p11, %p2397_p8 }
 0x217   : > { %p2395_p7 = pneg %p2394_p4 }
 0x219   : > { %p2400_p10 = pnand %p2399_p9, %p2395_p7 }
 0x21b   : > { %2403 = shalt.err (!%p2400_p10)
}
 0x21c   : > { %s2452_s25 = smov 128   ;;  %s2453_s27 = smov 8  }
 0x21d   : > { %2289 = dma.vmem_to_hbm [thread:$0]  (%p2507_p5), %s3729_s29, 256, %s3727_s5, %s3731_s8, %s2452_s25, %s2452_s25, %s2453_s27  }
 0x21e PF: > { %p2301_p12 = scmp.ge.s32.totalorder %s2442_s12, 2  ;;  %s2109_s28 = sand.u32 1, %s2430_s9  }
 0x21f   : > { %s2110_s30 = scalar_lea.sflag [#allocation3], %s2109_s28 }
 0x220   : > { %p2296_p13 = pnand %p2301_p12, %p2511_p6 }
 0x222   : > { %p2297_p0 = pneg %p2296_p13 }
 0x224   : > { %2425 = dma.done.wait (%p2297_p0), %s2110_s30, 256  }
 0x225   : > { %2427 = vsyncadd (%p2297_p0), %s2110_s30, 4294967040  ;;  %p13_p1 = scmp.ge.s32.totalorder %s2494_s15, 4   ;;  %s3783_s9 = smov %s2434_s10 }
 0x226   : > { %s3784_s10 = smov %s2438_s11  ;;  %s3785_s11 = smov %s2505_s18 }
 0x227   : > { %s3786_s12 = smov %s2494_s15  ;;  %15 = sbr.rel (!%p13_p1) target bundleno = 4 (0x4), region = 69 }
 0x22c   :  { %2115 = vsyncpa [#allocation3], 1 }
 0x22d   :  { %2117 = vsyncpa [#allocation3 + $0x1], 1 }
 0x22e   :  { %2118 = vsyncpa [#allocation4], 1 }
 0x22f   :  { %2120 = vsyncpa [#allocation4 + $0x1], 1 }

</bundles_post_ra>
